<compile_context>
chip_gen: v7x
topology: tpu7x:2x2x1
jax: 0.10.0
libtpu: 0.0.40
codegen_flags: <defaults>
</compile_context>

<pallas_src>
import functools

import jax
import jax.numpy as jnp
import numpy as np
from jax.experimental import pallas as pl
from jax.experimental.pallas import tpu as pltpu

GB = 128       # per-gate lane block (r | z | n each padded to a full vreg width)
GP = 3 * GB    # packed gate width


# ----------------------------------------------------------------------------
# Single fused kernel: all GRU layers + bidirectional sum + head.
# ----------------------------------------------------------------------------
def _fused_disc_kernel(n_layers, T, Bp, B, H, *refs):
    x_ref = refs[0]                            # (T*Bp, F)   time-major slab
    layer_refs = refs[1:1 + 5 * n_layers]      # (w_a, w_b, whh, bias, bhh_n)*L
    plane_ref = refs[1 + 5 * n_layers]         # (T, 2H)     scheduled head plane
    const_ref = refs[2 + 5 * n_layers]         # (1, 1)      SMEM scalar
    o_ref = refs[3 + 5 * n_layers]             # (B, 1)
    gp_scr = refs[4 + 5 * n_layers]            # (T*Bp, GP)  VMEM scratch
    gq_scr = refs[5 + 5 * n_layers]            # (T*Bp, GP)  VMEM scratch
    ys_scr = refs[6 + 5 * n_layers]            # (T*Bp, 2H)  VMEM scratch

    H2 = 2 * H
    acc = jnp.zeros((Bp, H2), jnp.float32)     # fused-head accumulator

    for layer in range(n_layers):
        w_a = layer_refs[5 * layer + 0]
        w_b = layer_refs[5 * layer + 1]
        whh_ref = layer_refs[5 * layer + 2]
        bias_ref = layer_refs[5 * layer + 3]
        bhhn_ref = layer_refs[5 * layer + 4]

        # Hoisted input projection for both directions and all time steps
        # (one MXU matmul per direction per layer).  Results -> VMEM scratch.
        slab = x_ref[...] if layer == 0 else ys_scr[...]
        gp_scr[...] = (jnp.dot(slab, w_a[...],
                               preferred_element_type=jnp.float32) + bias_ref[...])
        gq_scr[...] = jnp.dot(slab, w_b[...],
                              preferred_element_type=jnp.float32)

        whh = whh_ref[...]        # (2H, GP) block-diagonal over directions
        bhh_n = bhhn_ref[...]     # (1, 2H)
        last = layer == n_layers - 1

        # Both directions advance together: lanes [0:H] = forward state at
        # time t, lanes [H:2H] = backward state at time T-1-t.
        h = jnp.zeros((Bp, H2), jnp.float32)
        for t in range(T):                     # static unroll (T is small)
            tb = T - 1 - t
            gi = (gp_scr[t * Bp:(t + 1) * Bp, :]
                  + gq_scr[tb * Bp:(tb + 1) * Bp, :])
            gh = jnp.dot(h, whh, preferred_element_type=jnp.float32)
            # Gate slices start at lanes 0 / 128 / 256 -> vreg-aligned.
            r = jax.nn.sigmoid(gi[:, 0:H2] + gh[:, 0:H2])
            z = jax.nn.sigmoid(gi[:, GB:GB + H2] + gh[:, GB:GB + H2])
            n = jnp.tanh(gi[:, 2 * GB:2 * GB + H2]
                         + r * (gh[:, 2 * GB:2 * GB + H2] + bhh_n))
            h = (1.0 - z) * n + z * h
            if last:
                # Head fused into the recurrence: o = sigmoid(sum acc + const).
                acc = acc + h * plane_ref[t:t + 1, :]
            else:
                ys_scr[t * Bp:(t + 1) * Bp, :] = h   # scheduled storage

    out = jax.nn.sigmoid(jnp.sum(acc, axis=-1, keepdims=True) + const_ref[0, 0])
    o_ref[...] = out[:B, :]


# ----------------------------------------------------------------------------
# One-time parameter packing (kept OUT of the per-call wrapper).
# ----------------------------------------------------------------------------
def pack_params(params, hidden_size, n_poses):
    H, T, H2 = hidden_size, n_poses, 2 * hidden_size
    layers = []
    for layer, layer_params in enumerate(params["gru"]):
        wih_f, whh_f, bih_f, bhh_f = [np.asarray(a, np.float32) for a in layer_params[0]]
        wih_b, whh_b, bih_b, bhh_b = [np.asarray(a, np.float32) for a in layer_params[1]]
        in_dim = wih_f.shape[1] if layer == 0 else H2
        w_a = np.zeros((in_dim, GP), np.float32)
        w_b = np.zeros((in_dim, GP), np.float32)
        whh = np.zeros((H2, GP), np.float32)
        bias = np.zeros((1, GP), np.float32)
        bhh_n = np.zeros((1, H2), np.float32)
        for g in range(3):                      # r, z, n
            c0 = g * GB                         # fwd gate columns  [c0, c0+H)
            c1 = g * GB + H                     # bwd gate columns  [c1, c1+H)
            rows = slice(g * H, (g + 1) * H)
            if layer == 0:
                w_a[:, c0:c0 + H] = wih_f[rows, :].T
                w_b[:, c1:c1 + H] = wih_b[rows, :].T
            else:
                # Previous-layer states are stored "scheduled": row-block t
                # holds [fwd(t) | bwd(T-1-t)].  W_A applies to row-block t,
                # W_B to row-block T-1-t; their sum reproduces
                # x_t @ W_ih_f.T (fwd cols) and x_{T-1-t} @ W_ih_b.T (bwd cols).
                w_a[0:H, c0:c0 + H] = wih_f[rows, 0:H].T
                w_a[H:H2, c1:c1 + H] = wih_b[rows, H:H2].T
                w_b[0:H, c1:c1 + H] = wih_b[rows, 0:H].T
                w_b[H:H2, c0:c0 + H] = wih_f[rows, H:H2].T
            whh[0:H, c0:c0 + H] = whh_f[rows, :].T
            whh[H:H2, c1:c1 + H] = whh_b[rows, :].T
            bias[0, c0:c0 + H] = bih_f[rows]
            bias[0, c1:c1 + H] = bih_b[rows]
            if g < 2:   # b_hh of r and z gates folds into the input bias
                bias[0, c0:c0 + H] += bhh_f[rows]
                bias[0, c1:c1 + H] += bhh_b[rows]
        bhh_n[0, 0:H] = bhh_f[2 * H:3 * H]
        bhh_n[0, H:H2] = bhh_b[2 * H:3 * H]
        layers.append(tuple(jnp.asarray(a) for a in (w_a, w_b, whh, bias, bhh_n)))

    w1 = np.asarray(params["out_w"], np.float32).reshape(H)
    b1 = float(np.asarray(params["out_b"], np.float32).reshape(()))
    w2 = np.asarray(params["out2_w"], np.float32).reshape(T)
    b2 = float(np.asarray(params["out2_b"], np.float32).reshape(()))
    plane = np.zeros((T, H2), np.float32)
    for t in range(T):
        plane[t, 0:H] = w2[t] * w1              # multiplies fwd state (time t)
        plane[t, H:H2] = w2[T - 1 - t] * w1     # multiplies bwd state (time T-1-t)
    const = np.array([[b1 * w2.sum() + b2]], np.float32)
    return {"layers": layers, "plane": jnp.asarray(plane), "const": jnp.asarray(const)}


# ----------------------------------------------------------------------------
# Per-call wrapper: only transposes/pads poses and launches ONE pallas_call.
# ----------------------------------------------------------------------------
def discriminator_forward(poses, packed, hidden_size):
    B, T, F = poses.shape
    H = hidden_size
    n_layers = len(packed["layers"])
    Bp = ((B + 7) // 8) * 8     # pad batch to a sublane tile -> aligned accesses

    x = jnp.transpose(poses.astype(jnp.float32), (1, 0, 2))      # (T, B, F)
    x = jnp.pad(x, ((0, 0), (0, Bp - B), (0, 0)))                 # (T, Bp, F)
    x_slab = x.reshape(T * Bp, F)

    inputs = [x_slab]
    for lp in packed["layers"]:
        inputs.extend(lp)
    inputs += [packed["plane"], packed["const"]]

    vmem = pl.BlockSpec(memory_space=pltpu.MemorySpace.VMEM)
    smem = pl.BlockSpec(memory_space=pltpu.MemorySpace.SMEM)
    in_specs = [vmem] * (len(inputs) - 1) + [smem]

    kernel = functools.partial(_fused_disc_kernel, n_layers, T, Bp, B, H)
    return pl.pallas_call(
        kernel,
        out_shape=jax.ShapeDtypeStruct((B, 1), jnp.float32),
        in_specs=in_specs,
        out_specs=vmem,
        scratch_shapes=[
            pltpu.VMEM((T * Bp, GP), jnp.float32),     # gp: fwd-scheduled proj
            pltpu.VMEM((T * Bp, GP), jnp.float32),     # gq: bwd-scheduled proj
            pltpu.VMEM((T * Bp, 2 * H), jnp.float32),  # ys: inter-layer states
        ],
    )(*inputs)


# ----------------------------------------------------------------------------
# Pure-JAX reference (lax.scan) for verification.
# ----------------------------------------------------------------------------
def _gru_cell_ref(h, x_t, w_ih, w_hh, b_ih, b_hh):
    H = h.shape[-1]
    gi = x_t @ w_ih.T + b_ih
    gh = h @ w_hh.T + b_hh
    r = jax.nn.sigmoid(gi[:, :H] + gh[:, :H])
    z = jax.nn.sigmoid(gi[:, H:2 * H] + gh[:, H:2 * H])
    n = jnp.tanh(gi[:, 2 * H:] + r * gh[:, 2 * H:])
    return (1.0 - z) * n + z * h


def reference_forward(poses, params, hidden_size):
    B, T, F = poses.shape
    x = poses.astype(jnp.float32)
    for layer_params in params["gru"]:
        outs = []
        for d, rev in ((0, False), (1, True)):
            w_ih, w_hh, b_ih, b_hh = layer_params[d]
            seq = x[:, ::-1] if rev else x
            h0 = jnp.zeros((B, hidden_size), jnp.float32)

            def step(h, x_t, w_ih=w_ih, w_hh=w_hh, b_ih=b_ih, b_hh=b_hh):
                h2 = _gru_cell_ref(h, x_t, w_ih, w_hh, b_ih, b_hh)
                return h2, h2

            _, ys = jax.lax.scan(step, h0, jnp.swapaxes(seq, 0, 1))
            ys = jnp.swapaxes(ys, 0, 1)
            if rev:
                ys = ys[:, ::-1]
            outs.append(ys)
        x = jnp.concatenate(outs, axis=-1)
    s = x[..., :hidden_size] + x[..., hidden_size:]
    v = s.reshape(-1, hidden_size) @ params["out_w"].T + params["out_b"]
    v = v.reshape(B, -1)
    o = v @ params["out2_w"].T + params["out2_b"]
    return jax.nn.sigmoid(o)


# ----------------------------------------------------------------------------
# Deterministic parameter init (PyTorch-style uniform(-1/sqrt(H), 1/sqrt(H))).
# ----------------------------------------------------------------------------
def init_params(key, input_size, hidden_size, n_layers, n_poses):
    H = hidden_size
    k_gru = 1.0 / np.sqrt(H)
    gru = []
    for layer in range(n_layers):
        in_dim = input_size if layer == 0 else 2 * H
        dirs = []
        for _ in range(2):  # fwd, bwd
            key, k1, k2, k3, k4 = jax.random.split(key, 5)
            w_ih = jax.random.uniform(k1, (3 * H, in_dim), jnp.float32, -k_gru, k_gru)
            w_hh = jax.random.uniform(k2, (3 * H, H), jnp.float32, -k_gru, k_gru)
            b_ih = jax.random.uniform(k3, (3 * H,), jnp.float32, -k_gru, k_gru)
            b_hh = jax.random.uniform(k4, (3 * H,), jnp.float32, -k_gru, k_gru)
            dirs.append((w_ih, w_hh, b_ih, b_hh))
        gru.append(tuple(dirs))
    key, k1, k2, k3, k4 = jax.random.split(key, 5)
    k_out = 1.0 / np.sqrt(H)
    k_out2 = 1.0 / np.sqrt(n_poses)
    return {
        "gru": gru,
        "out_w": jax.random.uniform(k1, (1, H), jnp.float32, -k_out, k_out),
        "out_b": jax.random.uniform(k2, (1,), jnp.float32, -k_out, k_out),
        "out2_w": jax.random.uniform(k3, (1, n_poses), jnp.float32, -k_out2, k_out2),
        "out2_b": jax.random.uniform(k4, (1,), jnp.float32, -k_out2, k_out2),
    }


if __name__ == "__main__":
    # Small shapes consistent with the module:
    #   batch=2, n_poses(T)=8, pose feature size=4, hidden_size=32, n_layers=2
    B, T, F = 2, 8, 4
    HIDDEN = 32
    N_LAYERS = 2

    key = jax.random.PRNGKey(0)
    key, pkey = jax.random.split(key)
    poses = jax.random.normal(pkey, (B, T, F), jnp.float32)

    params = init_params(key, F, HIDDEN, N_LAYERS, T)
    packed = pack_params(params, HIDDEN, T)          # one-time packing

    fwd = jax.jit(functools.partial(discriminator_forward, hidden_size=HIDDEN))
    out = jax.block_until_ready(fwd(poses, packed))

    ref = jax.block_until_ready(reference_forward(poses, params, HIDDEN))
    assert out.shape == (B, 1)
    np.testing.assert_allclose(np.asarray(out), np.asarray(ref),
                               rtol=1e-4, atol=1e-4)

    print("KERNEL_OK")
</pallas_src>

<mosaic_0001>
module attributes {stable_mosaic.version = 11 : i64} {
  func.func @_fused_disc_kernel(%arg0: memref<64x4xf32, #tpu.memory_space<vmem>>, %arg1: memref<4x384xf32, #tpu.memory_space<vmem>>, %arg2: memref<4x384xf32, #tpu.memory_space<vmem>>, %arg3: memref<64x384xf32, #tpu.memory_space<vmem>>, %arg4: memref<1x384xf32, #tpu.memory_space<vmem>>, %arg5: memref<1x64xf32, #tpu.memory_space<vmem>>, %arg6: memref<64x384xf32, #tpu.memory_space<vmem>>, %arg7: memref<64x384xf32, #tpu.memory_space<vmem>>, %arg8: memref<64x384xf32, #tpu.memory_space<vmem>>, %arg9: memref<1x384xf32, #tpu.memory_space<vmem>>, %arg10: memref<1x64xf32, #tpu.memory_space<vmem>>, %arg11: memref<8x64xf32, #tpu.memory_space<vmem>>, %arg12: memref<1x1xf32, #tpu.memory_space<smem>>, %arg13: memref<2x1xf32, #tpu.memory_space<vmem>>, %arg14: memref<64x384xf32, #tpu.memory_space<vmem>>, %arg15: memref<64x384xf32, #tpu.memory_space<vmem>>, %arg16: memref<64x64xf32, #tpu.memory_space<vmem>>) attributes {dimension_semantics = [], scalar_prefetch = 0 : i64, scratch_operands = 3 : i64, tpu.core_type = #tpu.core_type<tc>} {
    %cst = arith.constant 0.000000e+00 : f32
    %0 = vector.broadcast %cst : f32 to vector<8x64xf32>
    %c0 = arith.constant 0 : index
    %c0_0 = arith.constant 0 : index
    %1 = vector.load %arg0[%c0, %c0_0] : memref<64x4xf32, #tpu.memory_space<vmem>>, vector<64x4xf32>
    %c0_1 = arith.constant 0 : index
    %c0_2 = arith.constant 0 : index
    %2 = vector.load %arg1[%c0_1, %c0_2] : memref<4x384xf32, #tpu.memory_space<vmem>>, vector<4x384xf32>
    %cst_3 = arith.constant dense<0.000000e+00> : vector<64x384xf32>
    %3 = tpu.matmul %1, %2, %cst_3 {dimension_numbers = #tpu.dot_dimension_numbers<[1], [0], [0], [1], [0, 0, 1, 1], [], []>} : vector<64x4xf32>, vector<4x384xf32>, vector<64x384xf32> -> vector<64x384xf32>
    %c0_4 = arith.constant 0 : index
    %c0_5 = arith.constant 0 : index
    %4 = vector.load %arg4[%c0_4, %c0_5] : memref<1x384xf32, #tpu.memory_space<vmem>>, vector<1x384xf32>
    %5 = vector.broadcast %4 : vector<1x384xf32> to vector<64x384xf32>
    %6 = arith.addf %3, %5 : vector<64x384xf32>
    %c0_6 = arith.constant 0 : index
    %c0_7 = arith.constant 0 : index
    %7 = vector.load %arg14[%c0_6, %c0_7] : memref<64x384xf32, #tpu.memory_space<vmem>>, vector<64x384xf32>
    tpu.vector_store %arg14[%c0_6, %c0_7], %6 {strides = array<i32>} : memref<64x384xf32, #tpu.memory_space<vmem>>, vector<64x384xf32>,
    %c0_8 = arith.constant 0 : index
    %c0_9 = arith.constant 0 : index
    %8 = vector.load %arg2[%c0_8, %c0_9] : memref<4x384xf32, #tpu.memory_space<vmem>>, vector<4x384xf32>
    %cst_10 = arith.constant dense<0.000000e+00> : vector<64x384xf32>
    %9 = tpu.matmul %1, %8, %cst_10 {dimension_numbers = #tpu.dot_dimension_numbers<[1], [0], [0], [1], [0, 0, 1, 1], [], []>} : vector<64x4xf32>, vector<4x384xf32>, vector<64x384xf32> -> vector<64x384xf32>
    %c0_11 = arith.constant 0 : index
    %c0_12 = arith.constant 0 : index
    %10 = vector.load %arg15[%c0_11, %c0_12] : memref<64x384xf32, #tpu.memory_space<vmem>>, vector<64x384xf32>
    tpu.vector_store %arg15[%c0_11, %c0_12], %9 {strides = array<i32>} : memref<64x384xf32, #tpu.memory_space<vmem>>, vector<64x384xf32>,
    %c0_13 = arith.constant 0 : index
    %c0_14 = arith.constant 0 : index
    %11 = vector.load %arg3[%c0_13, %c0_14] : memref<64x384xf32, #tpu.memory_space<vmem>>, vector<64x384xf32>
    %c0_15 = arith.constant 0 : index
    %c0_16 = arith.constant 0 : index
    %12 = vector.load %arg5[%c0_15, %c0_16] : memref<1x64xf32, #tpu.memory_space<vmem>>, vector<1x64xf32>
    %cst_17 = arith.constant 0.000000e+00 : f32
    %13 = vector.broadcast %cst_17 : f32 to vector<8x64xf32>
    %c0_18 = arith.constant 0 : index
    %c0_19 = arith.constant 0 : index
    %14 = vector.load %arg14[%c0_18, %c0_19] : memref<64x384xf32, #tpu.memory_space<vmem>>, vector<8x384xf32>
    %c56 = arith.constant 56 : index
    %c0_20 = arith.constant 0 : index
    %15 = vector.load %arg15[%c56, %c0_20] : memref<64x384xf32, #tpu.memory_space<vmem>>, vector<8x384xf32>
    %16 = arith.addf %14, %15 : vector<8x384xf32>
    %cst_21 = arith.constant dense<0.000000e+00> : vector<8x384xf32>
    %17 = tpu.matmul %13, %11, %cst_21 {dimension_numbers = #tpu.dot_dimension_numbers<[1], [0], [0], [1], [0, 0, 1, 1], [], []>} : vector<8x64xf32>, vector<64x384xf32>, vector<8x384xf32> -> vector<8x384xf32>
    %18 = vector.extract_strided_slice %16 {offsets = [0, 0], sizes = [8, 64], strides = [1, 1]} : vector<8x384xf32> to vector<8x64xf32>
    %19 = vector.extract_strided_slice %17 {offsets = [0, 0], sizes = [8, 64], strides = [1, 1]} : vector<8x384xf32> to vector<8x64xf32>
    %20 = arith.addf %18, %19 : vector<8x64xf32>
    %21 = arith.negf %20 : vector<8x64xf32>
    %22 = math.exp %21 : vector<8x64xf32>
    %cst_22 = arith.constant 1.000000e+00 : f32
    %23 = vector.broadcast %cst_22 : f32 to vector<8x64xf32>
    %24 = arith.addf %23, %22 : vector<8x64xf32>
    %25 = arith.divf %23, %24 : vector<8x64xf32>
    %26 = vector.extract_strided_slice %16 {offsets = [0, 128], sizes = [8, 64], strides = [1, 1]} : vector<8x384xf32> to vector<8x64xf32>
    %27 = vector.extract_strided_slice %17 {offsets = [0, 128], sizes = [8, 64], strides = [1, 1]} : vector<8x384xf32> to vector<8x64xf32>
    %28 = arith.addf %26, %27 : vector<8x64xf32>
    %29 = arith.negf %28 : vector<8x64xf32>
    %30 = math.exp %29 : vector<8x64xf32>
    %cst_23 = arith.constant 1.000000e+00 : f32
    %31 = vector.broadcast %cst_23 : f32 to vector<8x64xf32>
    %32 = arith.addf %31, %30 : vector<8x64xf32>
    %33 = arith.divf %31, %32 : vector<8x64xf32>
    %34 = vector.extract_strided_slice %16 {offsets = [0, 256], sizes = [8, 64], strides = [1, 1]} : vector<8x384xf32> to vector<8x64xf32>
    %35 = vector.extract_strided_slice %17 {offsets = [0, 256], sizes = [8, 64], strides = [1, 1]} : vector<8x384xf32> to vector<8x64xf32>
    %36 = vector.broadcast %12 : vector<1x64xf32> to vector<8x64xf32>
    %37 = arith.addf %35, %36 : vector<8x64xf32>
    %38 = arith.mulf %25, %37 : vector<8x64xf32>
    %39 = arith.addf %34, %38 : vector<8x64xf32>
    %40 = math.tanh %39 : vector<8x64xf32>
    %cst_24 = arith.constant 1.000000e+00 : f32
    %41 = vector.broadcast %cst_24 : f32 to vector<8x64xf32>
    %42 = arith.subf %41, %33 : vector<8x64xf32>
    %43 = arith.mulf %42, %40 : vector<8x64xf32>
    %44 = arith.mulf %33, %13 : vector<8x64xf32>
    %45 = arith.addf %43, %44 : vector<8x64xf32>
    %c0_25 = arith.constant 0 : index
    %c0_26 = arith.constant 0 : index
    %46 = vector.load %arg16[%c0_25, %c0_26] : memref<64x64xf32, #tpu.memory_space<vmem>>, vector<8x64xf32>
    tpu.vector_store %arg16[%c0_25, %c0_26], %45 {strides = array<i32>} : memref<64x64xf32, #tpu.memory_space<vmem>>, vector<8x64xf32>,
    %c8 = arith.constant 8 : index
    %c0_27 = arith.constant 0 : index
    %47 = vector.load %arg14[%c8, %c0_27] : memref<64x384xf32, #tpu.memory_space<vmem>>, vector<8x384xf32>
    %c48 = arith.constant 48 : index
    %c0_28 = arith.constant 0 : index
    %48 = vector.load %arg15[%c48, %c0_28] : memref<64x384xf32, #tpu.memory_space<vmem>>, vector<8x384xf32>
    %49 = arith.addf %47, %48 : vector<8x384xf32>
    %cst_29 = arith.constant dense<0.000000e+00> : vector<8x384xf32>
    %50 = tpu.matmul %45, %11, %cst_29 {dimension_numbers = #tpu.dot_dimension_numbers<[1], [0], [0], [1], [0, 0, 1, 1], [], []>} : vector<8x64xf32>, vector<64x384xf32>, vector<8x384xf32> -> vector<8x384xf32>
    %51 = vector.extract_strided_slice %49 {offsets = [0, 0], sizes = [8, 64], strides = [1, 1]} : vector<8x384xf32> to vector<8x64xf32>
    %52 = vector.extract_strided_slice %50 {offsets = [0, 0], sizes = [8, 64], strides = [1, 1]} : vector<8x384xf32> to vector<8x64xf32>
    %53 = arith.addf %51, %52 : vector<8x64xf32>
    %54 = arith.negf %53 : vector<8x64xf32>
    %55 = math.exp %54 : vector<8x64xf32>
    %cst_30 = arith.constant 1.000000e+00 : f32
    %56 = vector.broadcast %cst_30 : f32 to vector<8x64xf32>
    %57 = arith.addf %56, %55 : vector<8x64xf32>
    %58 = arith.divf %56, %57 : vector<8x64xf32>
    %59 = vector.extract_strided_slice %49 {offsets = [0, 128], sizes = [8, 64], strides = [1, 1]} : vector<8x384xf32> to vector<8x64xf32>
    %60 = vector.extract_strided_slice %50 {offsets = [0, 128], sizes = [8, 64], strides = [1, 1]} : vector<8x384xf32> to vector<8x64xf32>
    %61 = arith.addf %59, %60 : vector<8x64xf32>
    %62 = arith.negf %61 : vector<8x64xf32>
    %63 = math.exp %62 : vector<8x64xf32>
    %cst_31 = arith.constant 1.000000e+00 : f32
    %64 = vector.broadcast %cst_31 : f32 to vector<8x64xf32>
    %65 = arith.addf %64, %63 : vector<8x64xf32>
    %66 = arith.divf %64, %65 : vector<8x64xf32>
    %67 = vector.extract_strided_slice %49 {offsets = [0, 256], sizes = [8, 64], strides = [1, 1]} : vector<8x384xf32> to vector<8x64xf32>
    %68 = vector.extract_strided_slice %50 {offsets = [0, 256], sizes = [8, 64], strides = [1, 1]} : vector<8x384xf32> to vector<8x64xf32>
    %69 = vector.broadcast %12 : vector<1x64xf32> to vector<8x64xf32>
    %70 = arith.addf %68, %69 : vector<8x64xf32>
    %71 = arith.mulf %58, %70 : vector<8x64xf32>
    %72 = arith.addf %67, %71 : vector<8x64xf32>
    %73 = math.tanh %72 : vector<8x64xf32>
    %cst_32 = arith.constant 1.000000e+00 : f32
    %74 = vector.broadcast %cst_32 : f32 to vector<8x64xf32>
    %75 = arith.subf %74, %66 : vector<8x64xf32>
    %76 = arith.mulf %75, %73 : vector<8x64xf32>
    %77 = arith.mulf %66, %45 : vector<8x64xf32>
    %78 = arith.addf %76, %77 : vector<8x64xf32>
    %c8_33 = arith.constant 8 : index
    %c0_34 = arith.constant 0 : index
    %79 = vector.load %arg16[%c8_33, %c0_34] : memref<64x64xf32, #tpu.memory_space<vmem>>, vector<8x64xf32>
    tpu.vector_store %arg16[%c8_33, %c0_34], %78 {strides = array<i32>} : memref<64x64xf32, #tpu.memory_space<vmem>>, vector<8x64xf32>,
    %c16 = arith.constant 16 : index
    %c0_35 = arith.constant 0 : index
    %80 = vector.load %arg14[%c16, %c0_35] : memref<64x384xf32, #tpu.memory_space<vmem>>, vector<8x384xf32>
    %c40 = arith.constant 40 : index
    %c0_36 = arith.constant 0 : index
    %81 = vector.load %arg15[%c40, %c0_36] : memref<64x384xf32, #tpu.memory_space<vmem>>, vector<8x384xf32>
    %82 = arith.addf %80, %81 : vector<8x384xf32>
    %cst_37 = arith.constant dense<0.000000e+00> : vector<8x384xf32>
    %83 = tpu.matmul %78, %11, %cst_37 {dimension_numbers = #tpu.dot_dimension_numbers<[1], [0], [0], [1], [0, 0, 1, 1], [], []>} : vector<8x64xf32>, vector<64x384xf32>, vector<8x384xf32> -> vector<8x384xf32>
    %84 = vector.extract_strided_slice %82 {offsets = [0, 0], sizes = [8, 64], strides = [1, 1]} : vector<8x384xf32> to vector<8x64xf32>
    %85 = vector.extract_strided_slice %83 {offsets = [0, 0], sizes = [8, 64], strides = [1, 1]} : vector<8x384xf32> to vector<8x64xf32>
    %86 = arith.addf %84, %85 : vector<8x64xf32>
    %87 = arith.negf %86 : vector<8x64xf32>
    %88 = math.exp %87 : vector<8x64xf32>
    %cst_38 = arith.constant 1.000000e+00 : f32
    %89 = vector.broadcast %cst_38 : f32 to vector<8x64xf32>
    %90 = arith.addf %89, %88 : vector<8x64xf32>
    %91 = arith.divf %89, %90 : vector<8x64xf32>
    %92 = vector.extract_strided_slice %82 {offsets = [0, 128], sizes = [8, 64], strides = [1, 1]} : vector<8x384xf32> to vector<8x64xf32>
    %93 = vector.extract_strided_slice %83 {offsets = [0, 128], sizes = [8, 64], strides = [1, 1]} : vector<8x384xf32> to vector<8x64xf32>
    %94 = arith.addf %92, %93 : vector<8x64xf32>
    %95 = arith.negf %94 : vector<8x64xf32>
    %96 = math.exp %95 : vector<8x64xf32>
    %cst_39 = arith.constant 1.000000e+00 : f32
    %97 = vector.broadcast %cst_39 : f32 to vector<8x64xf32>
    %98 = arith.addf %97, %96 : vector<8x64xf32>
    %99 = arith.divf %97, %98 : vector<8x64xf32>
    %100 = vector.extract_strided_slice %82 {offsets = [0, 256], sizes = [8, 64], strides = [1, 1]} : vector<8x384xf32> to vector<8x64xf32>
    %101 = vector.extract_strided_slice %83 {offsets = [0, 256], sizes = [8, 64], strides = [1, 1]} : vector<8x384xf32> to vector<8x64xf32>
    %102 = vector.broadcast %12 : vector<1x64xf32> to vector<8x64xf32>
    %103 = arith.addf %101, %102 : vector<8x64xf32>
    %104 = arith.mulf %91, %103 : vector<8x64xf32>
    %105 = arith.addf %100, %104 : vector<8x64xf32>
    %106 = math.tanh %105 : vector<8x64xf32>
    %cst_40 = arith.constant 1.000000e+00 : f32
    %107 = vector.broadcast %cst_40 : f32 to vector<8x64xf32>
    %108 = arith.subf %107, %99 : vector<8x64xf32>
    %109 = arith.mulf %108, %106 : vector<8x64xf32>
    %110 = arith.mulf %99, %78 : vector<8x64xf32>
    %111 = arith.addf %109, %110 : vector<8x64xf32>
    %c16_41 = arith.constant 16 : index
    %c0_42 = arith.constant 0 : index
    %112 = vector.load %arg16[%c16_41, %c0_42] : memref<64x64xf32, #tpu.memory_space<vmem>>, vector<8x64xf32>
    tpu.vector_store %arg16[%c16_41, %c0_42], %111 {strides = array<i32>} : memref<64x64xf32, #tpu.memory_space<vmem>>, vector<8x64xf32>,
    %c24 = arith.constant 24 : index
    %c0_43 = arith.constant 0 : index
    %113 = vector.load %arg14[%c24, %c0_43] : memref<64x384xf32, #tpu.memory_space<vmem>>, vector<8x384xf32>
    %c32 = arith.constant 32 : index
    %c0_44 = arith.constant 0 : index
    %114 = vector.load %arg15[%c32, %c0_44] : memref<64x384xf32, #tpu.memory_space<vmem>>, vector<8x384xf32>
    %115 = arith.addf %113, %114 : vector<8x384xf32>
    %cst_45 = arith.constant dense<0.000000e+00> : vector<8x384xf32>
    %116 = tpu.matmul %111, %11, %cst_45 {dimension_numbers = #tpu.dot_dimension_numbers<[1], [0], [0], [1], [0, 0, 1, 1], [], []>} : vector<8x64xf32>, vector<64x384xf32>, vector<8x384xf32> -> vector<8x384xf32>
    %117 = vector.extract_strided_slice %115 {offsets = [0, 0], sizes = [8, 64], strides = [1, 1]} : vector<8x384xf32> to vector<8x64xf32>
    %118 = vector.extract_strided_slice %116 {offsets = [0, 0], sizes = [8, 64], strides = [1, 1]} : vector<8x384xf32> to vector<8x64xf32>
    %119 = arith.addf %117, %118 : vector<8x64xf32>
    %120 = arith.negf %119 : vector<8x64xf32>
    %121 = math.exp %120 : vector<8x64xf32>
    %cst_46 = arith.constant 1.000000e+00 : f32
    %122 = vector.broadcast %cst_46 : f32 to vector<8x64xf32>
    %123 = arith.addf %122, %121 : vector<8x64xf32>
    %124 = arith.divf %122, %123 : vector<8x64xf32>
    %125 = vector.extract_strided_slice %115 {offsets = [0, 128], sizes = [8, 64], strides = [1, 1]} : vector<8x384xf32> to vector<8x64xf32>
    %126 = vector.extract_strided_slice %116 {offsets = [0, 128], sizes = [8, 64], strides = [1, 1]} : vector<8x384xf32> to vector<8x64xf32>
    %127 = arith.addf %125, %126 : vector<8x64xf32>
    %128 = arith.negf %127 : vector<8x64xf32>
    %129 = math.exp %128 : vector<8x64xf32>
    %cst_47 = arith.constant 1.000000e+00 : f32
    %130 = vector.broadcast %cst_47 : f32 to vector<8x64xf32>
    %131 = arith.addf %130, %129 : vector<8x64xf32>
    %132 = arith.divf %130, %131 : vector<8x64xf32>
    %133 = vector.extract_strided_slice %115 {offsets = [0, 256], sizes = [8, 64], strides = [1, 1]} : vector<8x384xf32> to vector<8x64xf32>
    %134 = vector.extract_strided_slice %116 {offsets = [0, 256], sizes = [8, 64], strides = [1, 1]} : vector<8x384xf32> to vector<8x64xf32>
    %135 = vector.broadcast %12 : vector<1x64xf32> to vector<8x64xf32>
    %136 = arith.addf %134, %135 : vector<8x64xf32>
    %137 = arith.mulf %124, %136 : vector<8x64xf32>
    %138 = arith.addf %133, %137 : vector<8x64xf32>
    %139 = math.tanh %138 : vector<8x64xf32>
    %cst_48 = arith.constant 1.000000e+00 : f32
    %140 = vector.broadcast %cst_48 : f32 to vector<8x64xf32>
    %141 = arith.subf %140, %132 : vector<8x64xf32>
    %142 = arith.mulf %141, %139 : vector<8x64xf32>
    %143 = arith.mulf %132, %111 : vector<8x64xf32>
    %144 = arith.addf %142, %143 : vector<8x64xf32>
    %c24_49 = arith.constant 24 : index
    %c0_50 = arith.constant 0 : index
    %145 = vector.load %arg16[%c24_49, %c0_50] : memref<64x64xf32, #tpu.memory_space<vmem>>, vector<8x64xf32>
    tpu.vector_store %arg16[%c24_49, %c0_50], %144 {strides = array<i32>} : memref<64x64xf32, #tpu.memory_space<vmem>>, vector<8x64xf32>,
    %c32_51 = arith.constant 32 : index
    %c0_52 = arith.constant 0 : index
    %146 = vector.load %arg14[%c32_51, %c0_52] : memref<64x384xf32, #tpu.memory_space<vmem>>, vector<8x384xf32>
    %c24_53 = arith.constant 24 : index
    %c0_54 = arith.constant 0 : index
    %147 = vector.load %arg15[%c24_53, %c0_54] : memref<64x384xf32, #tpu.memory_space<vmem>>, vector<8x384xf32>
    %148 = arith.addf %146, %147 : vector<8x384xf32>
    %cst_55 = arith.constant dense<0.000000e+00> : vector<8x384xf32>
    %149 = tpu.matmul %144, %11, %cst_55 {dimension_numbers = #tpu.dot_dimension_numbers<[1], [0], [0], [1], [0, 0, 1, 1], [], []>} : vector<8x64xf32>, vector<64x384xf32>, vector<8x384xf32> -> vector<8x384xf32>
    %150 = vector.extract_strided_slice %148 {offsets = [0, 0], sizes = [8, 64], strides = [1, 1]} : vector<8x384xf32> to vector<8x64xf32>
    %151 = vector.extract_strided_slice %149 {offsets = [0, 0], sizes = [8, 64], strides = [1, 1]} : vector<8x384xf32> to vector<8x64xf32>
    %152 = arith.addf %150, %151 : vector<8x64xf32>
    %153 = arith.negf %152 : vector<8x64xf32>
    %154 = math.exp %153 : vector<8x64xf32>
    %cst_56 = arith.constant 1.000000e+00 : f32
    %155 = vector.broadcast %cst_56 : f32 to vector<8x64xf32>
    %156 = arith.addf %155, %154 : vector<8x64xf32>
    %157 = arith.divf %155, %156 : vector<8x64xf32>
    %158 = vector.extract_strided_slice %148 {offsets = [0, 128], sizes = [8, 64], strides = [1, 1]} : vector<8x384xf32> to vector<8x64xf32>
    %159 = vector.extract_strided_slice %149 {offsets = [0, 128], sizes = [8, 64], strides = [1, 1]} : vector<8x384xf32> to vector<8x64xf32>
    %160 = arith.addf %158, %159 : vector<8x64xf32>
    %161 = arith.negf %160 : vector<8x64xf32>
    %162 = math.exp %161 : vector<8x64xf32>
    %cst_57 = arith.constant 1.000000e+00 : f32
    %163 = vector.broadcast %cst_57 : f32 to vector<8x64xf32>
    %164 = arith.addf %163, %162 : vector<8x64xf32>
    %165 = arith.divf %163, %164 : vector<8x64xf32>
    %166 = vector.extract_strided_slice %148 {offsets = [0, 256], sizes = [8, 64], strides = [1, 1]} : vector<8x384xf32> to vector<8x64xf32>
    %167 = vector.extract_strided_slice %149 {offsets = [0, 256], sizes = [8, 64], strides = [1, 1]} : vector<8x384xf32> to vector<8x64xf32>
    %168 = vector.broadcast %12 : vector<1x64xf32> to vector<8x64xf32>
    %169 = arith.addf %167, %168 : vector<8x64xf32>
    %170 = arith.mulf %157, %169 : vector<8x64xf32>
    %171 = arith.addf %166, %170 : vector<8x64xf32>
    %172 = math.tanh %171 : vector<8x64xf32>
    %cst_58 = arith.constant 1.000000e+00 : f32
    %173 = vector.broadcast %cst_58 : f32 to vector<8x64xf32>
    %174 = arith.subf %173, %165 : vector<8x64xf32>
    %175 = arith.mulf %174, %172 : vector<8x64xf32>
    %176 = arith.mulf %165, %144 : vector<8x64xf32>
    %177 = arith.addf %175, %176 : vector<8x64xf32>
    %c32_59 = arith.constant 32 : index
    %c0_60 = arith.constant 0 : index
    %178 = vector.load %arg16[%c32_59, %c0_60] : memref<64x64xf32, #tpu.memory_space<vmem>>, vector<8x64xf32>
    tpu.vector_store %arg16[%c32_59, %c0_60], %177 {strides = array<i32>} : memref<64x64xf32, #tpu.memory_space<vmem>>, vector<8x64xf32>,
    %c40_61 = arith.constant 40 : index
    %c0_62 = arith.constant 0 : index
    %179 = vector.load %arg14[%c40_61, %c0_62] : memref<64x384xf32, #tpu.memory_space<vmem>>, vector<8x384xf32>
    %c16_63 = arith.constant 16 : index
    %c0_64 = arith.constant 0 : index
    %180 = vector.load %arg15[%c16_63, %c0_64] : memref<64x384xf32, #tpu.memory_space<vmem>>, vector<8x384xf32>
    %181 = arith.addf %179, %180 : vector<8x384xf32>
    %cst_65 = arith.constant dense<0.000000e+00> : vector<8x384xf32>
    %182 = tpu.matmul %177, %11, %cst_65 {dimension_numbers = #tpu.dot_dimension_numbers<[1], [0], [0], [1], [0, 0, 1, 1], [], []>} : vector<8x64xf32>, vector<64x384xf32>, vector<8x384xf32> -> vector<8x384xf32>
    %183 = vector.extract_strided_slice %181 {offsets = [0, 0], sizes = [8, 64], strides = [1, 1]} : vector<8x384xf32> to vector<8x64xf32>
    %184 = vector.extract_strided_slice %182 {offsets = [0, 0], sizes = [8, 64], strides = [1, 1]} : vector<8x384xf32> to vector<8x64xf32>
    %185 = arith.addf %183, %184 : vector<8x64xf32>
    %186 = arith.negf %185 : vector<8x64xf32>
    %187 = math.exp %186 : vector<8x64xf32>
    %cst_66 = arith.constant 1.000000e+00 : f32
    %188 = vector.broadcast %cst_66 : f32 to vector<8x64xf32>
    %189 = arith.addf %188, %187 : vector<8x64xf32>
    %190 = arith.divf %188, %189 : vector<8x64xf32>
    %191 = vector.extract_strided_slice %181 {offsets = [0, 128], sizes = [8, 64], strides = [1, 1]} : vector<8x384xf32> to vector<8x64xf32>
    %192 = vector.extract_strided_slice %182 {offsets = [0, 128], sizes = [8, 64], strides = [1, 1]} : vector<8x384xf32> to vector<8x64xf32>
    %193 = arith.addf %191, %192 : vector<8x64xf32>
    %194 = arith.negf %193 : vector<8x64xf32>
    %195 = math.exp %194 : vector<8x64xf32>
    %cst_67 = arith.constant 1.000000e+00 : f32
    %196 = vector.broadcast %cst_67 : f32 to vector<8x64xf32>
    %197 = arith.addf %196, %195 : vector<8x64xf32>
    %198 = arith.divf %196, %197 : vector<8x64xf32>
    %199 = vector.extract_strided_slice %181 {offsets = [0, 256], sizes = [8, 64], strides = [1, 1]} : vector<8x384xf32> to vector<8x64xf32>
    %200 = vector.extract_strided_slice %182 {offsets = [0, 256], sizes = [8, 64], strides = [1, 1]} : vector<8x384xf32> to vector<8x64xf32>
    %201 = vector.broadcast %12 : vector<1x64xf32> to vector<8x64xf32>
    %202 = arith.addf %200, %201 : vector<8x64xf32>
    %203 = arith.mulf %190, %202 : vector<8x64xf32>
    %204 = arith.addf %199, %203 : vector<8x64xf32>
    %205 = math.tanh %204 : vector<8x64xf32>
    %cst_68 = arith.constant 1.000000e+00 : f32
    %206 = vector.broadcast %cst_68 : f32 to vector<8x64xf32>
    %207 = arith.subf %206, %198 : vector<8x64xf32>
    %208 = arith.mulf %207, %205 : vector<8x64xf32>
    %209 = arith.mulf %198, %177 : vector<8x64xf32>
    %210 = arith.addf %208, %209 : vector<8x64xf32>
    %c40_69 = arith.constant 40 : index
    %c0_70 = arith.constant 0 : index
    %211 = vector.load %arg16[%c40_69, %c0_70] : memref<64x64xf32, #tpu.memory_space<vmem>>, vector<8x64xf32>
    tpu.vector_store %arg16[%c40_69, %c0_70], %210 {strides = array<i32>} : memref<64x64xf32, #tpu.memory_space<vmem>>, vector<8x64xf32>,
    %c48_71 = arith.constant 48 : index
    %c0_72 = arith.constant 0 : index
    %212 = vector.load %arg14[%c48_71, %c0_72] : memref<64x384xf32, #tpu.memory_space<vmem>>, vector<8x384xf32>
    %c8_73 = arith.constant 8 : index
    %c0_74 = arith.constant 0 : index
    %213 = vector.load %arg15[%c8_73, %c0_74] : memref<64x384xf32, #tpu.memory_space<vmem>>, vector<8x384xf32>
    %214 = arith.addf %212, %213 : vector<8x384xf32>
    %cst_75 = arith.constant dense<0.000000e+00> : vector<8x384xf32>
    %215 = tpu.matmul %210, %11, %cst_75 {dimension_numbers = #tpu.dot_dimension_numbers<[1], [0], [0], [1], [0, 0, 1, 1], [], []>} : vector<8x64xf32>, vector<64x384xf32>, vector<8x384xf32> -> vector<8x384xf32>
    %216 = vector.extract_strided_slice %214 {offsets = [0, 0], sizes = [8, 64], strides = [1, 1]} : vector<8x384xf32> to vector<8x64xf32>
    %217 = vector.extract_strided_slice %215 {offsets = [0, 0], sizes = [8, 64], strides = [1, 1]} : vector<8x384xf32> to vector<8x64xf32>
    %218 = arith.addf %216, %217 : vector<8x64xf32>
    %219 = arith.negf %218 : vector<8x64xf32>
    %220 = math.exp %219 : vector<8x64xf32>
    %cst_76 = arith.constant 1.000000e+00 : f32
    %221 = vector.broadcast %cst_76 : f32 to vector<8x64xf32>
    %222 = arith.addf %221, %220 : vector<8x64xf32>
    %223 = arith.divf %221, %222 : vector<8x64xf32>
    %224 = vector.extract_strided_slice %214 {offsets = [0, 128], sizes = [8, 64], strides = [1, 1]} : vector<8x384xf32> to vector<8x64xf32>
    %225 = vector.extract_strided_slice %215 {offsets = [0, 128], sizes = [8, 64], strides = [1, 1]} : vector<8x384xf32> to vector<8x64xf32>
    %226 = arith.addf %224, %225 : vector<8x64xf32>
    %227 = arith.negf %226 : vector<8x64xf32>
    %228 = math.exp %227 : vector<8x64xf32>
    %cst_77 = arith.constant 1.000000e+00 : f32
    %229 = vector.broadcast %cst_77 : f32 to vector<8x64xf32>
    %230 = arith.addf %229, %228 : vector<8x64xf32>
    %231 = arith.divf %229, %230 : vector<8x64xf32>
    %232 = vector.extract_strided_slice %214 {offsets = [0, 256], sizes = [8, 64], strides = [1, 1]} : vector<8x384xf32> to vector<8x64xf32>
    %233 = vector.extract_strided_slice %215 {offsets = [0, 256], sizes = [8, 64], strides = [1, 1]} : vector<8x384xf32> to vector<8x64xf32>
    %234 = vector.broadcast %12 : vector<1x64xf32> to vector<8x64xf32>
    %235 = arith.addf %233, %234 : vector<8x64xf32>
    %236 = arith.mulf %223, %235 : vector<8x64xf32>
    %237 = arith.addf %232, %236 : vector<8x64xf32>
    %238 = math.tanh %237 : vector<8x64xf32>
    %cst_78 = arith.constant 1.000000e+00 : f32
    %239 = vector.broadcast %cst_78 : f32 to vector<8x64xf32>
    %240 = arith.subf %239, %231 : vector<8x64xf32>
    %241 = arith.mulf %240, %238 : vector<8x64xf32>
    %242 = arith.mulf %231, %210 : vector<8x64xf32>
    %243 = arith.addf %241, %242 : vector<8x64xf32>
    %c48_79 = arith.constant 48 : index
    %c0_80 = arith.constant 0 : index
    %244 = vector.load %arg16[%c48_79, %c0_80] : memref<64x64xf32, #tpu.memory_space<vmem>>, vector<8x64xf32>
    tpu.vector_store %arg16[%c48_79, %c0_80], %243 {strides = array<i32>} : memref<64x64xf32, #tpu.memory_space<vmem>>, vector<8x64xf32>,
    %c56_81 = arith.constant 56 : index
    %c0_82 = arith.constant 0 : index
    %245 = vector.load %arg14[%c56_81, %c0_82] : memref<64x384xf32, #tpu.memory_space<vmem>>, vector<8x384xf32>
    %c0_83 = arith.constant 0 : index
    %c0_84 = arith.constant 0 : index
    %246 = vector.load %arg15[%c0_83, %c0_84] : memref<64x384xf32, #tpu.memory_space<vmem>>, vector<8x384xf32>
    %247 = arith.addf %245, %246 : vector<8x384xf32>
    %cst_85 = arith.constant dense<0.000000e+00> : vector<8x384xf32>
    %248 = tpu.matmul %243, %11, %cst_85 {dimension_numbers = #tpu.dot_dimension_numbers<[1], [0], [0], [1], [0, 0, 1, 1], [], []>} : vector<8x64xf32>, vector<64x384xf32>, vector<8x384xf32> -> vector<8x384xf32>
    %249 = vector.extract_strided_slice %247 {offsets = [0, 0], sizes = [8, 64], strides = [1, 1]} : vector<8x384xf32> to vector<8x64xf32>
    %250 = vector.extract_strided_slice %248 {offsets = [0, 0], sizes = [8, 64], strides = [1, 1]} : vector<8x384xf32> to vector<8x64xf32>
    %251 = arith.addf %249, %250 : vector<8x64xf32>
    %252 = arith.negf %251 : vector<8x64xf32>
    %253 = math.exp %252 : vector<8x64xf32>
    %cst_86 = arith.constant 1.000000e+00 : f32
    %254 = vector.broadcast %cst_86 : f32 to vector<8x64xf32>
    %255 = arith.addf %254, %253 : vector<8x64xf32>
    %256 = arith.divf %254, %255 : vector<8x64xf32>
    %257 = vector.extract_strided_slice %247 {offsets = [0, 128], sizes = [8, 64], strides = [1, 1]} : vector<8x384xf32> to vector<8x64xf32>
    %258 = vector.extract_strided_slice %248 {offsets = [0, 128], sizes = [8, 64], strides = [1, 1]} : vector<8x384xf32> to vector<8x64xf32>
    %259 = arith.addf %257, %258 : vector<8x64xf32>
    %260 = arith.negf %259 : vector<8x64xf32>
    %261 = math.exp %260 : vector<8x64xf32>
    %cst_87 = arith.constant 1.000000e+00 : f32
    %262 = vector.broadcast %cst_87 : f32 to vector<8x64xf32>
    %263 = arith.addf %262, %261 : vector<8x64xf32>
    %264 = arith.divf %262, %263 : vector<8x64xf32>
    %265 = vector.extract_strided_slice %247 {offsets = [0, 256], sizes = [8, 64], strides = [1, 1]} : vector<8x384xf32> to vector<8x64xf32>
    %266 = vector.extract_strided_slice %248 {offsets = [0, 256], sizes = [8, 64], strides = [1, 1]} : vector<8x384xf32> to vector<8x64xf32>
    %267 = vector.broadcast %12 : vector<1x64xf32> to vector<8x64xf32>
    %268 = arith.addf %266, %267 : vector<8x64xf32>
    %269 = arith.mulf %256, %268 : vector<8x64xf32>
    %270 = arith.addf %265, %269 : vector<8x64xf32>
    %271 = math.tanh %270 : vector<8x64xf32>
    %cst_88 = arith.constant 1.000000e+00 : f32
    %272 = vector.broadcast %cst_88 : f32 to vector<8x64xf32>
    %273 = arith.subf %272, %264 : vector<8x64xf32>
    %274 = arith.mulf %273, %271 : vector<8x64xf32>
    %275 = arith.mulf %264, %243 : vector<8x64xf32>
    %276 = arith.addf %274, %275 : vector<8x64xf32>
    %c56_89 = arith.constant 56 : index
    %c0_90 = arith.constant 0 : index
    %277 = vector.load %arg16[%c56_89, %c0_90] : memref<64x64xf32, #tpu.memory_space<vmem>>, vector<8x64xf32>
    tpu.vector_store %arg16[%c56_89, %c0_90], %276 {strides = array<i32>} : memref<64x64xf32, #tpu.memory_space<vmem>>, vector<8x64xf32>,
    %c0_91 = arith.constant 0 : index
    %c0_92 = arith.constant 0 : index
    %278 = vector.load %arg16[%c0_91, %c0_92] : memref<64x64xf32, #tpu.memory_space<vmem>>, vector<64x64xf32>
    %c0_93 = arith.constant 0 : index
    %c0_94 = arith.constant 0 : index
    %279 = vector.load %arg6[%c0_93, %c0_94] : memref<64x384xf32, #tpu.memory_space<vmem>>, vector<64x384xf32>
    %cst_95 = arith.constant dense<0.000000e+00> : vector<64x384xf32>
    %280 = tpu.matmul %278, %279, %cst_95 {dimension_numbers = #tpu.dot_dimension_numbers<[1], [0], [0], [1], [0, 0, 1, 1], [], []>} : vector<64x64xf32>, vector<64x384xf32>, vector<64x384xf32> -> vector<64x384xf32>
    %c0_96 = arith.constant 0 : index
    %c0_97 = arith.constant 0 : index
    %281 = vector.load %arg9[%c0_96, %c0_97] : memref<1x384xf32, #tpu.memory_space<vmem>>, vector<1x384xf32>
    %282 = vector.broadcast %281 : vector<1x384xf32> to vector<64x384xf32>
    %283 = arith.addf %280, %282 : vector<64x384xf32>
    %c0_98 = arith.constant 0 : index
    %c0_99 = arith.constant 0 : index
    %284 = vector.load %arg14[%c0_98, %c0_99] : memref<64x384xf32, #tpu.memory_space<vmem>>, vector<64x384xf32>
    tpu.vector_store %arg14[%c0_98, %c0_99], %283 {strides = array<i32>} : memref<64x384xf32, #tpu.memory_space<vmem>>, vector<64x384xf32>,
    %c0_100 = arith.constant 0 : index
    %c0_101 = arith.constant 0 : index
    %285 = vector.load %arg7[%c0_100, %c0_101] : memref<64x384xf32, #tpu.memory_space<vmem>>, vector<64x384xf32>
    %cst_102 = arith.constant dense<0.000000e+00> : vector<64x384xf32>
    %286 = tpu.matmul %278, %285, %cst_102 {dimension_numbers = #tpu.dot_dimension_numbers<[1], [0], [0], [1], [0, 0, 1, 1], [], []>} : vector<64x64xf32>, vector<64x384xf32>, vector<64x384xf32> -> vector<64x384xf32>
    %c0_103 = arith.constant 0 : index
    %c0_104 = arith.constant 0 : index
    %287 = vector.load %arg15[%c0_103, %c0_104] : memref<64x384xf32, #tpu.memory_space<vmem>>, vector<64x384xf32>
    tpu.vector_store %arg15[%c0_103, %c0_104], %286 {strides = array<i32>} : memref<64x384xf32, #tpu.memory_space<vmem>>, vector<64x384xf32>,
    %c0_105 = arith.constant 0 : index
    %c0_106 = arith.constant 0 : index
    %288 = vector.load %arg8[%c0_105, %c0_106] : memref<64x384xf32, #tpu.memory_space<vmem>>, vector<64x384xf32>
    %c0_107 = arith.constant 0 : index
    %c0_108 = arith.constant 0 : index
    %289 = vector.load %arg10[%c0_107, %c0_108] : memref<1x64xf32, #tpu.memory_space<vmem>>, vector<1x64xf32>
    %cst_109 = arith.constant 0.000000e+00 : f32
    %290 = vector.broadcast %cst_109 : f32 to vector<8x64xf32>
    %c0_110 = arith.constant 0 : index
    %c0_111 = arith.constant 0 : index
    %291 = vector.load %arg14[%c0_110, %c0_111] : memref<64x384xf32, #tpu.memory_space<vmem>>, vector<8x384xf32>
    %c56_112 = arith.constant 56 : index
    %c0_113 = arith.constant 0 : index
    %292 = vector.load %arg15[%c56_112, %c0_113] : memref<64x384xf32, #tpu.memory_space<vmem>>, vector<8x384xf32>
    %293 = arith.addf %291, %292 : vector<8x384xf32>
    %cst_114 = arith.constant dense<0.000000e+00> : vector<8x384xf32>
    %294 = tpu.matmul %290, %288, %cst_114 {dimension_numbers = #tpu.dot_dimension_numbers<[1], [0], [0], [1], [0, 0, 1, 1], [], []>} : vector<8x64xf32>, vector<64x384xf32>, vector<8x384xf32> -> vector<8x384xf32>
    %295 = vector.extract_strided_slice %293 {offsets = [0, 0], sizes = [8, 64], strides = [1, 1]} : vector<8x384xf32> to vector<8x64xf32>
    %296 = vector.extract_strided_slice %294 {offsets = [0, 0], sizes = [8, 64], strides = [1, 1]} : vector<8x384xf32> to vector<8x64xf32>
    %297 = arith.addf %295, %296 : vector<8x64xf32>
    %298 = arith.negf %297 : vector<8x64xf32>
    %299 = math.exp %298 : vector<8x64xf32>
    %cst_115 = arith.constant 1.000000e+00 : f32
    %300 = vector.broadcast %cst_115 : f32 to vector<8x64xf32>
    %301 = arith.addf %300, %299 : vector<8x64xf32>
    %302 = arith.divf %300, %301 : vector<8x64xf32>
    %303 = vector.extract_strided_slice %293 {offsets = [0, 128], sizes = [8, 64], strides = [1, 1]} : vector<8x384xf32> to vector<8x64xf32>
    %304 = vector.extract_strided_slice %294 {offsets = [0, 128], sizes = [8, 64], strides = [1, 1]} : vector<8x384xf32> to vector<8x64xf32>
    %305 = arith.addf %303, %304 : vector<8x64xf32>
    %306 = arith.negf %305 : vector<8x64xf32>
    %307 = math.exp %306 : vector<8x64xf32>
    %cst_116 = arith.constant 1.000000e+00 : f32
    %308 = vector.broadcast %cst_116 : f32 to vector<8x64xf32>
    %309 = arith.addf %308, %307 : vector<8x64xf32>
    %310 = arith.divf %308, %309 : vector<8x64xf32>
    %311 = vector.extract_strided_slice %293 {offsets = [0, 256], sizes = [8, 64], strides = [1, 1]} : vector<8x384xf32> to vector<8x64xf32>
    %312 = vector.extract_strided_slice %294 {offsets = [0, 256], sizes = [8, 64], strides = [1, 1]} : vector<8x384xf32> to vector<8x64xf32>
    %313 = vector.broadcast %289 : vector<1x64xf32> to vector<8x64xf32>
    %314 = arith.addf %312, %313 : vector<8x64xf32>
    %315 = arith.mulf %302, %314 : vector<8x64xf32>
    %316 = arith.addf %311, %315 : vector<8x64xf32>
    %317 = math.tanh %316 : vector<8x64xf32>
    %cst_117 = arith.constant 1.000000e+00 : f32
    %318 = vector.broadcast %cst_117 : f32 to vector<8x64xf32>
    %319 = arith.subf %318, %310 : vector<8x64xf32>
    %320 = arith.mulf %319, %317 : vector<8x64xf32>
    %321 = arith.mulf %310, %290 : vector<8x64xf32>
    %322 = arith.addf %320, %321 : vector<8x64xf32>
    %c0_118 = arith.constant 0 : index
    %c0_119 = arith.constant 0 : index
    %323 = vector.load %arg11[%c0_118, %c0_119] : memref<8x64xf32, #tpu.memory_space<vmem>>, vector<1x64xf32>
    %324 = vector.broadcast %323 : vector<1x64xf32> to vector<8x64xf32>
    %325 = arith.mulf %322, %324 : vector<8x64xf32>
    %326 = arith.addf %0, %325 : vector<8x64xf32>
    %c8_120 = arith.constant 8 : index
    %c0_121 = arith.constant 0 : index
    %327 = vector.load %arg14[%c8_120, %c0_121] : memref<64x384xf32, #tpu.memory_space<vmem>>, vector<8x384xf32>
    %c48_122 = arith.constant 48 : index
    %c0_123 = arith.constant 0 : index
    %328 = vector.load %arg15[%c48_122, %c0_123] : memref<64x384xf32, #tpu.memory_space<vmem>>, vector<8x384xf32>
    %329 = arith.addf %327, %328 : vector<8x384xf32>
    %cst_124 = arith.constant dense<0.000000e+00> : vector<8x384xf32>
    %330 = tpu.matmul %322, %288, %cst_124 {dimension_numbers = #tpu.dot_dimension_numbers<[1], [0], [0], [1], [0, 0, 1, 1], [], []>} : vector<8x64xf32>, vector<64x384xf32>, vector<8x384xf32> -> vector<8x384xf32>
    %331 = vector.extract_strided_slice %329 {offsets = [0, 0], sizes = [8, 64], strides = [1, 1]} : vector<8x384xf32> to vector<8x64xf32>
    %332 = vector.extract_strided_slice %330 {offsets = [0, 0], sizes = [8, 64], strides = [1, 1]} : vector<8x384xf32> to vector<8x64xf32>
    %333 = arith.addf %331, %332 : vector<8x64xf32>
    %334 = arith.negf %333 : vector<8x64xf32>
    %335 = math.exp %334 : vector<8x64xf32>
    %cst_125 = arith.constant 1.000000e+00 : f32
    %336 = vector.broadcast %cst_125 : f32 to vector<8x64xf32>
    %337 = arith.addf %336, %335 : vector<8x64xf32>
    %338 = arith.divf %336, %337 : vector<8x64xf32>
    %339 = vector.extract_strided_slice %329 {offsets = [0, 128], sizes = [8, 64], strides = [1, 1]} : vector<8x384xf32> to vector<8x64xf32>
    %340 = vector.extract_strided_slice %330 {offsets = [0, 128], sizes = [8, 64], strides = [1, 1]} : vector<8x384xf32> to vector<8x64xf32>
    %341 = arith.addf %339, %340 : vector<8x64xf32>
    %342 = arith.negf %341 : vector<8x64xf32>
    %343 = math.exp %342 : vector<8x64xf32>
    %cst_126 = arith.constant 1.000000e+00 : f32
    %344 = vector.broadcast %cst_126 : f32 to vector<8x64xf32>
    %345 = arith.addf %344, %343 : vector<8x64xf32>
    %346 = arith.divf %344, %345 : vector<8x64xf32>
    %347 = vector.extract_strided_slice %329 {offsets = [0, 256], sizes = [8, 64], strides = [1, 1]} : vector<8x384xf32> to vector<8x64xf32>
    %348 = vector.extract_strided_slice %330 {offsets = [0, 256], sizes = [8, 64], strides = [1, 1]} : vector<8x384xf32> to vector<8x64xf32>
    %349 = vector.broadcast %289 : vector<1x64xf32> to vector<8x64xf32>
    %350 = arith.addf %348, %349 : vector<8x64xf32>
    %351 = arith.mulf %338, %350 : vector<8x64xf32>
    %352 = arith.addf %347, %351 : vector<8x64xf32>
    %353 = math.tanh %352 : vector<8x64xf32>
    %cst_127 = arith.constant 1.000000e+00 : f32
    %354 = vector.broadcast %cst_127 : f32 to vector<8x64xf32>
    %355 = arith.subf %354, %346 : vector<8x64xf32>
    %356 = arith.mulf %355, %353 : vector<8x64xf32>
    %357 = arith.mulf %346, %322 : vector<8x64xf32>
    %358 = arith.addf %356, %357 : vector<8x64xf32>
    %c1 = arith.constant 1 : index
    %c0_128 = arith.constant 0 : index
    %359 = vector.load %arg11[%c1, %c0_128] : memref<8x64xf32, #tpu.memory_space<vmem>>, vector<1x64xf32>
    %360 = vector.broadcast %359 : vector<1x64xf32> to vector<8x64xf32>
    %361 = arith.mulf %358, %360 : vector<8x64xf32>
    %362 = arith.addf %326, %361 : vector<8x64xf32>
    %c16_129 = arith.constant 16 : index
    %c0_130 = arith.constant 0 : index
    %363 = vector.load %arg14[%c16_129, %c0_130] : memref<64x384xf32, #tpu.memory_space<vmem>>, vector<8x384xf32>
    %c40_131 = arith.constant 40 : index
    %c0_132 = arith.constant 0 : index
    %364 = vector.load %arg15[%c40_131, %c0_132] : memref<64x384xf32, #tpu.memory_space<vmem>>, vector<8x384xf32>
    %365 = arith.addf %363, %364 : vector<8x384xf32>
    %cst_133 = arith.constant dense<0.000000e+00> : vector<8x384xf32>
    %366 = tpu.matmul %358, %288, %cst_133 {dimension_numbers = #tpu.dot_dimension_numbers<[1], [0], [0], [1], [0, 0, 1, 1], [], []>} : vector<8x64xf32>, vector<64x384xf32>, vector<8x384xf32> -> vector<8x384xf32>
    %367 = vector.extract_strided_slice %365 {offsets = [0, 0], sizes = [8, 64], strides = [1, 1]} : vector<8x384xf32> to vector<8x64xf32>
    %368 = vector.extract_strided_slice %366 {offsets = [0, 0], sizes = [8, 64], strides = [1, 1]} : vector<8x384xf32> to vector<8x64xf32>
    %369 = arith.addf %367, %368 : vector<8x64xf32>
    %370 = arith.negf %369 : vector<8x64xf32>
    %371 = math.exp %370 : vector<8x64xf32>
    %cst_134 = arith.constant 1.000000e+00 : f32
    %372 = vector.broadcast %cst_134 : f32 to vector<8x64xf32>
    %373 = arith.addf %372, %371 : vector<8x64xf32>
    %374 = arith.divf %372, %373 : vector<8x64xf32>
    %375 = vector.extract_strided_slice %365 {offsets = [0, 128], sizes = [8, 64], strides = [1, 1]} : vector<8x384xf32> to vector<8x64xf32>
    %376 = vector.extract_strided_slice %366 {offsets = [0, 128], sizes = [8, 64], strides = [1, 1]} : vector<8x384xf32> to vector<8x64xf32>
    %377 = arith.addf %375, %376 : vector<8x64xf32>
    %378 = arith.negf %377 : vector<8x64xf32>
    %379 = math.exp %378 : vector<8x64xf32>
    %cst_135 = arith.constant 1.000000e+00 : f32
    %380 = vector.broadcast %cst_135 : f32 to vector<8x64xf32>
    %381 = arith.addf %380, %379 : vector<8x64xf32>
    %382 = arith.divf %380, %381 : vector<8x64xf32>
    %383 = vector.extract_strided_slice %365 {offsets = [0, 256], sizes = [8, 64], strides = [1, 1]} : vector<8x384xf32> to vector<8x64xf32>
    %384 = vector.extract_strided_slice %366 {offsets = [0, 256], sizes = [8, 64], strides = [1, 1]} : vector<8x384xf32> to vector<8x64xf32>
    %385 = vector.broadcast %289 : vector<1x64xf32> to vector<8x64xf32>
    %386 = arith.addf %384, %385 : vector<8x64xf32>
    %387 = arith.mulf %374, %386 : vector<8x64xf32>
    %388 = arith.addf %383, %387 : vector<8x64xf32>
    %389 = math.tanh %388 : vector<8x64xf32>
    %cst_136 = arith.constant 1.000000e+00 : f32
    %390 = vector.broadcast %cst_136 : f32 to vector<8x64xf32>
    %391 = arith.subf %390, %382 : vector<8x64xf32>
    %392 = arith.mulf %391, %389 : vector<8x64xf32>
    %393 = arith.mulf %382, %358 : vector<8x64xf32>
    %394 = arith.addf %392, %393 : vector<8x64xf32>
    %c2 = arith.constant 2 : index
    %c0_137 = arith.constant 0 : index
    %395 = vector.load %arg11[%c2, %c0_137] : memref<8x64xf32, #tpu.memory_space<vmem>>, vector<1x64xf32>
    %396 = vector.broadcast %395 : vector<1x64xf32> to vector<8x64xf32>
    %397 = arith.mulf %394, %396 : vector<8x64xf32>
    %398 = arith.addf %362, %397 : vector<8x64xf32>
    %c24_138 = arith.constant 24 : index
    %c0_139 = arith.constant 0 : index
    %399 = vector.load %arg14[%c24_138, %c0_139] : memref<64x384xf32, #tpu.memory_space<vmem>>, vector<8x384xf32>
    %c32_140 = arith.constant 32 : index
    %c0_141 = arith.constant 0 : index
    %400 = vector.load %arg15[%c32_140, %c0_141] : memref<64x384xf32, #tpu.memory_space<vmem>>, vector<8x384xf32>
    %401 = arith.addf %399, %400 : vector<8x384xf32>
    %cst_142 = arith.constant dense<0.000000e+00> : vector<8x384xf32>
    %402 = tpu.matmul %394, %288, %cst_142 {dimension_numbers = #tpu.dot_dimension_numbers<[1], [0], [0], [1], [0, 0, 1, 1], [], []>} : vector<8x64xf32>, vector<64x384xf32>, vector<8x384xf32> -> vector<8x384xf32>
    %403 = vector.extract_strided_slice %401 {offsets = [0, 0], sizes = [8, 64], strides = [1, 1]} : vector<8x384xf32> to vector<8x64xf32>
    %404 = vector.extract_strided_slice %402 {offsets = [0, 0], sizes = [8, 64], strides = [1, 1]} : vector<8x384xf32> to vector<8x64xf32>
    %405 = arith.addf %403, %404 : vector<8x64xf32>
    %406 = arith.negf %405 : vector<8x64xf32>
    %407 = math.exp %406 : vector<8x64xf32>
    %cst_143 = arith.constant 1.000000e+00 : f32
    %408 = vector.broadcast %cst_143 : f32 to vector<8x64xf32>
    %409 = arith.addf %408, %407 : vector<8x64xf32>
    %410 = arith.divf %408, %409 : vector<8x64xf32>
    %411 = vector.extract_strided_slice %401 {offsets = [0, 128], sizes = [8, 64], strides = [1, 1]} : vector<8x384xf32> to vector<8x64xf32>
    %412 = vector.extract_strided_slice %402 {offsets = [0, 128], sizes = [8, 64], strides = [1, 1]} : vector<8x384xf32> to vector<8x64xf32>
    %413 = arith.addf %411, %412 : vector<8x64xf32>
    %414 = arith.negf %413 : vector<8x64xf32>
    %415 = math.exp %414 : vector<8x64xf32>
    %cst_144 = arith.constant 1.000000e+00 : f32
    %416 = vector.broadcast %cst_144 : f32 to vector<8x64xf32>
    %417 = arith.addf %416, %415 : vector<8x64xf32>
    %418 = arith.divf %416, %417 : vector<8x64xf32>
    %419 = vector.extract_strided_slice %401 {offsets = [0, 256], sizes = [8, 64], strides = [1, 1]} : vector<8x384xf32> to vector<8x64xf32>
    %420 = vector.extract_strided_slice %402 {offsets = [0, 256], sizes = [8, 64], strides = [1, 1]} : vector<8x384xf32> to vector<8x64xf32>
    %421 = vector.broadcast %289 : vector<1x64xf32> to vector<8x64xf32>
    %422 = arith.addf %420, %421 : vector<8x64xf32>
    %423 = arith.mulf %410, %422 : vector<8x64xf32>
    %424 = arith.addf %419, %423 : vector<8x64xf32>
    %425 = math.tanh %424 : vector<8x64xf32>
    %cst_145 = arith.constant 1.000000e+00 : f32
    %426 = vector.broadcast %cst_145 : f32 to vector<8x64xf32>
    %427 = arith.subf %426, %418 : vector<8x64xf32>
    %428 = arith.mulf %427, %425 : vector<8x64xf32>
    %429 = arith.mulf %418, %394 : vector<8x64xf32>
    %430 = arith.addf %428, %429 : vector<8x64xf32>
    %c3 = arith.constant 3 : index
    %c0_146 = arith.constant 0 : index
    %431 = vector.load %arg11[%c3, %c0_146] : memref<8x64xf32, #tpu.memory_space<vmem>>, vector<1x64xf32>
    %432 = vector.broadcast %431 : vector<1x64xf32> to vector<8x64xf32>
    %433 = arith.mulf %430, %432 : vector<8x64xf32>
    %434 = arith.addf %398, %433 : vector<8x64xf32>
    %c32_147 = arith.constant 32 : index
    %c0_148 = arith.constant 0 : index
    %435 = vector.load %arg14[%c32_147, %c0_148] : memref<64x384xf32, #tpu.memory_space<vmem>>, vector<8x384xf32>
    %c24_149 = arith.constant 24 : index
    %c0_150 = arith.constant 0 : index
    %436 = vector.load %arg15[%c24_149, %c0_150] : memref<64x384xf32, #tpu.memory_space<vmem>>, vector<8x384xf32>
    %437 = arith.addf %435, %436 : vector<8x384xf32>
    %cst_151 = arith.constant dense<0.000000e+00> : vector<8x384xf32>
    %438 = tpu.matmul %430, %288, %cst_151 {dimension_numbers = #tpu.dot_dimension_numbers<[1], [0], [0], [1], [0, 0, 1, 1], [], []>} : vector<8x64xf32>, vector<64x384xf32>, vector<8x384xf32> -> vector<8x384xf32>
    %439 = vector.extract_strided_slice %437 {offsets = [0, 0], sizes = [8, 64], strides = [1, 1]} : vector<8x384xf32> to vector<8x64xf32>
    %440 = vector.extract_strided_slice %438 {offsets = [0, 0], sizes = [8, 64], strides = [1, 1]} : vector<8x384xf32> to vector<8x64xf32>
    %441 = arith.addf %439, %440 : vector<8x64xf32>
    %442 = arith.negf %441 : vector<8x64xf32>
    %443 = math.exp %442 : vector<8x64xf32>
    %cst_152 = arith.constant 1.000000e+00 : f32
    %444 = vector.broadcast %cst_152 : f32 to vector<8x64xf32>
    %445 = arith.addf %444, %443 : vector<8x64xf32>
    %446 = arith.divf %444, %445 : vector<8x64xf32>
    %447 = vector.extract_strided_slice %437 {offsets = [0, 128], sizes = [8, 64], strides = [1, 1]} : vector<8x384xf32> to vector<8x64xf32>
    %448 = vector.extract_strided_slice %438 {offsets = [0, 128], sizes = [8, 64], strides = [1, 1]} : vector<8x384xf32> to vector<8x64xf32>
    %449 = arith.addf %447, %448 : vector<8x64xf32>
    %450 = arith.negf %449 : vector<8x64xf32>
    %451 = math.exp %450 : vector<8x64xf32>
    %cst_153 = arith.constant 1.000000e+00 : f32
    %452 = vector.broadcast %cst_153 : f32 to vector<8x64xf32>
    %453 = arith.addf %452, %451 : vector<8x64xf32>
    %454 = arith.divf %452, %453 : vector<8x64xf32>
    %455 = vector.extract_strided_slice %437 {offsets = [0, 256], sizes = [8, 64], strides = [1, 1]} : vector<8x384xf32> to vector<8x64xf32>
    %456 = vector.extract_strided_slice %438 {offsets = [0, 256], sizes = [8, 64], strides = [1, 1]} : vector<8x384xf32> to vector<8x64xf32>
    %457 = vector.broadcast %289 : vector<1x64xf32> to vector<8x64xf32>
    %458 = arith.addf %456, %457 : vector<8x64xf32>
    %459 = arith.mulf %446, %458 : vector<8x64xf32>
    %460 = arith.addf %455, %459 : vector<8x64xf32>
    %461 = math.tanh %460 : vector<8x64xf32>
    %cst_154 = arith.constant 1.000000e+00 : f32
    %462 = vector.broadcast %cst_154 : f32 to vector<8x64xf32>
    %463 = arith.subf %462, %454 : vector<8x64xf32>
    %464 = arith.mulf %463, %461 : vector<8x64xf32>
    %465 = arith.mulf %454, %430 : vector<8x64xf32>
    %466 = arith.addf %464, %465 : vector<8x64xf32>
    %c4 = arith.constant 4 : index
    %c0_155 = arith.constant 0 : index
    %467 = vector.load %arg11[%c4, %c0_155] : memref<8x64xf32, #tpu.memory_space<vmem>>, vector<1x64xf32>
    %468 = vector.broadcast %467 : vector<1x64xf32> to vector<8x64xf32>
    %469 = arith.mulf %466, %468 : vector<8x64xf32>
    %470 = arith.addf %434, %469 : vector<8x64xf32>
    %c40_156 = arith.constant 40 : index
    %c0_157 = arith.constant 0 : index
    %471 = vector.load %arg14[%c40_156, %c0_157] : memref<64x384xf32, #tpu.memory_space<vmem>>, vector<8x384xf32>
    %c16_158 = arith.constant 16 : index
    %c0_159 = arith.constant 0 : index
    %472 = vector.load %arg15[%c16_158, %c0_159] : memref<64x384xf32, #tpu.memory_space<vmem>>, vector<8x384xf32>
    %473 = arith.addf %471, %472 : vector<8x384xf32>
    %cst_160 = arith.constant dense<0.000000e+00> : vector<8x384xf32>
    %474 = tpu.matmul %466, %288, %cst_160 {dimension_numbers = #tpu.dot_dimension_numbers<[1], [0], [0], [1], [0, 0, 1, 1], [], []>} : vector<8x64xf32>, vector<64x384xf32>, vector<8x384xf32> -> vector<8x384xf32>
    %475 = vector.extract_strided_slice %473 {offsets = [0, 0], sizes = [8, 64], strides = [1, 1]} : vector<8x384xf32> to vector<8x64xf32>
    %476 = vector.extract_strided_slice %474 {offsets = [0, 0], sizes = [8, 64], strides = [1, 1]} : vector<8x384xf32> to vector<8x64xf32>
    %477 = arith.addf %475, %476 : vector<8x64xf32>
    %478 = arith.negf %477 : vector<8x64xf32>
    %479 = math.exp %478 : vector<8x64xf32>
    %cst_161 = arith.constant 1.000000e+00 : f32
    %480 = vector.broadcast %cst_161 : f32 to vector<8x64xf32>
    %481 = arith.addf %480, %479 : vector<8x64xf32>
    %482 = arith.divf %480, %481 : vector<8x64xf32>
    %483 = vector.extract_strided_slice %473 {offsets = [0, 128], sizes = [8, 64], strides = [1, 1]} : vector<8x384xf32> to vector<8x64xf32>
    %484 = vector.extract_strided_slice %474 {offsets = [0, 128], sizes = [8, 64], strides = [1, 1]} : vector<8x384xf32> to vector<8x64xf32>
    %485 = arith.addf %483, %484 : vector<8x64xf32>
    %486 = arith.negf %485 : vector<8x64xf32>
    %487 = math.exp %486 : vector<8x64xf32>
    %cst_162 = arith.constant 1.000000e+00 : f32
    %488 = vector.broadcast %cst_162 : f32 to vector<8x64xf32>
    %489 = arith.addf %488, %487 : vector<8x64xf32>
    %490 = arith.divf %488, %489 : vector<8x64xf32>
    %491 = vector.extract_strided_slice %473 {offsets = [0, 256], sizes = [8, 64], strides = [1, 1]} : vector<8x384xf32> to vector<8x64xf32>
    %492 = vector.extract_strided_slice %474 {offsets = [0, 256], sizes = [8, 64], strides = [1, 1]} : vector<8x384xf32> to vector<8x64xf32>
    %493 = vector.broadcast %289 : vector<1x64xf32> to vector<8x64xf32>
    %494 = arith.addf %492, %493 : vector<8x64xf32>
    %495 = arith.mulf %482, %494 : vector<8x64xf32>
    %496 = arith.addf %491, %495 : vector<8x64xf32>
    %497 = math.tanh %496 : vector<8x64xf32>
    %cst_163 = arith.constant 1.000000e+00 : f32
    %498 = vector.broadcast %cst_163 : f32 to vector<8x64xf32>
    %499 = arith.subf %498, %490 : vector<8x64xf32>
    %500 = arith.mulf %499, %497 : vector<8x64xf32>
    %501 = arith.mulf %490, %466 : vector<8x64xf32>
    %502 = arith.addf %500, %501 : vector<8x64xf32>
    %c5 = arith.constant 5 : index
    %c0_164 = arith.constant 0 : index
    %503 = vector.load %arg11[%c5, %c0_164] : memref<8x64xf32, #tpu.memory_space<vmem>>, vector<1x64xf32>
    %504 = vector.broadcast %503 : vector<1x64xf32> to vector<8x64xf32>
    %505 = arith.mulf %502, %504 : vector<8x64xf32>
    %506 = arith.addf %470, %505 : vector<8x64xf32>
    %c48_165 = arith.constant 48 : index
    %c0_166 = arith.constant 0 : index
    %507 = vector.load %arg14[%c48_165, %c0_166] : memref<64x384xf32, #tpu.memory_space<vmem>>, vector<8x384xf32>
    %c8_167 = arith.constant 8 : index
    %c0_168 = arith.constant 0 : index
    %508 = vector.load %arg15[%c8_167, %c0_168] : memref<64x384xf32, #tpu.memory_space<vmem>>, vector<8x384xf32>
    %509 = arith.addf %507, %508 : vector<8x384xf32>
    %cst_169 = arith.constant dense<0.000000e+00> : vector<8x384xf32>
    %510 = tpu.matmul %502, %288, %cst_169 {dimension_numbers = #tpu.dot_dimension_numbers<[1], [0], [0], [1], [0, 0, 1, 1], [], []>} : vector<8x64xf32>, vector<64x384xf32>, vector<8x384xf32> -> vector<8x384xf32>
    %511 = vector.extract_strided_slice %509 {offsets = [0, 0], sizes = [8, 64], strides = [1, 1]} : vector<8x384xf32> to vector<8x64xf32>
    %512 = vector.extract_strided_slice %510 {offsets = [0, 0], sizes = [8, 64], strides = [1, 1]} : vector<8x384xf32> to vector<8x64xf32>
    %513 = arith.addf %511, %512 : vector<8x64xf32>
    %514 = arith.negf %513 : vector<8x64xf32>
    %515 = math.exp %514 : vector<8x64xf32>
    %cst_170 = arith.constant 1.000000e+00 : f32
    %516 = vector.broadcast %cst_170 : f32 to vector<8x64xf32>
    %517 = arith.addf %516, %515 : vector<8x64xf32>
    %518 = arith.divf %516, %517 : vector<8x64xf32>
    %519 = vector.extract_strided_slice %509 {offsets = [0, 128], sizes = [8, 64], strides = [1, 1]} : vector<8x384xf32> to vector<8x64xf32>
    %520 = vector.extract_strided_slice %510 {offsets = [0, 128], sizes = [8, 64], strides = [1, 1]} : vector<8x384xf32> to vector<8x64xf32>
    %521 = arith.addf %519, %520 : vector<8x64xf32>
    %522 = arith.negf %521 : vector<8x64xf32>
    %523 = math.exp %522 : vector<8x64xf32>
    %cst_171 = arith.constant 1.000000e+00 : f32
    %524 = vector.broadcast %cst_171 : f32 to vector<8x64xf32>
    %525 = arith.addf %524, %523 : vector<8x64xf32>
    %526 = arith.divf %524, %525 : vector<8x64xf32>
    %527 = vector.extract_strided_slice %509 {offsets = [0, 256], sizes = [8, 64], strides = [1, 1]} : vector<8x384xf32> to vector<8x64xf32>
    %528 = vector.extract_strided_slice %510 {offsets = [0, 256], sizes = [8, 64], strides = [1, 1]} : vector<8x384xf32> to vector<8x64xf32>
    %529 = vector.broadcast %289 : vector<1x64xf32> to vector<8x64xf32>
    %530 = arith.addf %528, %529 : vector<8x64xf32>
    %531 = arith.mulf %518, %530 : vector<8x64xf32>
    %532 = arith.addf %527, %531 : vector<8x64xf32>
    %533 = math.tanh %532 : vector<8x64xf32>
    %cst_172 = arith.constant 1.000000e+00 : f32
    %534 = vector.broadcast %cst_172 : f32 to vector<8x64xf32>
    %535 = arith.subf %534, %526 : vector<8x64xf32>
    %536 = arith.mulf %535, %533 : vector<8x64xf32>
    %537 = arith.mulf %526, %502 : vector<8x64xf32>
    %538 = arith.addf %536, %537 : vector<8x64xf32>
    %c6 = arith.constant 6 : index
    %c0_173 = arith.constant 0 : index
    %539 = vector.load %arg11[%c6, %c0_173] : memref<8x64xf32, #tpu.memory_space<vmem>>, vector<1x64xf32>
    %540 = vector.broadcast %539 : vector<1x64xf32> to vector<8x64xf32>
    %541 = arith.mulf %538, %540 : vector<8x64xf32>
    %542 = arith.addf %506, %541 : vector<8x64xf32>
    %c56_174 = arith.constant 56 : index
    %c0_175 = arith.constant 0 : index
    %543 = vector.load %arg14[%c56_174, %c0_175] : memref<64x384xf32, #tpu.memory_space<vmem>>, vector<8x384xf32>
    %c0_176 = arith.constant 0 : index
    %c0_177 = arith.constant 0 : index
    %544 = vector.load %arg15[%c0_176, %c0_177] : memref<64x384xf32, #tpu.memory_space<vmem>>, vector<8x384xf32>
    %545 = arith.addf %543, %544 : vector<8x384xf32>
    %cst_178 = arith.constant dense<0.000000e+00> : vector<8x384xf32>
    %546 = tpu.matmul %538, %288, %cst_178 {dimension_numbers = #tpu.dot_dimension_numbers<[1], [0], [0], [1], [0, 0, 1, 1], [], []>} : vector<8x64xf32>, vector<64x384xf32>, vector<8x384xf32> -> vector<8x384xf32>
    %547 = vector.extract_strided_slice %545 {offsets = [0, 0], sizes = [8, 64], strides = [1, 1]} : vector<8x384xf32> to vector<8x64xf32>
    %548 = vector.extract_strided_slice %546 {offsets = [0, 0], sizes = [8, 64], strides = [1, 1]} : vector<8x384xf32> to vector<8x64xf32>
    %549 = arith.addf %547, %548 : vector<8x64xf32>
    %550 = arith.negf %549 : vector<8x64xf32>
    %551 = math.exp %550 : vector<8x64xf32>
    %cst_179 = arith.constant 1.000000e+00 : f32
    %552 = vector.broadcast %cst_179 : f32 to vector<8x64xf32>
    %553 = arith.addf %552, %551 : vector<8x64xf32>
    %554 = arith.divf %552, %553 : vector<8x64xf32>
    %555 = vector.extract_strided_slice %545 {offsets = [0, 128], sizes = [8, 64], strides = [1, 1]} : vector<8x384xf32> to vector<8x64xf32>
    %556 = vector.extract_strided_slice %546 {offsets = [0, 128], sizes = [8, 64], strides = [1, 1]} : vector<8x384xf32> to vector<8x64xf32>
    %557 = arith.addf %555, %556 : vector<8x64xf32>
    %558 = arith.negf %557 : vector<8x64xf32>
    %559 = math.exp %558 : vector<8x64xf32>
    %cst_180 = arith.constant 1.000000e+00 : f32
    %560 = vector.broadcast %cst_180 : f32 to vector<8x64xf32>
    %561 = arith.addf %560, %559 : vector<8x64xf32>
    %562 = arith.divf %560, %561 : vector<8x64xf32>
    %563 = vector.extract_strided_slice %545 {offsets = [0, 256], sizes = [8, 64], strides = [1, 1]} : vector<8x384xf32> to vector<8x64xf32>
    %564 = vector.extract_strided_slice %546 {offsets = [0, 256], sizes = [8, 64], strides = [1, 1]} : vector<8x384xf32> to vector<8x64xf32>
    %565 = vector.broadcast %289 : vector<1x64xf32> to vector<8x64xf32>
    %566 = arith.addf %564, %565 : vector<8x64xf32>
    %567 = arith.mulf %554, %566 : vector<8x64xf32>
    %568 = arith.addf %563, %567 : vector<8x64xf32>
    %569 = math.tanh %568 : vector<8x64xf32>
    %cst_181 = arith.constant 1.000000e+00 : f32
    %570 = vector.broadcast %cst_181 : f32 to vector<8x64xf32>
    %571 = arith.subf %570, %562 : vector<8x64xf32>
    %572 = arith.mulf %571, %569 : vector<8x64xf32>
    %573 = arith.mulf %562, %538 : vector<8x64xf32>
    %574 = arith.addf %572, %573 : vector<8x64xf32>
    %c7 = arith.constant 7 : index
    %c0_182 = arith.constant 0 : index
    %575 = vector.load %arg11[%c7, %c0_182] : memref<8x64xf32, #tpu.memory_space<vmem>>, vector<1x64xf32>
    %576 = vector.broadcast %575 : vector<1x64xf32> to vector<8x64xf32>
    %577 = arith.mulf %574, %576 : vector<8x64xf32>
    %578 = arith.addf %542, %577 : vector<8x64xf32>
    %cst_183 = arith.constant dense<0.000000e+00> : vector<8xf32>
    %579 = vector.multi_reduction <add>, %578, %cst_183 [1] : vector<8x64xf32> to vector<8xf32>
    %580 = vector.shape_cast %579 : vector<8xf32> to vector<8x1xf32>
    %c0_184 = arith.constant 0 : index
    %c0_185 = arith.constant 0 : index
    %581 = memref.load %arg12[%c0_184, %c0_185] : memref<1x1xf32, #tpu.memory_space<smem>>
    %582 = vector.broadcast %581 : f32 to vector<8x1xf32>
    %583 = arith.addf %580, %582 : vector<8x1xf32>
    %584 = arith.negf %583 : vector<8x1xf32>
    %585 = math.exp %584 : vector<8x1xf32>
    %cst_186 = arith.constant 1.000000e+00 : f32
    %586 = vector.broadcast %cst_186 : f32 to vector<8x1xf32>
    %587 = arith.addf %586, %585 : vector<8x1xf32>
    %588 = arith.divf %586, %587 : vector<8x1xf32>
    %589 = vector.extract_strided_slice %588 {offsets = [0, 0], sizes = [2, 1], strides = [1, 1]} : vector<8x1xf32> to vector<2x1xf32>
    %c0_187 = arith.constant 0 : index
    %c0_188 = arith.constant 0 : index
    %590 = vector.load %arg13[%c0_187, %c0_188] : memref<2x1xf32, #tpu.memory_space<vmem>>, vector<2x1xf32>
    tpu.vector_store %arg13[%c0_187, %c0_188], %589 {strides = array<i32>} : memref<2x1xf32, #tpu.memory_space<vmem>>, vector<2x1xf32>,
    return
  }
}

</mosaic_0001>

<bundles_post_ra>
// kernel: discriminator_forward.1
= control target key start
LH: loop header
LB: loop body
LE: loop exit
PB: predicated region body
PF: predicated region fallthrough
CT: control target
= control target key end

     0   :  { %19 = vsyncpa [#allocation7], 0  ;;  %s6786_s0 = inlined_call_operand.vmem [shape: f32[64,4], index: 0, kind: input, shape index: {}]   ;;  %s6787_s1 = inlined_call_operand.vmem [shape: f32[4,384], index: 1, kind: input, shape index: {}]   ;;  %s6788_s2 = inlined_call_operand.vmem [shape: f32[4,384], index: 2, kind: input, shape index: {}]   ;;  %s6789_s3 = inlined_call_operand.hbm [shape: f32[64,384], index: 3, kind: input, shape index: {}]   ;;  %s6790_s4 = inlined_call_operand.vmem [shape: f32[1,384], index: 4, kind: input, shape index: {}]   ;;  %s6791_s5 = inlined_call_operand.vmem [shape: f32[1,64], index: 5, kind: input, shape index: {}]   ;;  %s6792_s6 = inlined_call_operand.hbm [shape: f32[64,384], index: 6, kind: input, shape index: {}]   ;;  %s6793_s7 = inlined_call_operand.hbm [shape: f32[64,384], index: 7, kind: input, shape index: {}]   ;;  %s6794_s8 = inlined_call_operand.hbm [shape: f32[64,384], index: 8, kind: input, shape index: {}]   ;;  %s6795_s9 = inlined_call_operand.vmem [shape: f32[1,384], index: 9, kind: input, shape index: {}]   ;;  %s6796_s10 = inlined_call_operand.vmem [shape: f32[1,64], index: 10, kind: input, shape index: {}]   ;;  %s6797_s11 = inlined_call_operand.vmem [shape: f32[8,64], index: 11, kind: input, shape index: {}]   ;;  %s6798_s12 = inlined_call_operand.<no memory space> [shape: f32[1,1], index: 12, kind: input, shape index: {}]   ;;  %s6799_s13 = inlined_call_operand.vmem [shape: f32[2,1], index: 13, kind: output, shape index: {}]  }
   0x1   :  { %20 = vsyncpa [#allocation9], 0 }
   0x2   :  { %21 = vsyncpa [#allocation12], 0  ;;  %s5783_s25 = smov [#allocation8]   ;;  %s5784_s27 = smov [#allocation6]  }
   0x3   :  { %s49_s26 = sshll.u32 %s5783_s25, 4  ;;  %s33_s28 = sshll.u32 %s5784_s27, 4  ;;  %s50_s26 = int_to_ptr.vmem [resolvable:$true] %s49_s26  ;;  %s5862_s28 = int_to_ptr.vmem [resolvable:$true] %s33_s28 }
   0x4   :  { %s5689_s14 = scalar_lea.hbm %s6792_s6, 3072 }
   0x5   :  { %p5690_p0 = scmp.ne.s32.totalorder %s6792_s6, %s5689_s14  ;;  %p5693_p1 = scmp.lt.u32.totalorder %s5689_s14, %s6792_s6 }
   0x7   :  { %p5695_p2 = pnand %p5693_p1, %p5690_p0 }
   0x9   :  { %5698 = shalt.err (!%p5695_p2)
}
   0xa   :  { %s5699_s19 = scalar_lea.vmem %s50_s26, 3072  ;;  %p5704_p4 = scmp.lt.s32.totalorder %s50_s26, %s50_s26 }
   0xb   :  { %p5700_p3 = scmp.ne.s32.totalorder %s50_s26, %s5699_s19  ;;  %p5705_p5 = scmp.lt.s32.totalorder %s5699_s19, %s5699_s19 }
   0xd   :  { %p5706_p6 = por %p5705_p5, %p5704_p4 }
   0xf   :  { %p5707_p7 = pnand %p5706_p6, %p5700_p3 }
  0x11   :  { %5710 = shalt.err (!%p5707_p7)
}
  0x12   :  { %s5785_s20 = smov 384   ;;  %s5786_s21 = smov 24  }
  0x13   :  { %55 = dma.hbm_to_vmem [thread:$0]  %s6792_s6, 3072, %s50_s26, [#allocation9], %s5785_s20, %s5785_s20, %s5786_s21  }
  0x14   :  { %s5711_s27 = scalar_lea.hbm %s6789_s3, 3072 }
  0x15   :  { %p5712_p8 = scmp.ne.s32.totalorder %s6789_s3, %s5711_s27  ;;  %p5715_p9 = scmp.lt.u32.totalorder %s5711_s27, %s6789_s3 }
  0x17   :  { %p5717_p10 = pnand %p5715_p9, %p5712_p8 }
  0x19   :  { %5720 = shalt.err (!%p5717_p10)
}
  0x1a   :  { %s5721_s16 = scalar_lea.vmem %s5862_s28, 3072  ;;  %p5726_p12 = scmp.lt.s32.totalorder %s5862_s28, %s5862_s28 }
  0x1b   :  { %p5722_p11 = scmp.ne.s32.totalorder %s5862_s28, %s5721_s16  ;;  %p5727_p13 = scmp.lt.s32.totalorder %s5721_s16, %s5721_s16 }
  0x1d   :  { %p5728_p0 = por %p5727_p13, %p5726_p12 }
  0x1f   :  { %p5729_p1 = pnand %p5728_p0, %p5722_p11 }
  0x21   :  { %5732 = shalt.err (!%p5729_p1)
}
  0x22   :  { %39 = dma.hbm_to_vmem [thread:$0]  %s6789_s3, 3072, %s5862_s28, [#allocation7], %s5785_s20, %s5785_s20, %s5786_s21  }
  0x23   :  { %s5787_s17 = smov [#allocation10]   ;;  %s5788_s19 = smov [#allocation11]  }
  0x24   :  { %s61_s18 = sshll.u32 %s5787_s17, 4  ;;  %s73_s22 = sshll.u32 %s5788_s19, 4  ;;  %s62_s18 = int_to_ptr.vmem [resolvable:$true] %s61_s18  ;;  %s5899_s22 = int_to_ptr.vmem [resolvable:$true] %s73_s22 }
  0x25   :  { %s5733_s25 = scalar_lea.hbm %s6793_s7, 3072 }
  0x26   :  { %p5734_p2 = scmp.ne.s32.totalorder %s6793_s7, %s5733_s25  ;;  %p5737_p3 = scmp.lt.u32.totalorder %s5733_s25, %s6793_s7 }
  0x28   :  { %p5739_p4 = pnand %p5737_p3, %p5734_p2 }
  0x2a   :  { %5742 = shalt.err (!%p5739_p4)
}
  0x2b   :  { %s5743_s3 = scalar_lea.vmem %s62_s18, 3072  ;;  %p5748_p6 = scmp.lt.s32.totalorder %s62_s18, %s62_s18 }
  0x2c   :  { %p5744_p5 = scmp.ne.s32.totalorder %s62_s18, %s5743_s3  ;;  %p5749_p7 = scmp.lt.s32.totalorder %s5743_s3, %s5743_s3 }
  0x2e   :  { %p5750_p8 = por %p5749_p7, %p5748_p6 }
  0x30   :  { %p5751_p9 = pnand %p5750_p8, %p5744_p5 }
  0x32   :  { %5754 = shalt.err (!%p5751_p9)
}
  0x33   :  { %67 = dma.hbm_to_vmem [thread:$0]  %s6793_s7, 3072, %s62_s18, [#allocation9], %s5785_s20, %s5785_s20, %s5786_s21  }
  0x34   :  { %s5755_s26 = scalar_lea.hbm %s6794_s8, 3072 }
  0x35   :  { %p5756_p10 = scmp.ne.s32.totalorder %s6794_s8, %s5755_s26  ;;  %p5759_p11 = scmp.lt.u32.totalorder %s5755_s26, %s6794_s8 }
  0x37   :  { %p5761_p12 = pnand %p5759_p11, %p5756_p10 }
  0x39   :  { %5764 = shalt.err (!%p5761_p12)
}
  0x3a   :  { %s5765_s25 = scalar_lea.vmem %s5899_s22, 3072  ;;  %p5770_p0 = scmp.lt.s32.totalorder %s5899_s22, %s5899_s22 }
  0x3b   :  { %p5766_p13 = scmp.ne.s32.totalorder %s5899_s22, %s5765_s25  ;;  %p5771_p1 = scmp.lt.s32.totalorder %s5765_s25, %s5765_s25 }
  0x3d   :  { %p5772_p2 = por %p5771_p1, %p5770_p0 }
  0x3f   :  { %p5773_p3 = pnand %p5772_p2, %p5766_p13 }
  0x41   :  { %5776 = shalt.err (!%p5773_p3)
}
  0x42   :  { %79 = dma.hbm_to_vmem [thread:$0]  %s6794_s8, 3072, %s5899_s22, [#allocation12], %s5785_s20, %s5785_s20, %s5786_s21  }
  0x43   :  { %5777 = dma.done.wait [#allocation7], 3072  }
  0x44   :  { %5778 = vsyncadd [#allocation7], 4294964224 }
  0x45   :  { %5779 = dma.done.wait [#allocation9], 6144  }
  0x46   :  { %5780 = vsyncadd [#allocation9], 4294961152 }
  0x47   :  { %5781 = dma.done.wait [#allocation12], 3072  }
  0x48   :  { %5782 = vsyncadd [#allocation12], 4294964224  ;;  %v5789_v0 = vmov 0.0   ;;  %v108_v1 = vld [vmem:[%s6787_s1] sm:$0xff]  ;;  %vm155_vm0 = vcmask 1043456   ;;  %vm130_vm1 = vcmask 31744   ;;  %v112_v52 = vlaneseq }
  0x49   :  { %226 = vmatprep.mubr.f32.mxu0 %v5789_v0  ;;  %v5943_v2 = vld [vmem:[%s6786_s0] sm:$0xff]  ;;  %v129_v4 = vcombine.high %v108_v1, %v108_v1  ;;  %v658_v6 = vld [vmem:[#allocation6 + $0x8] sm:$0xff]  ;;  %v5978_v12 = vld [vmem:[%s6786_s0 + $0x10] sm:$0xff]  ;;  %v5790_v15 = vmov 0.0|0.0   ;;  %vm5791_vm2 = vmmov 0   ;;  %vm691_vm3 = vcmask 523264  }
  0x4a   :  { %v404_v3 = vld [vmem:[%s6788_s2] sm:$0xff]  ;;  %4520 = vmatprep.mubr.msk.f32.mxu1 %vm130_vm1, %v5943_v2  ;;  %v109_v9 = vld [vmem:[%s6787_s1 + $0x8] sm:$0xf]  ;;  %v5989_v13 = vld [vmem:[%s6786_s0 + $0x18] sm:$0xff]  ;;  %v6142_v53 = vshrl.u32 %v112_v52, 7  ;;  %vm4174_vm4 = vcmask 1024  }
  0x4b   :  { %v408_v5 = vcombine.high %v404_v3, %v404_v3  ;;  %4183 = vmatprep.subr.msk.mxu0 %vm155_vm0, %v129_v4  ;;  %v661_v7 = vld [vmem:[#allocation6 + $0x20] sm:$0xff]  ;;  %v5965_v10 = vld [vmem:[%s6786_s0 + $0x8] sm:$0xff]  ;;  %4518 = vmatprep.subr.msk.mxu1 %vm155_vm0, %v109_v9  ;;  %v6015_v17 = vld [vmem:[%s6786_s0 + $0x30] sm:$0xff] }
  0x4c   :  { %4184 = vmatpush1.msk.msra.mxu0 %vm155_vm0, %v108_v1  ;;  %v5952_v8 = vpack.c.bf16 %v661_v7, %v658_v6  ;;  %4519 = vmatpush3.msk.msra.mxu1 %vm155_vm0, %v109_v9  ;;  %v405_v11 = vld [vmem:[%s6788_s2 + $0x8] sm:$0xf]  ;;  %v5997_v14 = vld [vmem:[%s6786_s0 + $0x20] sm:$0xff]  ;;  %v6025_v18 = vld [vmem:[%s6786_s0 + $0x38] sm:$0xff]  ;;  %v122_v54 = vsub.s32 2, %v6142_v53 }
  0x4d   :  { %4185 = vmatmul.mubr.msk.f32.vlgmr.msra.gmra.mrb[0].mxu0 %vm130_vm1, %v5943_v2  ;;  %4202 = vmatprep.subr.msk.mxu0 %vm155_vm0, %v408_v5  ;;  %v6008_v16 = vld [vmem:[%s6786_s0 + $0x28] sm:$0xff]  ;;  %v659_v19 = vld [vmem:[#allocation6 + $0x10] sm:$0xff]  ;;  %v665_v22 = vld [vmem:[#allocation6 + $0x40] sm:$0xff] }
  0x4e   :  { %4203 = vmatpush1.msk.msra.mxu0 %vm155_vm0, %v404_v3  ;;  %232 = vmatprep.mubr.f32.mxu0 %v5789_v0  ;;  %v662_v20 = vld [vmem:[#allocation6 + $0x28] sm:$0xff]  ;;  %v668_v23 = vld [vmem:[#allocation6 + $0x58] sm:$0xff]  ;;  %v671_v25 = vld [vmem:[#allocation6 + $0x70] sm:$0xff] }
  0x4f   :  { %4907 = vmatprep.subr.bf16.mxu0 %v5952_v8  ;;  %4521 = vmatmul.mubr.msk.f32.vlgmr.msra.gmra.mrb[0].mxu1 %vm130_vm1, %v5965_v10  ;;  %v6034_v21 = vpack.c.bf16 %v662_v20, %v659_v19  ;;  %v6044_v24 = vpack.c.bf16 %v668_v23, %v665_v22  ;;  %v674_v26 = vld [vmem:[#allocation6 + $0x88] sm:$0xff]  ;;  %v677_v28 = vld [vmem:[#allocation6 + $0xa0] sm:$0xff]  ;;  %v680_v29 = vld [vmem:[#allocation6 + $0xb8] sm:$0xff] }
  0x50   :  { %4523 = vmatprep.mubr.msk.f32.mxu1 %vm130_vm1, %v5978_v12  ;;  %4532 = vmatprep.subr.msk.mxu1 %vm155_vm0, %v405_v11  ;;  %v6055_v27 = vpack.c.bf16 %v674_v26, %v671_v25  ;;  %v657_v30 = vld [vmem:[#allocation6] sm:$0xff]  ;;  %v660_v31 = vld [vmem:[#allocation6 + $0x18] sm:$0xff]  ;;  %v6066_v32 = vpack.c.bf16 %v680_v29, %v677_v28  ;;  %v667_v34 = vld [vmem:[#allocation6 + $0x50] sm:$0xff] }
  0x51   :  { %4186 = vmatmul.mubr.msk.f32.gmra.mrb[2].mxu0 %vm130_vm1, %v5965_v10  ;;  %4533 = vmatpush3.msk.msra.mxu1 %vm155_vm0, %v405_v11  ;;  %v664_v33 = vld [vmem:[#allocation6 + $0x38] sm:$0xff]  ;;  %v6071_v35 = vpack.c.bf16 %v660_v31, %v657_v30  ;;  %v663_v37 = vld [vmem:[#allocation6 + $0x30] sm:$0xff]  ;;  %v666_v38 = vld [vmem:[#allocation6 + $0x48] sm:$0xff] }
  0x52   :  { %238 = vmatprep.mubr.f32.mxu0 %v5789_v0  ;;  %4922 = vmatprep.subr.bf16.mxu1 %v5790_v15  ;;  %v6075_v36 = vpack.c.bf16 %v667_v34, %v664_v33  ;;  %v670_v39 = vld [vmem:[#allocation6 + $0x68] sm:$0xff]  ;;  %v673_v40 = vld [vmem:[#allocation6 + $0x80] sm:$0xff]  ;;  %v6083_v41 = vpack.c.bf16 %v666_v38, %v663_v37  ;;  %v672_v44 = vld [vmem:[#allocation6 + $0x78] sm:$0xff]  ;;  %v114_v34 = vsub.s32 0, %v6142_v53  ;;  %v118_v37 = vsub.s32 1, %v6142_v53 }
  0x53   :  { %4524 = vmatmul.mubr.msk.f32.gmra.mrb[2].mxu1 %vm130_vm1, %v5989_v13  ;;  %v6086_v42 = vpack.c.bf16 %v673_v40, %v670_v39  ;;  %v669_v43 = vld [vmem:[#allocation6 + $0x60] sm:$0xff]  ;;  %v676_v45 = vld [vmem:[#allocation6 + $0x98] sm:$0xff]  ;;  %v679_v46 = vld [vmem:[#allocation6 + $0xb0] sm:$0xff] }
  0x54   :  { %4526 = vmatprep.mubr.msk.f32.mxu1 %vm130_vm1, %v5997_v14  ;;  %v6097_v47 = vpack.c.bf16 %v672_v44, %v669_v43  ;;  %v6100_v48 = vpack.c.bf16 %v679_v46, %v676_v45  ;;  %v675_v49 = vld [vmem:[#allocation6 + $0x90] sm:$0xff]  ;;  %v678_v50 = vld [vmem:[#allocation6 + $0xa8] sm:$0xff]  ;;  %v110_v55 = vld [vmem:[%s6790_s4] sm:$0x7] }
  0x55   :  { %4187 = vmatmul.mubr.msk.f32.gmra.mrb[4].mxu0 %vm130_vm1, %v5978_v12  ;;  %v6108_v51 = vpack.c.bf16 %v678_v50, %v675_v49  ;;  %v123_v56 = vrot.slane %v110_v55, %v122_v54  ;;  %v6168_v38 = vrot.slane %v110_v55, %v114_v34  ;;  %v6172_v40 = vrot.slane %v110_v55, %v118_v37 }
  0x56   :  { %244 = vmatprep.mubr.f32.mxu0 %v5789_v0 }
  0x57   :  { %4527 = vmatmul.mubr.msk.f32.gmra.mrb[4].mxu1 %vm130_vm1, %v6008_v16 }
  0x58   :  { %4529 = vmatprep.mubr.msk.f32.mxu1 %vm130_vm1, %v6015_v17 }
  0x59   :  { %4188 = vmatmul.mubr.msk.f32.gmra.mrb[6].mxu0 %vm130_vm1, %v5989_v13 }
  0x5a   :  { %250 = vmatprep.mubr.f32.mxu0 %v5789_v0 }
  0x5b   :  { %4530 = vmatmul.mubr.msk.f32.gmra.mrb[6].mxu1 %vm130_vm1, %v6025_v18 }
  0x5c   :  { %4534 = vmatprep.mubr.msk.f32.mxu1 %vm130_vm1, %v5943_v2 }
  0x5d   :  { %4189 = vmatmul.mubr.msk.f32.gmra.mrb[8].mxu0 %vm130_vm1, %v5997_v14 }
  0x5e   :  { %256 = vmatprep.mubr.f32.mxu0 %v5789_v0 }
  0x5f   :  { %4535 = vmatmul.mubr.msk.f32.vlgmr.msra.gmra.mrb[8].mxu1 %vm130_vm1, %v5965_v10 }
  0x60   :  { %4537 = vmatprep.mubr.msk.f32.mxu1 %vm130_vm1, %v5978_v12  ;;  %4924 = vmatpush3.bf16.msra.mxu1 %v6034_v21 }
  0x61   :  { %4190 = vmatmul.mubr.msk.f32.gmra.mrb[10].mxu0 %vm130_vm1, %v6008_v16  ;;  %4925 = vmatprep.subr.bf16.mxu1 %v5790_v15 }
  0x62   :  { %262 = vmatprep.mubr.f32.mxu0 %v5789_v0 }
  0x63   :  { %4538 = vmatmul.mubr.msk.f32.gmra.mrb[10].mxu1 %vm130_vm1, %v5989_v13 }
  0x64   :  { %4540 = vmatprep.mubr.msk.f32.mxu1 %vm130_vm1, %v5997_v14  ;;  %4927 = vmatpush3.bf16.msra.mxu1 %v6044_v24 }
  0x65   :  { %4191 = vmatmul.mubr.msk.f32.gmra.mrb[12].mxu0 %vm130_vm1, %v6015_v17  ;;  %4928 = vmatprep.subr.bf16.mxu1 %v5790_v15 }
  0x66   :  { %268 = vmatprep.mubr.f32.mxu0 %v5789_v0 }
  0x67   :  { %4541 = vmatmul.mubr.msk.f32.gmra.mrb[12].mxu1 %vm130_vm1, %v6008_v16 }
  0x68   :  { %4543 = vmatprep.mubr.msk.f32.mxu1 %vm130_vm1, %v6015_v17  ;;  %4930 = vmatpush3.bf16.msra.mxu1 %v6055_v27 }
  0x69   :  { %4192 = vmatmul.mubr.msk.f32.gmra.mrb[14].mxu0 %vm130_vm1, %v6025_v18  ;;  %4931 = vmatprep.subr.bf16.mxu1 %v5790_v15 }
  0x6a   :  { %479 = vmatprep.mubr.f32.mxu0 %v5789_v0 }
  0x6b   :  { %4544 = vmatmul.mubr.msk.f32.gmra.mrb[14].mxu1 %vm130_vm1, %v6025_v18 }
  0x6c   :  { %4562 = vmatprep.mubr.msk.f32.mxu1 %vm5791_vm2, %v5789_v0  ;;  %4933 = vmatpush3.bf16.msra.mxu1 %v6066_v32 }
  0x6d   :  { %4950 = vmatprep.subr.bf16.mxu1 %v5790_v15 }
  0x6f   :  { %4563 = vmatmul.mubr.f32.vlgmr.msra.gmra.mrb[16].mxu1 %v5789_v0 }
  0x70   :  { %4952 = vmatpush3.bf16.msra.mxu1 %v6034_v21  ;;  %4581 = vmatprep.mubr.msk.f32.mxu1 %vm5791_vm2, %v5789_v0 }
  0x71   :  { %4204 = vmatmul.mubr.msk.f32.vlgmr.msra.gmra.mrb[14].mxu0 %vm130_vm1, %v5943_v2  ;;  %4953 = vmatprep.subr.bf16.mxu1 %v5790_v15 }
  0x72   :  { %4909 = vmatpush1.bf16.msra.mxu0 %v6071_v35  ;;  %485 = vmatprep.mubr.f32.mxu0 %v5789_v0 }
  0x73   :  { %4911 = vmatprep.subr.bf16.mxu0 %v6075_v36 }
  0x74   :  { %4955 = vmatpush3.bf16.msra.mxu1 %v6044_v24 }
  0x75   :  { %4205 = vmatmul.mubr.msk.f32.gmra.mrb[12].mxu0 %vm130_vm1, %v5965_v10  ;;  %4956 = vmatprep.subr.bf16.mxu1 %v5790_v15 }
  0x76   :  { %491 = vmatprep.mubr.f32.mxu0 %v5789_v0  ;;  %4913 = vmatpush1.bf16.msra.mxu0 %v6083_v41 }
  0x77   :  { %4915 = vmatprep.subr.bf16.mxu0 %v6086_v42 }
  0x78   :  { %4958 = vmatpush3.bf16.msra.mxu1 %v6055_v27 }
  0x79   :  { %4206 = vmatmul.mubr.msk.f32.gmra.mrb[10].mxu0 %vm130_vm1, %v5978_v12  ;;  %4959 = vmatprep.subr.bf16.mxu1 %v5790_v15 }
  0x7a   :  { %497 = vmatprep.mubr.f32.mxu0 %v5789_v0  ;;  %4917 = vmatpush1.bf16.msra.mxu0 %v6097_v47 }
  0x7b   :  { %4919 = vmatprep.subr.bf16.mxu0 %v6100_v48 }
  0x7c   :  { %4961 = vmatpush3.bf16.msra.mxu1 %v6066_v32 }
  0x7d   :  { %4207 = vmatmul.mubr.msk.f32.gmra.mrb[8].mxu0 %vm130_vm1, %v5989_v13  ;;  %4978 = vmatprep.subr.bf16.mxu1 %v5790_v15 }
  0x7e   :  { %503 = vmatprep.mubr.f32.mxu0 %v5789_v0  ;;  %4921 = vmatpush1.bf16.msra.mxu0 %v6108_v51 }
  0x7f   :  { %4935 = vmatprep.subr.bf16.mxu0 %v5952_v8 }
  0x81   :  { %4208 = vmatmul.mubr.msk.f32.gmra.mrb[6].mxu0 %vm130_vm1, %v5997_v14 }
  0x82   :  { %509 = vmatprep.mubr.f32.mxu0 %v5789_v0 }
  0x85   :  { %4209 = vmatmul.mubr.msk.f32.gmra.mrb[4].mxu0 %vm130_vm1, %v6008_v16 }
  0x86   :  { %515 = vmatprep.mubr.f32.mxu0 %v5789_v0 }
  0x89   :  { %4210 = vmatmul.mubr.msk.f32.gmra.mrb[2].mxu0 %vm130_vm1, %v6015_v17 }
  0x8a   :  { %521 = vmatprep.mubr.f32.mxu0 %v5789_v0 }
  0x8d   :  { %4211 = vmatmul.mubr.msk.f32.gmra.mrb[0].mxu0 %vm130_vm1, %v6025_v18 }
  0x8e   :  { %759 = vmatprep.mubr.f32.mxu0 %v5789_v0 }
  0x95   :  { %760 = vmatmul.mubr.f32.vlgmr.msra.gmra.mrb[0].mxu0 %v5789_v0 }
  0x96   :  { %4937 = vmatpush1.bf16.msra.mxu0 %v6071_v35  ;;  %941 = vmatprep.mubr.f32.mxu0 %v5789_v0 }
  0x97   :  { %4939 = vmatprep.subr.bf16.mxu0 %v6075_v36 }
  0x9a   :  { %4941 = vmatpush1.bf16.msra.mxu0 %v6083_v41 }
  0x9b   :  { %4943 = vmatprep.subr.bf16.mxu0 %v6086_v42 }
  0x9e   :  { %4945 = vmatpush1.bf16.msra.mxu0 %v6097_v47 }
  0x9f   :  { %4947 = vmatprep.subr.bf16.mxu0 %v6100_v48 }
  0xa2   :  { %4949 = vmatpush1.bf16.msra.mxu0 %v6108_v51 }
  0xa3   :  { %4963 = vmatprep.subr.bf16.mxu0 %v5952_v8 }
 0x122   :  { %v4522_v57 = vpop.f32.mrb[0].mxu1 }
 0x123   :  { %v347_v58 = vadd.f32 %v4522_v57, %v123_v56  ;;  %v341_v59 = vpop.f32.mrb[1].mxu1  ;;  %v6179_v57 = vld [vmem:[%s6791_s5] ss:$0 sm:$0xff] }
 0x124   :  { %v342_v20 = vadd.f32 %v341_v59, %v123_v56 }
 0x126   :  { %v4525_v60 = vpop.f32.mrb[2].mxu1 }
 0x127   :  { %v357_v61 = vadd.f32 %v4525_v60, %v123_v56  ;;  %v351_v62 = vpop.f32.mrb[3].mxu1 }
 0x128   :  { %v352_v63 = vadd.f32 %v351_v62, %v123_v56 }
 0x12a   :  { %v4528_v1 = vpop.f32.mrb[4].mxu1 }
 0x12b   :  { %v367_v2 = vadd.f32 %v4528_v1, %v123_v56  ;;  %v361_v3 = vpop.f32.mrb[5].mxu1 }
 0x12c   :  { %v362_v4 = vadd.f32 %v361_v3, %v123_v56 }
 0x12e   :  { %v4531_v5 = vpop.f32.mrb[6].mxu1 }
 0x12f   :  { %v377_v6 = vadd.f32 %v4531_v5, %v123_v56  ;;  %v371_v7 = vpop.f32.mrb[7].mxu1 }
 0x130   :  { %v372_v9 = vadd.f32 %v371_v7, %v123_v56 }
 0x132   :  { %v4536_v10 = vpop.f32.mrb[8].mxu1 }
 0x133   :  { %v6150_v11 = vadd.f32 %v4536_v10, %v372_v9  ;;  %v594_v12 = vpop.f32.mrb[9].mxu1 }
 0x134   :  { %v6152_v13 = vadd.f32 %v594_v12, %v377_v6 }
 0x136   :  { %v4539_v14 = vpop.f32.mrb[10].mxu1 }
 0x137   :  { %v6154_v16 = vadd.f32 %v4539_v14, %v362_v4  ;;  %v604_v17 = vpop.f32.mrb[11].mxu1 }
 0x138   :  { %v6156_v18 = vadd.f32 %v604_v17, %v367_v2 }
 0x13a   :  { %v4542_v19 = vpop.f32.mrb[12].mxu1 }
 0x13b   :  { %v6158_v22 = vadd.f32 %v4542_v19, %v352_v63  ;;  %v614_v23 = vpop.f32.mrb[13].mxu1 }
 0x13c   :  { %v6160_v25 = vadd.f32 %v614_v23, %v357_v61 }
 0x13e   :  { %v4545_v26 = vpop.f32.mrb[14].mxu1 }
 0x13f   :  { %v690_v28 = vadd.f32 %v4545_v26, %v342_v20  ;;  %v624_v29 = vpop.f32.mrb[15].mxu1 }
 0x140   :  { %v6162_v30 = vadd.f32 %v624_v29, %v347_v58 }
 0x142   :  { %v832_v31 = vpop.f32.mrb[16].mxu1 }
 0x143   :  { %v4564_v33 = vpop.f32.mrb[17].mxu1  ;;  %v856_v58 = vadd.f32 %v6179_v57, %v832_v31 }
 0x168   :  { %v761_v39 = vpop.f32.mrb[0].mxu0 }
 0x169   :  { %v5418_v43 = vadd.f32 %v761_v39, %v6168_v38  ;;  %v763_v44 = vpop.f32.mrb[1].mxu0 }
 0x16a   :  { %v5419_v46 = vadd.f32 %v763_v44, %v6172_v40 }
 0x16b   :  { %v4221_v45 = vmul.f32 -1.442695, %v5418_v43 }
 0x16c   :  { %v4222_v49 = vmul.f32 -1.442695, %v5419_v46 }
 0x16d   :  { %5525 = vpow2.f32 %v4221_v45 }
 0x16e   :  { %5527 = vpow2.f32 %v4222_v49 }
 0x177   :  { %v5526_v50 = vpop.eup %5525 }
 0x178   :  { %v840_v52 = vadd.f32 1.0, %v5526_v50  ;;  %v5528_v56 = vpop.eup %5527 }
 0x179   :  { %v847_v55 = vadd.f32 1.0, %v5528_v56 }
 0x17a   :  { %5529 = vrcp.f32 %v840_v52 }
 0x17b   :  { %5531 = vrcp.f32 %v847_v55 }
 0x184   :  { %v5530_v59 = vpop.eup %5529 }
 0x185   :  { %v857_v60 = vmul.f32 %v5530_v59, %v856_v58  ;;  %v5532_v62 = vpop.eup %5531 }
 0x186   :  { %v860_v63 = vsub.f32 1.0, %v5532_v62  ;;  %v862_v3 = vmul.f32 0.0, %v5532_v62 }
 0x187   :  { %v858_v61 = vadd.f32 %v857_v60, %v690_v28 }
 0x189   :  { %5533 = vtanh.f32 %v858_v61 }
 0x193   :  { %v5534_v1 = vpop.eup %5533 }
 0x194   :  { %v861_v2 = vmul.f32 %v5534_v1, %v860_v63 }
 0x196   :  { %v863_v4 = vadd.f32 %v862_v3, %v861_v2 }
 0x198   :  { %864 = vst.msk [vmem:[#allocation4] sm:$0xff] %vm691_vm3, %v863_v4  ;;  %4224 = vmatmul.mubr.msk.f32.vlgmr.msra.gmra.mrb[2].mxu0 %vm691_vm3, %v863_v4  ;;  %4582 = vmatmul.mubr.msk.f32.vlgmr.msra.gmra.mrb[18].mxu1 %vm691_vm3, %v863_v4 }
 0x199   :  { %4965 = vmatpush1.bf16.msra.mxu0 %v6071_v35  ;;  %4980 = vmatpush3.bf16.msra.mxu1 %v6034_v21 }
 0x19a   :  { %4967 = vmatprep.subr.bf16.mxu0 %v6075_v36  ;;  %4981 = vmatprep.subr.bf16.mxu1 %v5790_v15 }
 0x19b   :  { %1117 = vmatprep.mubr.f32.mxu0 %v5789_v0  ;;  %4600 = vmatprep.mubr.msk.f32.mxu1 %vm5791_vm2, %v5789_v0 }
 0x19d   :  { %4969 = vmatpush1.bf16.msra.mxu0 %v6083_v41  ;;  %4983 = vmatpush3.bf16.msra.mxu1 %v6044_v24 }
 0x19e   :  { %4971 = vmatprep.subr.bf16.mxu0 %v6086_v42  ;;  %4984 = vmatprep.subr.bf16.mxu1 %v5790_v15 }
 0x1a1   :  { %4973 = vmatpush1.bf16.msra.mxu0 %v6097_v47  ;;  %4986 = vmatpush3.bf16.msra.mxu1 %v6055_v27 }
 0x1a2   :  { %4975 = vmatprep.subr.bf16.mxu0 %v6100_v48  ;;  %4987 = vmatprep.subr.bf16.mxu1 %v5790_v15 }
 0x1a5   :  { %4977 = vmatpush1.bf16.msra.mxu0 %v6108_v51  ;;  %4989 = vmatpush3.bf16.msra.mxu1 %v6066_v32 }
 0x1a6   :  { %4991 = vmatprep.subr.bf16.mxu0 %v5952_v8  ;;  %5006 = vmatprep.subr.bf16.mxu1 %v5790_v15 }
 0x26b   :  { %v943_v5 = vpop.f32.mrb[2].mxu0  ;;  %v1014_v6 = vpop.f32.mrb[18].mxu1 }
 0x26c   :  { %v5420_v7 = vadd.f32 %v943_v5, %v6168_v38  ;;  %v945_v9 = vpop.f32.mrb[3].mxu0  ;;  %v4583_v10 = vpop.f32.mrb[19].mxu1  ;;  %v1032_v28 = vadd.f32 %v6179_v57, %v1014_v6 }
 0x26d   :  { %v5421_v14 = vadd.f32 %v945_v9, %v6172_v40 }
 0x26e   :  { %v4226_v12 = vmul.f32 -1.442695, %v5420_v7 }
 0x26f   :  { %v4227_v17 = vmul.f32 -1.442695, %v5421_v14 }
 0x270   :  { %5535 = vpow2.f32 %v4226_v12 }
 0x271   :  { %5537 = vpow2.f32 %v4227_v17 }
 0x27a   :  { %v5536_v19 = vpop.eup %5535 }
 0x27b   :  { %v1022_v20 = vadd.f32 1.0, %v5536_v19  ;;  %v5538_v23 = vpop.eup %5537 }
 0x27c   :  { %v1029_v26 = vadd.f32 1.0, %v5538_v23 }
 0x27d   :  { %5539 = vrcp.f32 %v1022_v20 }
 0x27e   :  { %5541 = vrcp.f32 %v1029_v26 }
 0x287   :  { %v5540_v29 = vpop.eup %5539 }
 0x288   :  { %v1033_v31 = vmul.f32 %v5540_v29, %v1032_v28  ;;  %v5542_v39 = vpop.eup %5541 }
 0x289   :  { %v1036_v43 = vsub.f32 1.0, %v5542_v39  ;;  %v1038_v46 = vmul.f32 %v5542_v39, %v863_v4 }
 0x28a   :  { %v1034_v33 = vadd.f32 %v1033_v31, %v6162_v30 }
 0x28c   :  { %5543 = vtanh.f32 %v1034_v33 }
 0x296   :  { %v5544_v44 = vpop.eup %5543 }
 0x297   :  { %v1037_v45 = vmul.f32 %v5544_v44, %v1036_v43 }
 0x299   :  { %v1039_v49 = vadd.f32 %v1038_v46, %v1037_v45 }
 0x29b   :  { %1040 = vst.msk [vmem:[#allocation4 + $0x8] sm:$0xff] %vm691_vm3, %v1039_v49  ;;  %4228 = vmatmul.mubr.msk.f32.vlgmr.msra.gmra.mrb[4].mxu0 %vm691_vm3, %v1039_v49  ;;  %4601 = vmatmul.mubr.msk.f32.vlgmr.msra.gmra.mrb[20].mxu1 %vm691_vm3, %v1039_v49 }
 0x29c   :  { %4993 = vmatpush1.bf16.msra.mxu0 %v6071_v35  ;;  %5008 = vmatpush3.bf16.msra.mxu1 %v6034_v21 }
 0x29d   :  { %4995 = vmatprep.subr.bf16.mxu0 %v6075_v36  ;;  %5009 = vmatprep.subr.bf16.mxu1 %v5790_v15 }
 0x29e   :  { %1293 = vmatprep.mubr.f32.mxu0 %v5789_v0  ;;  %4619 = vmatprep.mubr.msk.f32.mxu1 %vm5791_vm2, %v5789_v0 }
 0x2a0   :  { %4997 = vmatpush1.bf16.msra.mxu0 %v6083_v41  ;;  %5011 = vmatpush3.bf16.msra.mxu1 %v6044_v24 }
 0x2a1   :  { %4999 = vmatprep.subr.bf16.mxu0 %v6086_v42  ;;  %5012 = vmatprep.subr.bf16.mxu1 %v5790_v15 }
 0x2a4   :  { %5001 = vmatpush1.bf16.msra.mxu0 %v6097_v47  ;;  %5014 = vmatpush3.bf16.msra.mxu1 %v6055_v27 }
 0x2a5   :  { %5003 = vmatprep.subr.bf16.mxu0 %v6100_v48  ;;  %5015 = vmatprep.subr.bf16.mxu1 %v5790_v15 }
 0x2a8   :  { %5005 = vmatpush1.bf16.msra.mxu0 %v6108_v51  ;;  %5017 = vmatpush3.bf16.msra.mxu1 %v6066_v32 }
 0x2a9   :  { %5019 = vmatprep.subr.bf16.mxu0 %v5952_v8  ;;  %5034 = vmatprep.subr.bf16.mxu1 %v5790_v15 }
 0x36e   :  { %v1119_v30 = vpop.f32.mrb[4].mxu0  ;;  %v1190_v50 = vpop.f32.mrb[20].mxu1 }
 0x36f   :  { %v5422_v52 = vadd.f32 %v1119_v30, %v6168_v38  ;;  %v1121_v56 = vpop.f32.mrb[5].mxu0  ;;  %v4602_v55 = vpop.f32.mrb[21].mxu1  ;;  %v1208_v2 = vadd.f32 %v6179_v57, %v1190_v50 }
 0x370   :  { %v5423_v59 = vadd.f32 %v1121_v56, %v6172_v40 }
 0x371   :  { %v4230_v58 = vmul.f32 -1.442695, %v5422_v52 }
 0x372   :  { %v4231_v60 = vmul.f32 -1.442695, %v5423_v59 }
 0x373   :  { %5545 = vpow2.f32 %v4230_v58 }
 0x374   :  { %5547 = vpow2.f32 %v4231_v60 }
 0x37d   :  { %v5546_v61 = vpop.eup %5545 }
 0x37e   :  { %v1198_v62 = vadd.f32 1.0, %v5546_v61  ;;  %v5548_v63 = vpop.eup %5547 }
 0x37f   :  { %v1205_v1 = vadd.f32 1.0, %v5548_v63 }
 0x380   :  { %5549 = vrcp.f32 %v1198_v62 }
 0x381   :  { %5551 = vrcp.f32 %v1205_v1 }
 0x38a   :  { %v5550_v3 = vpop.eup %5549 }
 0x38b   :  { %v1209_v4 = vmul.f32 %v5550_v3, %v1208_v2  ;;  %v5552_v6 = vpop.eup %5551 }
 0x38c   :  { %v1212_v7 = vsub.f32 1.0, %v5552_v6  ;;  %v1214_v12 = vmul.f32 %v5552_v6, %v1039_v49 }
 0x38d   :  { %v1210_v5 = vadd.f32 %v1209_v4, %v6158_v22 }
 0x38f   :  { %5553 = vtanh.f32 %v1210_v5 }
 0x399   :  { %v5554_v9 = vpop.eup %5553 }
 0x39a   :  { %v1213_v10 = vmul.f32 %v5554_v9, %v1212_v7 }
 0x39c   :  { %v1215_v14 = vadd.f32 %v1214_v12, %v1213_v10 }
 0x39e   :  { %1216 = vst.msk [vmem:[#allocation4 + $0x10] sm:$0xff] %vm691_vm3, %v1215_v14  ;;  %4232 = vmatmul.mubr.msk.f32.vlgmr.msra.gmra.mrb[6].mxu0 %vm691_vm3, %v1215_v14  ;;  %4620 = vmatmul.mubr.msk.f32.vlgmr.msra.gmra.mrb[22].mxu1 %vm691_vm3, %v1215_v14 }
 0x39f   :  { %5021 = vmatpush1.bf16.msra.mxu0 %v6071_v35  ;;  %5036 = vmatpush3.bf16.msra.mxu1 %v6034_v21 }
 0x3a0   :  { %5023 = vmatprep.subr.bf16.mxu0 %v6075_v36  ;;  %5037 = vmatprep.subr.bf16.mxu1 %v5790_v15 }
 0x3a1   :  { %1469 = vmatprep.mubr.f32.mxu0 %v5789_v0  ;;  %4638 = vmatprep.mubr.msk.f32.mxu1 %vm5791_vm2, %v5789_v0 }
 0x3a3   :  { %5025 = vmatpush1.bf16.msra.mxu0 %v6083_v41  ;;  %5039 = vmatpush3.bf16.msra.mxu1 %v6044_v24 }
 0x3a4   :  { %5027 = vmatprep.subr.bf16.mxu0 %v6086_v42  ;;  %5040 = vmatprep.subr.bf16.mxu1 %v5790_v15 }
 0x3a7   :  { %5029 = vmatpush1.bf16.msra.mxu0 %v6097_v47  ;;  %5042 = vmatpush3.bf16.msra.mxu1 %v6055_v27 }
 0x3a8   :  { %5031 = vmatprep.subr.bf16.mxu0 %v6100_v48  ;;  %5043 = vmatprep.subr.bf16.mxu1 %v5790_v15 }
 0x3ab   :  { %5033 = vmatpush1.bf16.msra.mxu0 %v6108_v51  ;;  %5045 = vmatpush3.bf16.msra.mxu1 %v6066_v32 }
 0x3ac   :  { %5047 = vmatprep.subr.bf16.mxu0 %v5952_v8  ;;  %5062 = vmatprep.subr.bf16.mxu1 %v5790_v15 }
 0x471   :  { %v1295_v22 = vpop.f32.mrb[6].mxu0  ;;  %v1366_v17 = vpop.f32.mrb[22].mxu1 }
 0x472   :  { %v5424_v19 = vadd.f32 %v1295_v22, %v6168_v38  ;;  %v1297_v20 = vpop.f32.mrb[7].mxu0  ;;  %v4621_v23 = vpop.f32.mrb[23].mxu1  ;;  %v1384_v44 = vadd.f32 %v6179_v57, %v1366_v17 }
 0x473   :  { %v5425_v28 = vadd.f32 %v1297_v20, %v6172_v40 }
 0x474   :  { %v4234_v26 = vmul.f32 -1.442695, %v5424_v19 }
 0x475   :  { %v4235_v29 = vmul.f32 -1.442695, %v5425_v28 }
 0x476   :  { %5555 = vpow2.f32 %v4234_v26 }
 0x477   :  { %5557 = vpow2.f32 %v4235_v29 }
 0x480   :  { %v5556_v31 = vpop.eup %5555 }
 0x481   :  { %v1374_v33 = vadd.f32 1.0, %v5556_v31  ;;  %v5558_v39 = vpop.eup %5557 }
 0x482   :  { %v1381_v43 = vadd.f32 1.0, %v5558_v39 }
 0x483   :  { %5559 = vrcp.f32 %v1374_v33 }
 0x484   :  { %5561 = vrcp.f32 %v1381_v43 }
 0x48d   :  { %v5560_v45 = vpop.eup %5559 }
 0x48e   :  { %v1385_v46 = vmul.f32 %v5560_v45, %v1384_v44  ;;  %v5562_v30 = vpop.eup %5561 }
 0x48f   :  { %v1388_v50 = vsub.f32 1.0, %v5562_v30  ;;  %v1390_v55 = vmul.f32 %v5562_v30, %v1215_v14 }
 0x490   :  { %v1386_v49 = vadd.f32 %v1385_v46, %v6160_v25 }
 0x492   :  { %5563 = vtanh.f32 %v1386_v49 }
 0x49c   :  { %v5564_v52 = vpop.eup %5563 }
 0x49d   :  { %v1389_v56 = vmul.f32 %v5564_v52, %v1388_v50 }
 0x49f   :  { %v1391_v58 = vadd.f32 %v1390_v55, %v1389_v56 }
 0x4a1   :  { %1392 = vst.msk [vmem:[#allocation4 + $0x18] sm:$0xff] %vm691_vm3, %v1391_v58  ;;  %4236 = vmatmul.mubr.msk.f32.vlgmr.msra.gmra.mrb[8].mxu0 %vm691_vm3, %v1391_v58  ;;  %4639 = vmatmul.mubr.msk.f32.vlgmr.msra.gmra.mrb[24].mxu1 %vm691_vm3, %v1391_v58 }
 0x4a2   :  { %5049 = vmatpush1.bf16.msra.mxu0 %v6071_v35  ;;  %5064 = vmatpush3.bf16.msra.mxu1 %v6034_v21 }
 0x4a3   :  { %5051 = vmatprep.subr.bf16.mxu0 %v6075_v36  ;;  %5065 = vmatprep.subr.bf16.mxu1 %v5790_v15 }
 0x4a4   :  { %1645 = vmatprep.mubr.f32.mxu0 %v5789_v0  ;;  %4657 = vmatprep.mubr.msk.f32.mxu1 %vm5791_vm2, %v5789_v0 }
 0x4a6   :  { %5053 = vmatpush1.bf16.msra.mxu0 %v6083_v41  ;;  %5067 = vmatpush3.bf16.msra.mxu1 %v6044_v24 }
 0x4a7   :  { %5055 = vmatprep.subr.bf16.mxu0 %v6086_v42  ;;  %5068 = vmatprep.subr.bf16.mxu1 %v5790_v15 }
 0x4aa   :  { %5057 = vmatpush1.bf16.msra.mxu0 %v6097_v47  ;;  %5070 = vmatpush3.bf16.msra.mxu1 %v6055_v27 }
 0x4ab   :  { %5059 = vmatprep.subr.bf16.mxu0 %v6100_v48  ;;  %5071 = vmatprep.subr.bf16.mxu1 %v5790_v15 }
 0x4ae   :  { %5061 = vmatpush1.bf16.msra.mxu0 %v6108_v51  ;;  %5073 = vmatpush3.bf16.msra.mxu1 %v6066_v32 }
 0x4af   :  { %5075 = vmatprep.subr.bf16.mxu0 %v5952_v8  ;;  %5090 = vmatprep.subr.bf16.mxu1 %v5790_v15 }
 0x574   :  { %v1471_v25 = vpop.f32.mrb[8].mxu0  ;;  %v1542_v59 = vpop.f32.mrb[24].mxu1 }
 0x575   :  { %v5426_v60 = vadd.f32 %v1471_v25, %v6168_v38  ;;  %v1473_v61 = vpop.f32.mrb[9].mxu0  ;;  %v4640_v62 = vpop.f32.mrb[25].mxu1  ;;  %v1560_v7 = vadd.f32 %v6179_v57, %v1542_v59 }
 0x576   :  { %v5427_v1 = vadd.f32 %v1473_v61, %v6172_v40 }
 0x577   :  { %v4238_v63 = vmul.f32 -1.442695, %v5426_v60 }
 0x578   :  { %v4239_v2 = vmul.f32 -1.442695, %v5427_v1 }
 0x579   :  { %5565 = vpow2.f32 %v4238_v63 }
 0x57a   :  { %5567 = vpow2.f32 %v4239_v2 }
 0x583   :  { %v5566_v3 = vpop.eup %5565 }
 0x584   :  { %v1550_v4 = vadd.f32 1.0, %v5566_v3  ;;  %v5568_v5 = vpop.eup %5567 }
 0x585   :  { %v1557_v6 = vadd.f32 1.0, %v5568_v5 }
 0x586   :  { %5569 = vrcp.f32 %v1550_v4 }
 0x587   :  { %5571 = vrcp.f32 %v1557_v6 }
 0x590   :  { %v5570_v9 = vpop.eup %5569 }
 0x591   :  { %v1561_v10 = vmul.f32 %v5570_v9, %v1560_v7  ;;  %v5572_v14 = vpop.eup %5571 }
 0x592   :  { %v1564_v22 = vsub.f32 1.0, %v5572_v14  ;;  %v1566_v20 = vmul.f32 %v5572_v14, %v1391_v58  ;;  %v2108_v14 = vld [vmem:[#allocation8 + $0x18] sm:$0xff] }
 0x593   :  { %v1562_v12 = vadd.f32 %v1561_v10, %v6154_v16 }
 0x595   :  { %5573 = vtanh.f32 %v1562_v12  ;;  %v2105_v12 = vld [vmem:[#allocation8] sm:$0xff] }
 0x59f   :  { %v5574_v17 = vpop.eup %5573 }
 0x5a0   :  { %v1565_v19 = vmul.f32 %v5574_v17, %v1564_v22  ;;  %v2112_v17 = vld [vmem:[#allocation8 + $0x38] sm:$0xff] }
 0x5a2   :  { %v1567_v23 = vadd.f32 %v1566_v20, %v1565_v19  ;;  %v2115_v19 = vld [vmem:[#allocation8 + $0x50] sm:$0xff] }
 0x5a4   :  { %1568 = vst.msk [vmem:[#allocation4 + $0x20] sm:$0xff] %vm691_vm3, %v1567_v23  ;;  %4240 = vmatmul.mubr.msk.f32.vlgmr.msra.gmra.mrb[10].mxu0 %vm691_vm3, %v1567_v23  ;;  %4658 = vmatmul.mubr.msk.f32.vlgmr.msra.gmra.mrb[26].mxu1 %vm691_vm3, %v1567_v23 }
 0x5a5   :  { %5077 = vmatpush1.bf16.msra.mxu0 %v6071_v35  ;;  %5092 = vmatpush3.bf16.msra.mxu1 %v6034_v21 }
 0x5a6   :  { %5079 = vmatprep.subr.bf16.mxu0 %v6075_v36  ;;  %5093 = vmatprep.subr.bf16.mxu1 %v5790_v15 }
 0x5a7   :  { %1821 = vmatprep.mubr.f32.mxu0 %v5789_v0  ;;  %4676 = vmatprep.mubr.msk.f32.mxu1 %vm5791_vm2, %v5789_v0 }
 0x5a9   :  { %5081 = vmatpush1.bf16.msra.mxu0 %v6083_v41  ;;  %5095 = vmatpush3.bf16.msra.mxu1 %v6044_v24 }
 0x5aa   :  { %5083 = vmatprep.subr.bf16.mxu0 %v6086_v42  ;;  %5096 = vmatprep.subr.bf16.mxu1 %v5790_v15 }
 0x5ad   :  { %5085 = vmatpush1.bf16.msra.mxu0 %v6097_v47  ;;  %5098 = vmatpush3.bf16.msra.mxu1 %v6055_v27 }
 0x5ae   :  { %5087 = vmatprep.subr.bf16.mxu0 %v6100_v48  ;;  %5099 = vmatprep.subr.bf16.mxu1 %v5790_v15 }
 0x5b1   :  { %5089 = vmatpush1.bf16.msra.mxu0 %v6108_v51  ;;  %5101 = vmatpush3.bf16.msra.mxu1 %v6066_v32 }
 0x5b2   :  { %5103 = vmatprep.subr.bf16.mxu0 %v5952_v8  ;;  %5118 = vmatprep.subr.bf16.mxu1 %v5790_v15 }
 0x677   :  { %v1647_v16 = vpop.f32.mrb[10].mxu0  ;;  %v1718_v26 = vpop.f32.mrb[26].mxu1 }
 0x678   :  { %v5428_v28 = vadd.f32 %v1647_v16, %v6168_v38  ;;  %v1649_v29 = vpop.f32.mrb[11].mxu0  ;;  %v4659_v31 = vpop.f32.mrb[27].mxu1  ;;  %v1736_v8 = vadd.f32 %v6179_v57, %v1718_v26  ;;  %v2113_v16 = vld [vmem:[#allocation8 + $0x40] sm:$0xff]  ;;  %v2116_v26 = vld [vmem:[#allocation8 + $0x58] sm:$0xff] }
 0x679   :  { %v5429_v39 = vadd.f32 %v1649_v29, %v6172_v40  ;;  %v5134_v31 = vpack.c.bf16 %v2115_v19, %v2112_v17  ;;  %v2421_v17 = vld [vmem:[#allocation10 + $0x48] sm:$0xff] }
 0x67a   :  { %v4242_v33 = vmul.f32 -1.442695, %v5428_v28  ;;  %v5132_v28 = vpack.c.bf16 %v2108_v14, %v2105_v12  ;;  %v2418_v12 = vld [vmem:[#allocation10 + $0x30] sm:$0xff]  ;;  %v2425_v19 = vld [vmem:[#allocation10 + $0x68] sm:$0xff] }
 0x67b   :  { %v4243_v43 = vmul.f32 -1.442695, %v5429_v39  ;;  %v2114_v39 = vld [vmem:[#allocation8 + $0x48] sm:$0xff] }
 0x67c   :  { %5575 = vpow2.f32 %v4242_v33  ;;  %v2111_v33 = vld [vmem:[#allocation8 + $0x30] sm:$0xff] }
 0x67d   :  { %5577 = vpow2.f32 %v4243_v43  ;;  %v2118_v43 = vld [vmem:[#allocation8 + $0x68] sm:$0xff] }
 0x686   :  { %v5576_v44 = vpop.eup %5575 }
 0x687   :  { %v1726_v45 = vadd.f32 1.0, %v5576_v44  ;;  %v5578_v46 = vpop.eup %5577  ;;  %v2121_v44 = vld [vmem:[#allocation8 + $0x80] sm:$0xff] }
 0x688   :  { %v1733_v49 = vadd.f32 1.0, %v5578_v46  ;;  %v2122_v46 = vld [vmem:[#allocation8 + $0x88] sm:$0xff] }
 0x689   :  { %5579 = vrcp.f32 %v1726_v45  ;;  %v2119_v45 = vld [vmem:[#allocation8 + $0x70] sm:$0xff] }
 0x68a   :  { %5581 = vrcp.f32 %v1733_v49  ;;  %v6344_v49 = vld [vmem:[#allocation4] sm:$0xff] }
 0x693   :  { %v5580_v30 = vpop.eup %5579 }
 0x694   :  { %v1737_v50 = vmul.f32 %v5580_v30, %v1736_v8  ;;  %v5582_v56 = vpop.eup %5581  ;;  %v5136_v8 = vpack.c.bf16 %v2114_v39, %v2111_v33  ;;  %v5138_v30 = vpack.c.bf16 %v2121_v44, %v2118_v43  ;;  %v2429_v33 = vld [vmem:[#allocation10 + $0x88] sm:$0xff]  ;;  %v2431_v43 = vld [vmem:[#allocation10 + $0x98] sm:$0xff] }
 0x695   :  { %v1740_v55 = vsub.f32 1.0, %v5582_v56  ;;  %v1742_v59 = vmul.f32 %v5582_v56, %v1567_v23  ;;  %v2120_v56 = vld [vmem:[#allocation8 + $0x78] sm:$0xff] }
 0x696   :  { %v1738_v52 = vadd.f32 %v1737_v50, %v6156_v18  ;;  %v5154_v50 = vpack.c.bf16 %v2122_v46, %v2119_v45  ;;  %v2432_v45 = vld [vmem:[#allocation10 + $0xa0] sm:$0xff]  ;;  %v2435_v46 = vld [vmem:[#allocation10 + $0xb8] sm:$0xff] }
 0x698   :  { %5583 = vtanh.f32 %v1738_v52  ;;  %v2117_v52 = vld [vmem:[#allocation8 + $0x60] sm:$0xff] }
 0x6a2   :  { %v5584_v58 = vpop.eup %5583 }
 0x6a3   :  { %v1741_v25 = vmul.f32 %v5584_v58, %v1740_v55  ;;  %v2124_v55 = vld [vmem:[#allocation8 + $0x98] sm:$0xff]  ;;  %v2127_v58 = vld [vmem:[#allocation8 + $0xb0] sm:$0xff] }
 0x6a5   :  { %v1743_v60 = vadd.f32 %v1742_v59, %v1741_v25  ;;  %v2125_v25 = vld [vmem:[#allocation8 + $0xa0] sm:$0xff]  ;;  %v2128_v59 = vld [vmem:[#allocation8 + $0xb8] sm:$0xff] }
 0x6a7   :  { %1744 = vst.msk [vmem:[#allocation4 + $0x28] sm:$0xff] %vm691_vm3, %v1743_v60  ;;  %4244 = vmatmul.mubr.msk.f32.vlgmr.msra.gmra.mrb[12].mxu0 %vm691_vm3, %v1743_v60  ;;  %4677 = vmatmul.mubr.msk.f32.vlgmr.msra.gmra.mrb[28].mxu1 %vm691_vm3, %v1743_v60 }
 0x6a8   :  { %5105 = vmatpush1.bf16.msra.mxu0 %v6071_v35  ;;  %5120 = vmatpush3.bf16.msra.mxu1 %v6034_v21  ;;  %v2106_v21 = vld [vmem:[#allocation8 + $0x8] sm:$0xff]  ;;  %v2109_v35 = vld [vmem:[#allocation8 + $0x20] sm:$0xff] }
 0x6a9   :  { %5107 = vmatprep.subr.bf16.mxu0 %v6075_v36  ;;  %5121 = vmatprep.subr.bf16.mxu1 %v5790_v15  ;;  %v2107_v36 = vld [vmem:[#allocation8 + $0x10] sm:$0xff] }
 0x6aa   :  { %1997 = vmatprep.mubr.f32.mxu0 %v5789_v0  ;;  %4695 = vmatprep.mubr.msk.f32.mxu1 %vm5791_vm2, %v5789_v0 }
 0x6ac   :  { %5109 = vmatpush1.bf16.msra.mxu0 %v6083_v41  ;;  %5123 = vmatpush3.bf16.msra.mxu1 %v6044_v24  ;;  %v5130_v24 = vpack.c.bf16 %v2109_v35, %v2106_v21  ;;  %v2110_v41 = vld [vmem:[#allocation8 + $0x28] sm:$0xff]  ;;  %v5142_v21 = vpack.c.bf16 %v2127_v58, %v2124_v55  ;;  %v5158_v35 = vpack.c.bf16 %v2128_v59, %v2125_v25  ;;  %v2682_v58 = vld [vmem:[#allocation11 + $0x20] sm:$0xff] }
 0x6ad   :  { %5111 = vmatprep.subr.bf16.mxu0 %v6086_v42  ;;  %5124 = vmatprep.subr.bf16.mxu1 %v5790_v15  ;;  %v5146_v42 = vpack.c.bf16 %v2110_v41, %v2107_v36  ;;  %v2123_v36 = vld [vmem:[#allocation8 + $0x90] sm:$0xff]  ;;  %v2679_v55 = vld [vmem:[#allocation11 + $0x8] sm:$0xff] }
 0x6ae   :  { %v6395_v25 = vpack.c.bf16 %v2682_v58, %v2679_v55  ;;  %v2693_v58 = vld [vmem:[#allocation11 + $0x78] sm:$0xff] }
 0x6b0   :  { %5113 = vmatpush1.bf16.msra.mxu0 %v6097_v47  ;;  %5126 = vmatpush3.bf16.msra.mxu1 %v6055_v27 }
 0x6b1   :  { %5115 = vmatprep.subr.bf16.mxu0 %v6100_v48  ;;  %5127 = vmatprep.subr.bf16.mxu1 %v5790_v15 }
 0x6b4   :  { %5117 = vmatpush1.bf16.msra.mxu0 %v6108_v51  ;;  %5129 = vmatpush3.bf16.msra.mxu1 %v6066_v32 }
 0x6b5   :  { %5131 = vmatprep.subr.bf16.mxu1 %v5130_v24  ;;  %5147 = vmatprep.subr.bf16.mxu0 %v5146_v42  ;;  %v2126_v24 = vld [vmem:[#allocation8 + $0xa8] sm:$0xff] }
 0x6b6   :  { %v5144_v41 = vpack.c.bf16 %v2126_v24, %v2123_v36 }
 0x77a   :  { %v1823_v18 = vpop.f32.mrb[12].mxu0  ;;  %v1894_v47 = vpop.f32.mrb[28].mxu1 }
 0x77b   :  { %v5430_v27 = vadd.f32 %v1823_v18, %v6168_v38  ;;  %v1825_v61 = vpop.f32.mrb[13].mxu0  ;;  %v4678_v48 = vpop.f32.mrb[29].mxu1  ;;  %v1912_v4 = vadd.f32 %v6179_v57, %v1894_v47  ;;  %v6355_v18 = vld [vmem:[#allocation4 + $0x10] sm:$0xff]  ;;  %v6360_v47 = vld [vmem:[#allocation4 + $0x18] sm:$0xff] }
 0x77c   :  { %v5431_v63 = vadd.f32 %v1825_v61, %v6172_v40  ;;  %v6371_v61 = vld [vmem:[#allocation4 + $0x28] sm:$0xff] }
 0x77d   :  { %v4246_v62 = vmul.f32 -1.442695, %v5430_v27  ;;  %v6366_v27 = vld [vmem:[#allocation4 + $0x20] sm:$0xff] }
 0x77e   :  { %v4247_v51 = vmul.f32 -1.442695, %v5431_v63  ;;  %v2417_v63 = vld [vmem:[#allocation10 + $0x28] sm:$0xff] }
 0x77f   :  { %5585 = vpow2.f32 %v4246_v62  ;;  %v2414_v62 = vld [vmem:[#allocation10 + $0x10] sm:$0xff] }
 0x780   :  { %5587 = vpow2.f32 %v4247_v51  ;;  %v5178_v51 = vpack.c.bf16 %v2417_v63, %v2414_v62 }
 0x789   :  { %v5586_v32 = vpop.eup %5585 }
 0x78a   :  { %v1902_v1 = vadd.f32 1.0, %v5586_v32  ;;  %v5588_v2 = vpop.eup %5587  ;;  %v2413_v32 = vld [vmem:[#allocation10 + $0x8] sm:$0xff] }
 0x78b   :  { %v1909_v3 = vadd.f32 1.0, %v5588_v2  ;;  %v2420_v2 = vld [vmem:[#allocation10 + $0x40] sm:$0xff] }
 0x78c   :  { %5589 = vrcp.f32 %v1902_v1  ;;  %v2416_v1 = vld [vmem:[#allocation10 + $0x20] sm:$0xff] }
 0x78d   :  { %5591 = vrcp.f32 %v1909_v3  ;;  %v5162_v3 = vpack.c.bf16 %v2416_v1, %v2413_v32 }
 0x796   :  { %v5590_v5 = vpop.eup %5589 }
 0x797   :  { %v1913_v6 = vmul.f32 %v5590_v5, %v1912_v4  ;;  %v5592_v9 = vpop.eup %5591  ;;  %v2412_v4 = vld [vmem:[#allocation10] sm:$0xff]  ;;  %v2415_v5 = vld [vmem:[#allocation10 + $0x18] sm:$0xff] }
 0x798   :  { %v1916_v10 = vsub.f32 1.0, %v5592_v9  ;;  %v1918_v23 = vmul.f32 %v5592_v9, %v1743_v60  ;;  %v5140_v60 = vpack.c.bf16 %v2120_v56, %v2117_v52  ;;  %v2419_v9 = vld [vmem:[#allocation10 + $0x38] sm:$0xff]  ;;  %v2433_v52 = vld [vmem:[#allocation10 + $0xa8] sm:$0xff] }
 0x799   :  { %v1914_v7 = vadd.f32 %v1913_v6, %v6150_v11  ;;  %v5150_v11 = vpack.c.bf16 %v2116_v26, %v2113_v16  ;;  %v2423_v6 = vld [vmem:[#allocation10 + $0x58] sm:$0xff]  ;;  %v2426_v16 = vld [vmem:[#allocation10 + $0x70] sm:$0xff] }
 0x79a   :  { %v5182_v14 = vpack.c.bf16 %v2423_v6, %v2420_v2  ;;  %v5186_v39 = vpack.c.bf16 %v2429_v33, %v2426_v16  ;;  %v2683_v16 = vld [vmem:[#allocation11 + $0x28] sm:$0xff]  ;;  %v2686_v33 = vld [vmem:[#allocation11 + $0x40] sm:$0xff] }
 0x79b   :  { %5593 = vtanh.f32 %v1914_v7  ;;  %v5164_v7 = vpack.c.bf16 %v2415_v5, %v2412_v4 }
 0x7a5   :  { %v5594_v22 = vpop.eup %5593 }
 0x7a6   :  { %v1917_v20 = vmul.f32 %v5594_v22, %v1916_v10  ;;  %v2422_v10 = vld [vmem:[#allocation10 + $0x50] sm:$0xff] }
 0x7a7   :  { %v5166_v22 = vpack.c.bf16 %v2422_v10, %v2419_v9 }
 0x7a8   :  { %v6336_v29 = vadd.f32 %v1918_v23, %v1917_v20  ;;  %v2428_v20 = vld [vmem:[#allocation10 + $0x80] sm:$0xff]  ;;  %v5168_v23 = vpack.c.bf16 %v2421_v17, %v2418_v12 }
 0x7a9   :  { %v5170_v26 = vpack.c.bf16 %v2428_v20, %v2425_v19 }
 0x7aa   :  { %1920 = vst.msk [vmem:[#allocation4 + $0x30] sm:$0xff] %vm691_vm3, %v6336_v29  ;;  %4248 = vmatmul.mubr.msk.f32.vlgmr.msra.gmra.mrb[14].mxu0 %vm691_vm3, %v6336_v29  ;;  %4696 = vmatmul.mubr.msk.f32.vlgmr.msra.gmra.mrb[30].mxu1 %vm691_vm3, %v6336_v29 }
 0x7ab   :  { %5133 = vmatpush1.bf16.msra.mxu1 %v5132_v28  ;;  %5149 = vmatpush3.bf16.msra.mxu0 %v5146_v42  ;;  %v6349_v42 = vld [vmem:[#allocation4 + $0x8] sm:$0xff]  ;;  %v2424_v28 = vld [vmem:[#allocation10 + $0x60] sm:$0xff] }
 0x7ac   :  { %4714 = vmatprep.mubr.msk.f32.mxu0 %vm691_vm3, %v6344_v49  ;;  %5135 = vmatprep.subr.bf16.mxu1 %v5134_v31  ;;  %v2427_v31 = vld [vmem:[#allocation10 + $0x78] sm:$0xff] }
 0x7ad   :  { %5151 = vmatprep.subr.bf16.mxu0 %v5150_v11  ;;  %2234 = vmatprep.mubr.f32.mxu1 %v5789_v0  ;;  %v5172_v44 = vpack.c.bf16 %v2427_v31, %v2424_v28  ;;  %v2685_v28 = vld [vmem:[#allocation11 + $0x38] sm:$0xff]  ;;  %v2688_v31 = vld [vmem:[#allocation11 + $0x50] sm:$0xff] }
 0x7af   :  { %5137 = vmatpush1.bf16.msra.mxu1 %v5136_v8  ;;  %5153 = vmatpush3.bf16.msra.mxu0 %v5150_v11  ;;  %v2434_v11 = vld [vmem:[#allocation10 + $0xb0] sm:$0xff] }
 0x7b0   :  { %5139 = vmatprep.subr.bf16.mxu1 %v5138_v30  ;;  %5155 = vmatprep.subr.bf16.mxu0 %v5154_v50  ;;  %v5174_v8 = vpack.c.bf16 %v2434_v11, %v2431_v43  ;;  %v5190_v30 = vpack.c.bf16 %v2435_v46, %v2432_v45  ;;  %v6434_v11 = vpack.c.bf16 %v2688_v31, %v2685_v28  ;;  %v2687_v45 = vld [vmem:[#allocation11 + $0x48] sm:$0xff] }
 0x7b1   :  { %v6377_v48 = vld [vmem:[#allocation4 + $0x30] sm:$0xff]  ;;  %v2691_v46 = vld [vmem:[#allocation11 + $0x68] sm:$0xff] }
 0x7b3   :  { %5141 = vmatpush1.bf16.msra.mxu1 %v5140_v60  ;;  %5157 = vmatpush3.bf16.msra.mxu0 %v5154_v50  ;;  %v2430_v50 = vld [vmem:[#allocation10 + $0x90] sm:$0xff] }
 0x7b4   :  { %5143 = vmatprep.subr.bf16.mxu1 %v5142_v21  ;;  %5159 = vmatprep.subr.bf16.mxu0 %v5158_v35  ;;  %v5176_v56 = vpack.c.bf16 %v2433_v52, %v2430_v50  ;;  %v2692_v50 = vld [vmem:[#allocation11 + $0x70] sm:$0xff]  ;;  %v2695_v52 = vld [vmem:[#allocation11 + $0x88] sm:$0xff] }
 0x7b7   :  { %5145 = vmatpush1.bf16.msra.mxu1 %v5144_v41  ;;  %5161 = vmatpush3.bf16.msra.mxu0 %v5158_v35 }
 0x7b8   :  { %5179 = vmatprep.subr.bf16.mxu0 %v5178_v51  ;;  %5163 = vmatprep.subr.bf16.mxu1 %v5162_v3 }
 0x7ba   :  { %4252 = vmatmul.mubr.msk.f32.vlgmr.msra.gmra.mrb[32].mxu1 %vm691_vm3, %v6344_v49  ;;  %4715 = vmatmul.mubr.msk.f32.vlgmr.msra.gmra.mrb[16].mxu0 %vm691_vm3, %v6349_v42 }
 0x7bb   :  { %4717 = vmatprep.mubr.msk.f32.mxu0 %vm691_vm3, %v6355_v18  ;;  %2240 = vmatprep.mubr.f32.mxu1 %v5789_v0 }
 0x7bc   :  { %5181 = vmatpush3.bf16.msra.mxu0 %v5178_v51  ;;  %5165 = vmatpush1.bf16.msra.mxu1 %v5164_v7 }
 0x7bd   :  { %5183 = vmatprep.subr.bf16.mxu0 %v5182_v14  ;;  %5167 = vmatprep.subr.bf16.mxu1 %v5166_v22 }
 0x7be   :  { %4253 = vmatmul.mubr.msk.f32.gmra.mrb[34].mxu1 %vm691_vm3, %v6349_v42  ;;  %4718 = vmatmul.mubr.msk.f32.gmra.mrb[18].mxu0 %vm691_vm3, %v6360_v47 }
 0x7bf   :  { %4720 = vmatprep.mubr.msk.f32.mxu0 %vm691_vm3, %v6366_v27  ;;  %2246 = vmatprep.mubr.f32.mxu1 %v5789_v0 }
 0x7c0   :  { %5185 = vmatpush3.bf16.msra.mxu0 %v5182_v14  ;;  %5169 = vmatpush1.bf16.msra.mxu1 %v5168_v23  ;;  %v2680_v23 = vld [vmem:[#allocation11 + $0x10] sm:$0xff] }
 0x7c1   :  { %5187 = vmatprep.subr.bf16.mxu0 %v5186_v39  ;;  %5171 = vmatprep.subr.bf16.mxu1 %v5170_v26 }
 0x7c2   :  { %4254 = vmatmul.mubr.msk.f32.gmra.mrb[36].mxu1 %vm691_vm3, %v6355_v18  ;;  %4721 = vmatmul.mubr.msk.f32.gmra.mrb[20].mxu0 %vm691_vm3, %v6371_v61 }
 0x7c3   :  { %4723 = vmatprep.mubr.msk.f32.mxu0 %vm691_vm3, %v6377_v48  ;;  %2252 = vmatprep.mubr.f32.mxu1 %v5789_v0 }
 0x7c4   :  { %5189 = vmatpush3.bf16.msra.mxu0 %v5186_v39  ;;  %5173 = vmatpush1.bf16.msra.mxu1 %v5172_v44  ;;  %v2689_v39 = vld [vmem:[#allocation11 + $0x58] sm:$0xff]  ;;  %v2684_v44 = vld [vmem:[#allocation11 + $0x30] sm:$0xff] }
 0x7c5   :  { %5191 = vmatprep.subr.bf16.mxu0 %v5190_v30  ;;  %5175 = vmatprep.subr.bf16.mxu1 %v5174_v8  ;;  %v6437_v8 = vpack.c.bf16 %v2689_v39, %v2686_v33 }
 0x7c6   :  { %4255 = vmatmul.mubr.msk.f32.gmra.mrb[38].mxu1 %vm691_vm3, %v6360_v47 }
 0x7c7   :  { %2258 = vmatprep.mubr.f32.mxu1 %v5789_v0 }
 0x7c8   :  { %5193 = vmatpush3.bf16.msra.mxu0 %v5190_v30  ;;  %5177 = vmatpush1.bf16.msra.mxu1 %v5176_v56  ;;  %v2694_v30 = vld [vmem:[#allocation11 + $0x80] sm:$0xff]  ;;  %v6448_v56 = vpack.c.bf16 %v2687_v45, %v2684_v44 }
 0x7c9   :  { %5210 = vmatprep.subr.bf16.mxu0 %v5790_v15  ;;  %5195 = vmatprep.subr.bf16.mxu1 %v6395_v25  ;;  %v6450_v55 = vpack.c.bf16 %v2694_v30, %v2691_v46 }
 0x7ca   :  { %4256 = vmatmul.mubr.msk.f32.gmra.mrb[40].mxu1 %vm691_vm3, %v6366_v27 }
 0x7cb   :  { %2264 = vmatprep.mubr.f32.mxu1 %v5789_v0 }
 0x7ce   :  { %4257 = vmatmul.mubr.msk.f32.gmra.mrb[42].mxu1 %vm691_vm3, %v6371_v61 }
 0x7cf   :  { %2270 = vmatprep.mubr.f32.mxu1 %v5789_v0 }
 0x7d2   :  { %4258 = vmatmul.mubr.msk.f32.gmra.mrb[44].mxu1 %vm691_vm3, %v6377_v48 }
 0x7d3   :  { %2276 = vmatprep.mubr.f32.mxu1 %v5789_v0 }
 0x87d   :  { %v1999_v59 = vpop.f32.mrb[14].mxu0  ;;  %v2070_v60 = vpop.f32.mrb[30].mxu1 }
 0x87e   :  { %v5432_v21 = vadd.f32 %v1999_v59, %v6168_v38  ;;  %v2001_v35 = vpop.f32.mrb[15].mxu0  ;;  %v4697_v36 = vpop.f32.mrb[31].mxu1  ;;  %v2697_v59 = vld [vmem:[#allocation11 + $0x98] sm:$0xff] }
 0x87f   :  { %v5433_v41 = vadd.f32 %v2001_v35, %v6172_v40  ;;  %v2088_v40 = vadd.f32 %v6179_v57, %v2070_v60  ;;  %v2678_v57 = vld [vmem:[#allocation11] sm:$0xff]  ;;  %v6453_v60 = vpack.c.bf16 %v2695_v52, %v2692_v50  ;;  %v2701_v36 = vld [vmem:[#allocation11 + $0xb8] sm:$0xff] }
 0x880   :  { %v4250_v24 = vmul.f32 -1.442695, %v5432_v21  ;;  %v2700_v21 = vld [vmem:[#allocation11 + $0xb0] sm:$0xff]  ;;  %v2698_v35 = vld [vmem:[#allocation11 + $0xa0] sm:$0xff] }
 0x881   :  { %v4251_v62 = vmul.f32 -1.442695, %v5433_v41  ;;  %v2696_v41 = vld [vmem:[#allocation11 + $0x90] sm:$0xff] }
 0x882   :  { %5595 = vpow2.f32 %v4250_v24 }
 0x883   :  { %5597 = vpow2.f32 %v4251_v62  ;;  %v2699_v62 = vld [vmem:[#allocation11 + $0xa8] sm:$0xff] }
 0x88c   :  { %v5596_v63 = vpop.eup %5595 }
 0x88d   :  { %v2078_v51 = vadd.f32 1.0, %v5596_v63  ;;  %v6400_v32 = vpop.f32.mrb[16].mxu0  ;;  %v5598_v38 = vpop.eup %5597  ;;  %v6470_v63 = vpack.c.bf16 %v2701_v36, %v2698_v35 }
 0x88e   :  { %v6402_v1 = vpop.f32.mrb[17].mxu0  ;;  %v2085_v5 = vadd.f32 1.0, %v5598_v38 }
 0x88f   :  { %5599 = vrcp.f32 %v2078_v51  ;;  %v6479_v51 = vpack.c.bf16 %v2699_v62, %v2696_v41 }
 0x890   :  { %5601 = vrcp.f32 %v2085_v5 }
 0x891   :  { %v6404_v2 = vpop.f32.mrb[18].mxu0 }
 0x892   :  { %v6406_v3 = vpop.f32.mrb[19].mxu0 }
 0x895   :  { %v6408_v4 = vpop.f32.mrb[20].mxu0 }
 0x896   :  { %v6410_v6 = vpop.f32.mrb[21].mxu0 }
 0x899   :  { %v5600_v7 = vpop.eup %5599 }
 0x89a   :  { %v2089_v9 = vmul.f32 %v5600_v7, %v2088_v40  ;;  %v5602_v12 = vpop.eup %5601 }
 0x89b   :  { %v2092_v14 = vsub.f32 1.0, %v5602_v12  ;;  %v2094_v19 = vmul.f32 %v5602_v12, %v6336_v29  ;;  %v2681_v29 = vld [vmem:[#allocation11 + $0x18] sm:$0xff] }
 0x89c   :  { %v2090_v10 = vadd.f32 %v2089_v9, %v6152_v13  ;;  %v6425_v13 = vpack.c.bf16 %v2683_v16, %v2680_v23  ;;  %v6431_v43 = vpack.c.bf16 %v2681_v29, %v2678_v57 }
 0x89e   :  { %5603 = vtanh.f32 %v2090_v10 }
 0x8a8   :  { %v5604_v22 = vpop.eup %5603 }
 0x8a9   :  { %v2093_v17 = vmul.f32 %v5604_v22, %v2092_v14 }
 0x8ab   :  { %v2095_v20 = vadd.f32 %v2094_v19, %v2093_v17 }
 0x8ad   :  { %2096 = vst.msk [vmem:[#allocation4 + $0x38] sm:$0xff] %vm691_vm3, %v2095_v20 }
 0x8b4   :  { %v6416_v26 = vld [vmem:[#allocation4 + $0x38] sm:$0xff] }
 0x8b5   :  { %4259 = vmatmul.mubr.msk.f32.gmra.mrb[46].mxu1 %vm691_vm3, %v6416_v26  ;;  %4724 = vmatmul.mubr.msk.f32.gmra.mrb[22].mxu0 %vm691_vm3, %v6416_v26 }
 0x8b6   :  { %4742 = vmatprep.mubr.msk.f32.mxu0 %vm691_vm3, %v6344_v49  ;;  %2500 = vmatprep.mubr.f32.mxu1 %v5789_v0 }
 0x8b9   :  { %4743 = vmatmul.mubr.msk.f32.vlgmr.msra.gmra.mrb[24].mxu0 %vm691_vm3, %v6349_v42 }
 0x8ba   :  { %4745 = vmatprep.mubr.msk.f32.mxu0 %vm691_vm3, %v6355_v18  ;;  %5212 = vmatpush3.bf16.msra.mxu0 %v6425_v13 }
 0x8bb   :  { %5213 = vmatprep.subr.bf16.mxu0 %v5790_v15 }
 0x8bd   :  { %4268 = vmatmul.mubr.msk.f32.vlgmr.msra.gmra.mrb[46].mxu1 %vm691_vm3, %v6344_v49  ;;  %4746 = vmatmul.mubr.msk.f32.gmra.mrb[26].mxu0 %vm691_vm3, %v6360_v47  ;;  %v2690_v49 = vld [vmem:[#allocation11 + $0x60] sm:$0xff] }
 0x8be   :  { %4748 = vmatprep.mubr.msk.f32.mxu0 %vm691_vm3, %v6366_v27  ;;  %5197 = vmatpush1.bf16.msra.mxu1 %v6431_v43  ;;  %v6463_v24 = vpack.c.bf16 %v2693_v58, %v2690_v49 }
 0x8bf   :  { %2506 = vmatprep.mubr.f32.mxu1 %v5789_v0  ;;  %5199 = vmatprep.subr.bf16.mxu1 %v6434_v11 }
 0x8c0   :  { %5215 = vmatpush3.bf16.msra.mxu0 %v6437_v8 }
 0x8c1   :  { %4269 = vmatmul.mubr.msk.f32.gmra.mrb[44].mxu1 %vm691_vm3, %v6349_v42  ;;  %4749 = vmatmul.mubr.msk.f32.gmra.mrb[28].mxu0 %vm691_vm3, %v6371_v61  ;;  %v6467_v42 = vpack.c.bf16 %v2700_v21, %v2697_v59 }
 0x8c2   :  { %4751 = vmatprep.mubr.msk.f32.mxu0 %vm691_vm3, %v6377_v48  ;;  %2512 = vmatprep.mubr.f32.mxu1 %v5789_v0 }
 0x8c3   :  { %5201 = vmatpush1.bf16.msra.mxu1 %v6448_v56  ;;  %5216 = vmatprep.subr.bf16.mxu0 %v5790_v15 }
 0x8c4   :  { %5203 = vmatprep.subr.bf16.mxu1 %v6450_v55  ;;  %5218 = vmatpush3.bf16.msra.mxu0 %v6453_v60 }
 0x8c5   :  { %4270 = vmatmul.mubr.msk.f32.gmra.mrb[42].mxu1 %vm691_vm3, %v6355_v18  ;;  %4752 = vmatmul.mubr.msk.f32.gmra.mrb[30].mxu0 %vm691_vm3, %v6416_v26  ;;  %v2129_v18 = vld [vmem:[%s6795_s9] sm:$0x7] }
 0x8c6   :  { %2518 = vmatprep.mubr.f32.mxu1 %v5789_v0  ;;  %5219 = vmatprep.subr.bf16.mxu0 %v5790_v15  ;;  %v6555_v45 = vrot.slane %v2129_v18, %v118_v37 }
 0x8c7   :  { %5205 = vmatpush1.bf16.msra.mxu1 %v6463_v24  ;;  %4770 = vmatprep.mubr.msk.f32.mxu0 %vm5791_vm2, %v5789_v0 }
 0x8c8   :  { %5207 = vmatprep.subr.bf16.mxu1 %v6467_v42  ;;  %5221 = vmatpush3.bf16.msra.mxu0 %v6470_v63 }
 0x8c9   :  { %4271 = vmatmul.mubr.msk.f32.gmra.mrb[40].mxu1 %vm691_vm3, %v6360_v47  ;;  %5238 = vmatprep.subr.bf16.mxu0 %v5790_v15  ;;  %v2142_v47 = vrot.slane %v2129_v18, %v122_v54 }
 0x8ca   :  { %2524 = vmatprep.mubr.f32.mxu1 %v5789_v0 }
 0x8cb   :  { %5209 = vmatpush1.bf16.msra.mxu1 %v6479_v51  ;;  %4771 = vmatmul.mubr.f32.vlgmr.msra.gmra.mrb[32].mxu0 %v5789_v0  ;;  %v2370_v10 = vadd.f32 %v6410_v6, %v2142_v47  ;;  %v2375_v12 = vadd.f32 %v6408_v4, %v2142_v47  ;;  %v2360_v54 = vadd.f32 %v6406_v3, %v2142_v47 }
 0x8cc   :  { %5223 = vmatprep.subr.bf16.mxu1 %v6395_v25  ;;  %5240 = vmatpush3.bf16.msra.mxu0 %v6425_v13  ;;  %v2365_v20 = vadd.f32 %v6404_v2, %v2142_v47  ;;  %v2350_v6 = vadd.f32 %v6402_v1, %v2142_v47  ;;  %v2355_v4 = vadd.f32 %v6400_v32, %v2142_v47 }
 0x8cd   :  { %4272 = vmatmul.mubr.msk.f32.gmra.mrb[38].mxu1 %vm691_vm3, %v6366_v27  ;;  %5241 = vmatprep.subr.bf16.mxu0 %v5790_v15  ;;  %v6551_v2 = vrot.slane %v2129_v18, %v114_v34  ;;  %v6562_v34 = vld [vmem:[%s6796_s10] ss:$0 sm:$0xff] }
 0x8ce   :  { %2530 = vmatprep.mubr.f32.mxu1 %v5789_v0  ;;  %4789 = vmatprep.mubr.msk.f32.mxu0 %vm5791_vm2, %v5789_v0 }
 0x8d0   :  { %5243 = vmatpush3.bf16.msra.mxu0 %v6437_v8 }
 0x8d1   :  { %4273 = vmatmul.mubr.msk.f32.gmra.mrb[36].mxu1 %vm691_vm3, %v6371_v61  ;;  %5244 = vmatprep.subr.bf16.mxu0 %v5790_v15 }
 0x8d2   :  { %2536 = vmatprep.mubr.f32.mxu1 %v5789_v0 }
 0x8d4   :  { %5246 = vmatpush3.bf16.msra.mxu0 %v6453_v60 }
 0x8d5   :  { %4274 = vmatmul.mubr.msk.f32.gmra.mrb[34].mxu1 %vm691_vm3, %v6377_v48  ;;  %5247 = vmatprep.subr.bf16.mxu0 %v5790_v15 }
 0x8d6   :  { %2542 = vmatprep.mubr.f32.mxu1 %v5789_v0 }
 0x8d8   :  { %5249 = vmatpush3.bf16.msra.mxu0 %v6470_v63 }
 0x8d9   :  { %4275 = vmatmul.mubr.msk.f32.gmra.mrb[32].mxu1 %vm691_vm3, %v6416_v26  ;;  %5266 = vmatprep.subr.bf16.mxu0 %v5790_v15 }
 0x8da   :  { %2776 = vmatprep.mubr.f32.mxu1 %v5789_v0 }
 0x8e1   :  { %2777 = vmatmul.mubr.f32.vlgmr.msra.gmra.mrb[32].mxu1 %v5789_v0 }
 0x8e2   :  { %5225 = vmatpush1.bf16.msra.mxu1 %v6431_v43  ;;  %2964 = vmatprep.mubr.f32.mxu1 %v5789_v0 }
 0x8e3   :  { %5227 = vmatprep.subr.bf16.mxu1 %v6434_v11 }
 0x8e6   :  { %5229 = vmatpush1.bf16.msra.mxu1 %v6448_v56 }
 0x8e7   :  { %5231 = vmatprep.subr.bf16.mxu1 %v6450_v55 }
 0x8ea   :  { %5233 = vmatpush1.bf16.msra.mxu1 %v6463_v24 }
 0x8eb   :  { %5235 = vmatprep.subr.bf16.mxu1 %v6467_v42 }
 0x8ee   :  { %5237 = vmatpush1.bf16.msra.mxu1 %v6479_v51 }
 0x8ef   :  { %5251 = vmatprep.subr.bf16.mxu1 %v6395_v25 }
 0x988   :  { %v4725_v27 = vpop.f32.mrb[22].mxu0 }
 0x989   :  { %v2379_v61 = vpop.f32.mrb[23].mxu0  ;;  %v2385_v38 = vadd.f32 %v4725_v27, %v2142_v47 }
 0x98a   :  { %v2380_v48 = vadd.f32 %v2379_v61, %v2142_v47 }
 0x98c   :  { %v4744_v5 = vpop.f32.mrb[24].mxu0 }
 0x98d   :  { %v6529_v40 = vadd.f32 %v4744_v5, %v2380_v48  ;;  %v2615_v7 = vpop.f32.mrb[25].mxu0 }
 0x98e   :  { %v6531_v9 = vadd.f32 %v2615_v7, %v2385_v38 }
 0x990   :  { %v4747_v14 = vpop.f32.mrb[26].mxu0 }
 0x991   :  { %v6535_v22 = vadd.f32 %v4747_v14, %v2370_v10  ;;  %v2625_v17 = vpop.f32.mrb[27].mxu0 }
 0x992   :  { %v6537_v19 = vadd.f32 %v2625_v17, %v2375_v12 }
 0x994   :  { %v4750_v23 = vpop.f32.mrb[28].mxu0 }
 0x995   :  { %v6541_v16 = vadd.f32 %v4750_v23, %v2360_v54  ;;  %v2635_v26 = vpop.f32.mrb[29].mxu0 }
 0x996   :  { %v6543_v57 = vadd.f32 %v2635_v26, %v2365_v20 }
 0x998   :  { %v4753_v29 = vpop.f32.mrb[30].mxu0 }
 0x999   :  { %v2711_v28 = vadd.f32 %v4753_v29, %v2350_v6  ;;  %v2645_v31 = vpop.f32.mrb[31].mxu0 }
 0x99a   :  { %v6547_v33 = vadd.f32 %v2645_v31, %v2355_v4 }
 0x99e   :  { %v2849_v39 = vpop.f32.mrb[32].mxu0 }
 0x99f   :  { %v4772_v44 = vpop.f32.mrb[33].mxu0  ;;  %v2873_v37 = vadd.f32 %v6562_v34, %v2849_v39 }
 0x9b4   :  { %v2778_v3 = vpop.f32.mrb[32].mxu1 }
 0x9b5   :  { %v5434_v1 = vadd.f32 %v2778_v3, %v6551_v2  ;;  %v2780_v46 = vpop.f32.mrb[33].mxu1 }
 0x9b6   :  { %v5435_v30 = vadd.f32 %v2780_v46, %v6555_v45 }
 0x9b7   :  { %v4284_v32 = vmul.f32 -1.442695, %v5434_v1 }
 0x9b8   :  { %v4285_v50 = vmul.f32 -1.442695, %v5435_v30 }
 0x9b9   :  { %5605 = vpow2.f32 %v4284_v32 }
 0x9ba   :  { %5607 = vpow2.f32 %v4285_v50 }
 0x9c3   :  { %v5606_v52 = vpop.eup %5605 }
 0x9c4   :  { %v2857_v49 = vadd.f32 1.0, %v5606_v52  ;;  %v5608_v58 = vpop.eup %5607 }
 0x9c5   :  { %v2864_v53 = vadd.f32 1.0, %v5608_v58 }
 0x9c6   :  { %5609 = vrcp.f32 %v2857_v49 }
 0x9c7   :  { %5611 = vrcp.f32 %v2864_v53 }
 0x9d0   :  { %v5610_v59 = vpop.eup %5609 }
 0x9d1   :  { %v2874_v21 = vmul.f32 %v5610_v59, %v2873_v37  ;;  %v5612_v36 = vpop.eup %5611 }
 0x9d2   :  { %v2877_v41 = vsub.f32 1.0, %v5612_v36  ;;  %v2879_v47 = vmul.f32 0.0, %v5612_v36 }
 0x9d3   :  { %v2875_v35 = vadd.f32 %v2874_v21, %v2711_v28 }
 0x9d5   :  { %5613 = vtanh.f32 %v2875_v35 }
 0x9df   :  { %v5614_v62 = vpop.eup %5613 }
 0x9e0   :  { %v2878_v18 = vmul.f32 %v5614_v62, %v2877_v41 }
 0x9e2   :  { %v6565_v27 = vadd.f32 %v2879_v47, %v2878_v18 }
 0x9e4   :  { %4288 = vmatmul.mubr.msk.f32.vlgmr.msra.gmra.mrb[34].mxu1 %vm691_vm3, %v6565_v27  ;;  %4790 = vmatmul.mubr.msk.f32.vlgmr.msra.gmra.mrb[34].mxu0 %vm691_vm3, %v6565_v27 }
 0x9e5   :  { %5253 = vmatpush1.bf16.msra.mxu1 %v6431_v43  ;;  %5268 = vmatpush3.bf16.msra.mxu0 %v6425_v13 }
 0x9e6   :  { %5255 = vmatprep.subr.bf16.mxu1 %v6434_v11  ;;  %5269 = vmatprep.subr.bf16.mxu0 %v5790_v15 }
 0x9e7   :  { %3146 = vmatprep.mubr.f32.mxu1 %v5789_v0  ;;  %4808 = vmatprep.mubr.msk.f32.mxu0 %vm5791_vm2, %v5789_v0 }
 0x9e9   :  { %5257 = vmatpush1.bf16.msra.mxu1 %v6448_v56  ;;  %5271 = vmatpush3.bf16.msra.mxu0 %v6437_v8 }
 0x9ea   :  { %5259 = vmatprep.subr.bf16.mxu1 %v6450_v55  ;;  %5272 = vmatprep.subr.bf16.mxu0 %v5790_v15 }
 0x9ed   :  { %5261 = vmatpush1.bf16.msra.mxu1 %v6463_v24  ;;  %5274 = vmatpush3.bf16.msra.mxu0 %v6453_v60 }
 0x9ee   :  { %5263 = vmatprep.subr.bf16.mxu1 %v6467_v42  ;;  %5275 = vmatprep.subr.bf16.mxu0 %v5790_v15 }
 0x9f1   :  { %5265 = vmatpush1.bf16.msra.mxu1 %v6479_v51  ;;  %5277 = vmatpush3.bf16.msra.mxu0 %v6470_v63 }
 0x9f2   :  { %5279 = vmatprep.subr.bf16.mxu1 %v6395_v25  ;;  %5294 = vmatprep.subr.bf16.mxu0 %v5790_v15 }
 0xab7   :  { %v2966_v61 = vpop.f32.mrb[34].mxu1  ;;  %v3037_v48 = vpop.f32.mrb[34].mxu0 }
 0xab8   :  { %v5436_v38 = vadd.f32 %v2966_v61, %v6551_v2  ;;  %v2968_v5 = vpop.f32.mrb[35].mxu1  ;;  %v4791_v7 = vpop.f32.mrb[35].mxu0  ;;  %v3055_v26 = vadd.f32 %v6562_v34, %v3037_v48 }
 0xab9   :  { %v5437_v12 = vadd.f32 %v2968_v5, %v6555_v45 }
 0xaba   :  { %v4290_v10 = vmul.f32 -1.442695, %v5436_v38 }
 0xabb   :  { %v4291_v14 = vmul.f32 -1.442695, %v5437_v12 }
 0xabc   :  { %5615 = vpow2.f32 %v4290_v10 }
 0xabd   :  { %5617 = vpow2.f32 %v4291_v14 }
 0xac6   :  { %v5616_v17 = vpop.eup %5615 }
 0xac7   :  { %v3045_v54 = vadd.f32 1.0, %v5616_v17  ;;  %v5618_v20 = vpop.eup %5617 }
 0xac8   :  { %v3052_v23 = vadd.f32 1.0, %v5618_v20 }
 0xac9   :  { %5619 = vrcp.f32 %v3045_v54 }
 0xaca   :  { %5621 = vrcp.f32 %v3052_v23 }
 0xad3   :  { %v5620_v6 = vpop.eup %5619 }
 0xad4   :  { %v3056_v4 = vmul.f32 %v5620_v6, %v3055_v26  ;;  %v5622_v28 = vpop.eup %5621 }
 0xad5   :  { %v3059_v31 = vsub.f32 1.0, %v5622_v28  ;;  %v3061_v3 = vmul.f32 %v5622_v28, %v6565_v27 }
 0xad6   :  { %v3057_v29 = vadd.f32 %v3056_v4, %v6547_v33 }
 0xad8   :  { %5623 = vtanh.f32 %v3057_v29 }
 0xae2   :  { %v5624_v39 = vpop.eup %5623 }
 0xae3   :  { %v3060_v44 = vmul.f32 %v5624_v39, %v3059_v31 }
 0xae5   :  { %v6595_v1 = vadd.f32 %v3061_v3, %v3060_v44 }
 0xae7   :  { %4293 = vmatmul.mubr.msk.f32.vlgmr.msra.gmra.mrb[36].mxu1 %vm691_vm3, %v6595_v1  ;;  %4809 = vmatmul.mubr.msk.f32.vlgmr.msra.gmra.mrb[36].mxu0 %vm691_vm3, %v6595_v1 }
 0xae8   :  { %5281 = vmatpush1.bf16.msra.mxu1 %v6431_v43  ;;  %5296 = vmatpush3.bf16.msra.mxu0 %v6425_v13 }
 0xae9   :  { %5283 = vmatprep.subr.bf16.mxu1 %v6434_v11  ;;  %5297 = vmatprep.subr.bf16.mxu0 %v5790_v15 }
 0xaea   :  { %3328 = vmatprep.mubr.f32.mxu1 %v5789_v0  ;;  %4827 = vmatprep.mubr.msk.f32.mxu0 %vm5791_vm2, %v5789_v0 }
 0xaec   :  { %5285 = vmatpush1.bf16.msra.mxu1 %v6448_v56  ;;  %5299 = vmatpush3.bf16.msra.mxu0 %v6437_v8 }
 0xaed   :  { %5287 = vmatprep.subr.bf16.mxu1 %v6450_v55  ;;  %5300 = vmatprep.subr.bf16.mxu0 %v5790_v15 }
 0xaf0   :  { %5289 = vmatpush1.bf16.msra.mxu1 %v6463_v24  ;;  %5302 = vmatpush3.bf16.msra.mxu0 %v6453_v60 }
 0xaf1   :  { %5291 = vmatprep.subr.bf16.mxu1 %v6467_v42  ;;  %5303 = vmatprep.subr.bf16.mxu0 %v5790_v15 }
 0xaf4   :  { %5293 = vmatpush1.bf16.msra.mxu1 %v6479_v51  ;;  %5305 = vmatpush3.bf16.msra.mxu0 %v6470_v63 }
 0xaf5   :  { %5307 = vmatprep.subr.bf16.mxu1 %v6395_v25  ;;  %5322 = vmatprep.subr.bf16.mxu0 %v5790_v15 }
 0xbba   :  { %v3148_v33 = vpop.f32.mrb[36].mxu1  ;;  %v3219_v46 = vpop.f32.mrb[36].mxu0 }
 0xbbb   :  { %v5438_v32 = vadd.f32 %v3148_v33, %v6551_v2  ;;  %v3150_v30 = vpop.f32.mrb[37].mxu1  ;;  %v4810_v50 = vpop.f32.mrb[37].mxu0  ;;  %v3237_v35 = vadd.f32 %v6562_v34, %v3219_v46 }
 0xbbc   :  { %v5439_v49 = vadd.f32 %v3150_v30, %v6555_v45 }
 0xbbd   :  { %v4295_v52 = vmul.f32 -1.442695, %v5438_v32 }
 0xbbe   :  { %v4296_v58 = vmul.f32 -1.442695, %v5439_v49 }
 0xbbf   :  { %5625 = vpow2.f32 %v4295_v52 }
 0xbc0   :  { %5627 = vpow2.f32 %v4296_v58 }
 0xbc9   :  { %v5626_v53 = vpop.eup %5625 }
 0xbca   :  { %v3227_v37 = vadd.f32 1.0, %v5626_v53  ;;  %v5628_v59 = vpop.eup %5627 }
 0xbcb   :  { %v3234_v21 = vadd.f32 1.0, %v5628_v59 }
 0xbcc   :  { %5629 = vrcp.f32 %v3227_v37 }
 0xbcd   :  { %5631 = vrcp.f32 %v3234_v21 }
 0xbd6   :  { %v5630_v36 = vpop.eup %5629 }
 0xbd7   :  { %v3238_v41 = vmul.f32 %v5630_v36, %v3237_v35  ;;  %v5632_v18 = vpop.eup %5631 }
 0xbd8   :  { %v3241_v47 = vsub.f32 1.0, %v5632_v18  ;;  %v3243_v38 = vmul.f32 %v5632_v18, %v6595_v1 }
 0xbd9   :  { %v3239_v62 = vadd.f32 %v3238_v41, %v6541_v16 }
 0xbdb   :  { %5633 = vtanh.f32 %v3239_v62 }
 0xbe5   :  { %v5634_v61 = vpop.eup %5633 }
 0xbe6   :  { %v3242_v48 = vmul.f32 %v5634_v61, %v3241_v47 }
 0xbe8   :  { %v6625_v5 = vadd.f32 %v3243_v38, %v3242_v48 }
 0xbea   :  { %4298 = vmatmul.mubr.msk.f32.vlgmr.msra.gmra.mrb[38].mxu1 %vm691_vm3, %v6625_v5  ;;  %4828 = vmatmul.mubr.msk.f32.vlgmr.msra.gmra.mrb[38].mxu0 %vm691_vm3, %v6625_v5 }
 0xbeb   :  { %5309 = vmatpush1.bf16.msra.mxu1 %v6431_v43  ;;  %5324 = vmatpush3.bf16.msra.mxu0 %v6425_v13 }
 0xbec   :  { %5311 = vmatprep.subr.bf16.mxu1 %v6434_v11  ;;  %5325 = vmatprep.subr.bf16.mxu0 %v5790_v15 }
 0xbed   :  { %3510 = vmatprep.mubr.f32.mxu1 %v5789_v0  ;;  %4846 = vmatprep.mubr.msk.f32.mxu0 %vm5791_vm2, %v5789_v0 }
 0xbef   :  { %5313 = vmatpush1.bf16.msra.mxu1 %v6448_v56  ;;  %5327 = vmatpush3.bf16.msra.mxu0 %v6437_v8 }
 0xbf0   :  { %5315 = vmatprep.subr.bf16.mxu1 %v6450_v55  ;;  %5328 = vmatprep.subr.bf16.mxu0 %v5790_v15 }
 0xbf3   :  { %5317 = vmatpush1.bf16.msra.mxu1 %v6463_v24  ;;  %5330 = vmatpush3.bf16.msra.mxu0 %v6453_v60 }
 0xbf4   :  { %5319 = vmatprep.subr.bf16.mxu1 %v6467_v42  ;;  %5331 = vmatprep.subr.bf16.mxu0 %v5790_v15 }
 0xbf7   :  { %5321 = vmatpush1.bf16.msra.mxu1 %v6479_v51  ;;  %5333 = vmatpush3.bf16.msra.mxu0 %v6470_v63 }
 0xbf8   :  { %5335 = vmatprep.subr.bf16.mxu1 %v6395_v25  ;;  %5350 = vmatprep.subr.bf16.mxu0 %v5790_v15 }
 0xcbd   :  { %v3330_v16 = vpop.f32.mrb[38].mxu1  ;;  %v3401_v7 = vpop.f32.mrb[38].mxu0 }
 0xcbe   :  { %v5440_v10 = vadd.f32 %v3330_v16, %v6551_v2  ;;  %v3332_v12 = vpop.f32.mrb[39].mxu1  ;;  %v4829_v14 = vpop.f32.mrb[39].mxu0  ;;  %v3419_v29 = vadd.f32 %v6562_v34, %v3401_v7 }
 0xcbf   :  { %v5441_v54 = vadd.f32 %v3332_v12, %v6555_v45 }
 0xcc0   :  { %v4300_v17 = vmul.f32 -1.442695, %v5440_v10 }
 0xcc1   :  { %v4301_v20 = vmul.f32 -1.442695, %v5441_v54 }
 0xcc2   :  { %5635 = vpow2.f32 %v4300_v17 }
 0xcc3   :  { %5637 = vpow2.f32 %v4301_v20 }
 0xccc   :  { %v5636_v23 = vpop.eup %5635 }
 0xccd   :  { %v3409_v26 = vadd.f32 1.0, %v5636_v23  ;;  %v5638_v6 = vpop.eup %5637 }
 0xcce   :  { %v3416_v4 = vadd.f32 1.0, %v5638_v6 }
 0xccf   :  { %5639 = vrcp.f32 %v3409_v26 }
 0xcd0   :  { %5641 = vrcp.f32 %v3416_v4 }
 0xcd9   :  { %v5640_v28 = vpop.eup %5639 }
 0xcda   :  { %v3420_v31 = vmul.f32 %v5640_v28, %v3419_v29  ;;  %v5642_v44 = vpop.eup %5641 }
 0xcdb   :  { %v3423_v3 = vsub.f32 1.0, %v5642_v44  ;;  %v3425_v32 = vmul.f32 %v5642_v44, %v6625_v5 }
 0xcdc   :  { %v3421_v39 = vadd.f32 %v3420_v31, %v6543_v57 }
 0xcde   :  { %5643 = vtanh.f32 %v3421_v39 }
 0xce8   :  { %v5644_v33 = vpop.eup %5643 }
 0xce9   :  { %v3424_v46 = vmul.f32 %v5644_v33, %v3423_v3 }
 0xceb   :  { %v6655_v30 = vadd.f32 %v3425_v32, %v3424_v46 }
 0xced   :  { %4303 = vmatmul.mubr.msk.f32.vlgmr.msra.gmra.mrb[40].mxu1 %vm691_vm3, %v6655_v30  ;;  %4847 = vmatmul.mubr.msk.f32.vlgmr.msra.gmra.mrb[40].mxu0 %vm691_vm3, %v6655_v30 }
 0xcee   :  { %5337 = vmatpush1.bf16.msra.mxu1 %v6431_v43  ;;  %5352 = vmatpush3.bf16.msra.mxu0 %v6425_v13 }
 0xcef   :  { %5339 = vmatprep.subr.bf16.mxu1 %v6434_v11  ;;  %5353 = vmatprep.subr.bf16.mxu0 %v5790_v15 }
 0xcf0   :  { %3692 = vmatprep.mubr.f32.mxu1 %v5789_v0  ;;  %4865 = vmatprep.mubr.msk.f32.mxu0 %vm5791_vm2, %v5789_v0 }
 0xcf2   :  { %5341 = vmatpush1.bf16.msra.mxu1 %v6448_v56  ;;  %5355 = vmatpush3.bf16.msra.mxu0 %v6437_v8 }
 0xcf3   :  { %5343 = vmatprep.subr.bf16.mxu1 %v6450_v55  ;;  %5356 = vmatprep.subr.bf16.mxu0 %v5790_v15 }
 0xcf6   :  { %5345 = vmatpush1.bf16.msra.mxu1 %v6463_v24  ;;  %5358 = vmatpush3.bf16.msra.mxu0 %v6453_v60 }
 0xcf7   :  { %5347 = vmatprep.subr.bf16.mxu1 %v6467_v42  ;;  %5359 = vmatprep.subr.bf16.mxu0 %v5790_v15 }
 0xcfa   :  { %5349 = vmatpush1.bf16.msra.mxu1 %v6479_v51  ;;  %5361 = vmatpush3.bf16.msra.mxu0 %v6470_v63 }
 0xcfb   :  { %5363 = vmatprep.subr.bf16.mxu1 %v6395_v25  ;;  %5378 = vmatprep.subr.bf16.mxu0 %v5790_v15 }
 0xdc0   :  { %v3512_v57 = vpop.f32.mrb[40].mxu1  ;;  %v3583_v50 = vpop.f32.mrb[40].mxu0 }
 0xdc1   :  { %v5442_v52 = vadd.f32 %v3512_v57, %v6551_v2  ;;  %v3514_v49 = vpop.f32.mrb[41].mxu1  ;;  %v4848_v58 = vpop.f32.mrb[41].mxu0  ;;  %v3601_v62 = vadd.f32 %v6562_v34, %v3583_v50 }
 0xdc2   :  { %v5443_v37 = vadd.f32 %v3514_v49, %v6555_v45 }
 0xdc3   :  { %v4305_v53 = vmul.f32 -1.442695, %v5442_v52 }
 0xdc4   :  { %v4306_v59 = vmul.f32 -1.442695, %v5443_v37 }
 0xdc5   :  { %5645 = vpow2.f32 %v4305_v53 }
 0xdc6   :  { %5647 = vpow2.f32 %v4306_v59 }
 0xdcf   :  { %v5646_v21 = vpop.eup %5645 }
 0xdd0   :  { %v3591_v35 = vadd.f32 1.0, %v5646_v21  ;;  %v5648_v36 = vpop.eup %5647 }
 0xdd1   :  { %v3598_v41 = vadd.f32 1.0, %v5648_v36 }
 0xdd2   :  { %5649 = vrcp.f32 %v3591_v35 }
 0xdd3   :  { %5651 = vrcp.f32 %v3598_v41 }
 0xddc   :  { %v5650_v18 = vpop.eup %5649 }
 0xddd   :  { %v3602_v47 = vmul.f32 %v5650_v18, %v3601_v62  ;;  %v5652_v48 = vpop.eup %5651 }
 0xdde   :  { %v3605_v38 = vsub.f32 1.0, %v5652_v48  ;;  %v3607_v10 = vmul.f32 %v5652_v48, %v6655_v30 }
 0xddf   :  { %v3603_v61 = vadd.f32 %v3602_v47, %v6535_v22 }
 0xde1   :  { %5653 = vtanh.f32 %v3603_v61 }
 0xdeb   :  { %v5654_v16 = vpop.eup %5653 }
 0xdec   :  { %v3606_v7 = vmul.f32 %v5654_v16, %v3605_v38 }
 0xdee   :  { %v6685_v12 = vadd.f32 %v3607_v10, %v3606_v7 }
 0xdf0   :  { %4308 = vmatmul.mubr.msk.f32.vlgmr.msra.gmra.mrb[42].mxu1 %vm691_vm3, %v6685_v12  ;;  %4866 = vmatmul.mubr.msk.f32.vlgmr.msra.gmra.mrb[42].mxu0 %vm691_vm3, %v6685_v12 }
 0xdf1   :  { %5365 = vmatpush1.bf16.msra.mxu1 %v6431_v43  ;;  %5380 = vmatpush3.bf16.msra.mxu0 %v6425_v13 }
 0xdf2   :  { %5367 = vmatprep.subr.bf16.mxu1 %v6434_v11  ;;  %5381 = vmatprep.subr.bf16.mxu0 %v5790_v15 }
 0xdf3   :  { %3874 = vmatprep.mubr.f32.mxu1 %v5789_v0  ;;  %4884 = vmatprep.mubr.msk.f32.mxu0 %vm5791_vm2, %v5789_v0 }
 0xdf5   :  { %5369 = vmatpush1.bf16.msra.mxu1 %v6448_v56  ;;  %5383 = vmatpush3.bf16.msra.mxu0 %v6437_v8 }
 0xdf6   :  { %5371 = vmatprep.subr.bf16.mxu1 %v6450_v55  ;;  %5384 = vmatprep.subr.bf16.mxu0 %v5790_v15 }
 0xdf9   :  { %5373 = vmatpush1.bf16.msra.mxu1 %v6463_v24  ;;  %5386 = vmatpush3.bf16.msra.mxu0 %v6453_v60 }
 0xdfa   :  { %5375 = vmatprep.subr.bf16.mxu1 %v6467_v42  ;;  %5387 = vmatprep.subr.bf16.mxu0 %v5790_v15 }
 0xdfd   :  { %5377 = vmatpush1.bf16.msra.mxu1 %v6479_v51  ;;  %5389 = vmatpush3.bf16.msra.mxu0 %v6470_v63 }
 0xdfe   :  { %5391 = vmatprep.subr.bf16.mxu1 %v6395_v25  ;;  %5406 = vmatprep.subr.bf16.mxu0 %v5790_v15 }
 0xec3   :  { %v3694_v22 = vpop.f32.mrb[42].mxu1  ;;  %v3765_v14 = vpop.f32.mrb[42].mxu0 }
 0xec4   :  { %v5444_v17 = vadd.f32 %v3694_v22, %v6551_v2  ;;  %v3696_v54 = vpop.f32.mrb[43].mxu1  ;;  %v4867_v20 = vpop.f32.mrb[43].mxu0  ;;  %v3783_v25 = vadd.f32 %v6562_v34, %v3765_v14 }
 0xec5   :  { %v5445_v26 = vadd.f32 %v3696_v54, %v6555_v45  ;;  %v4292_v20 = vld [vmem:[%s6797_s11 + $0x1] ss:$0 sm:$0xff] }
 0xec6   :  { %v4310_v23 = vmul.f32 -1.442695, %v5444_v17 }
 0xec7   :  { %v4311_v6 = vmul.f32 -1.442695, %v5445_v26  ;;  %v4302_v26 = vld [vmem:[%s6797_s11 + $0x3] ss:$0 sm:$0xff] }
 0xec8   :  { %5655 = vpow2.f32 %v4310_v23  ;;  %v4297_v23 = vld [vmem:[%s6797_s11 + $0x2] ss:$0 sm:$0xff] }
 0xec9   :  { %5657 = vpow2.f32 %v4311_v6  ;;  %v3250_v6 = vmul.f32 %v4297_v23, %v6625_v5 }
 0xed2   :  { %v5656_v4 = vpop.eup %5655 }
 0xed3   :  { %v3773_v29 = vadd.f32 1.0, %v5656_v4  ;;  %v5658_v28 = vpop.eup %5657  ;;  %v4307_v4 = vld [vmem:[%s6797_s11 + $0x4] ss:$0 sm:$0xff] }
 0xed4   :  { %v3780_v31 = vadd.f32 1.0, %v5658_v28  ;;  %v3432_v28 = vmul.f32 %v4302_v26, %v6655_v30 }
 0xed5   :  { %5659 = vrcp.f32 %v3773_v29 }
 0xed6   :  { %5661 = vrcp.f32 %v3780_v31 }
 0xedf   :  { %v5660_v39 = vpop.eup %5659 }
 0xee0   :  { %v3784_v44 = vmul.f32 %v5660_v39, %v3783_v25  ;;  %v5662_v33 = vpop.eup %5661  ;;  %v3614_v39 = vmul.f32 %v4307_v4, %v6685_v12 }
 0xee1   :  { %v3787_v46 = vsub.f32 1.0, %v5662_v33  ;;  %v3789_v50 = vmul.f32 %v5662_v33, %v6685_v12 }
 0xee2   :  { %v3785_v3 = vadd.f32 %v3784_v44, %v6537_v19 }
 0xee4   :  { %5663 = vtanh.f32 %v3785_v3 }
 0xeee   :  { %v5664_v32 = vpop.eup %5663 }
 0xeef   :  { %v3788_v57 = vmul.f32 %v5664_v32, %v3787_v46 }
 0xef1   :  { %v6715_v52 = vadd.f32 %v3789_v50, %v3788_v57  ;;  %v4322_v50 = vld [vmem:[%s6797_s11 + $0x7] ss:$0 sm:$0xff] }
 0xef3   :  { %4313 = vmatmul.mubr.msk.f32.vlgmr.msra.gmra.mrb[44].mxu1 %vm691_vm3, %v6715_v52  ;;  %4885 = vmatmul.mubr.msk.f32.vlgmr.msra.gmra.mrb[44].mxu0 %vm691_vm3, %v6715_v52 }
 0xef4   :  { %5393 = vmatpush1.bf16.msra.mxu1 %v6431_v43  ;;  %5408 = vmatpush3.bf16.msra.mxu0 %v6425_v13 }
 0xef5   :  { %5395 = vmatprep.subr.bf16.mxu1 %v6434_v11  ;;  %5409 = vmatprep.subr.bf16.mxu0 %v5790_v15 }
 0xef6   :  { %4056 = vmatprep.mubr.f32.mxu1 %v5789_v0  ;;  %4903 = vmatprep.mubr.msk.f32.mxu0 %vm5791_vm2, %v5789_v0 }
 0xef8   :  { %5397 = vmatpush1.bf16.msra.mxu1 %v6448_v56  ;;  %5411 = vmatpush3.bf16.msra.mxu0 %v6437_v8 }
 0xef9   :  { %5399 = vmatprep.subr.bf16.mxu1 %v6450_v55  ;;  %5412 = vmatprep.subr.bf16.mxu0 %v5790_v15 }
 0xefc   :  { %5401 = vmatpush1.bf16.msra.mxu1 %v6463_v24  ;;  %5414 = vmatpush3.bf16.msra.mxu0 %v6453_v60 }
 0xefd   :  { %5403 = vmatprep.subr.bf16.mxu1 %v6467_v42  ;;  %5415 = vmatprep.subr.bf16.mxu0 %v5790_v15 }
 0xf00   :  { %5405 = vmatpush1.bf16.msra.mxu1 %v6479_v51  ;;  %5417 = vmatpush3.bf16.msra.mxu0 %v6470_v63 }
 0xfc6   :  { %v3876_v0 = vpop.f32.mrb[44].mxu1  ;;  %v3947_v13 = vpop.f32.mrb[44].mxu0 }
 0xfc7   :  { %v5446_v43 = vadd.f32 %v3876_v0, %v6551_v2  ;;  %v3878_v11 = vpop.f32.mrb[45].mxu1  ;;  %v4886_v8 = vpop.f32.mrb[45].mxu0  ;;  %v3965_v51 = vadd.f32 %v6562_v34, %v3947_v13 }
 0xfc8   :  { %v5447_v55 = vadd.f32 %v3878_v11, %v6555_v45 }
 0xfc9   :  { %v4315_v56 = vmul.f32 -1.442695, %v5446_v43 }
 0xfca   :  { %v4316_v24 = vmul.f32 -1.442695, %v5447_v55 }
 0xfcb   :  { %5665 = vpow2.f32 %v4315_v56 }
 0xfcc   :  { %5667 = vpow2.f32 %v4316_v24 }
 0xfd5   :  { %v5666_v60 = vpop.eup %5665 }
 0xfd6   :  { %v3955_v42 = vadd.f32 1.0, %v5666_v60  ;;  %v5668_v15 = vpop.eup %5667 }
 0xfd7   :  { %v3962_v19 = vadd.f32 1.0, %v5668_v15 }
 0xfd8   :  { %5669 = vrcp.f32 %v3955_v42 }
 0xfd9   :  { %5671 = vrcp.f32 %v3962_v19 }
 0xfe2   :  { %v5670_v63 = vpop.eup %5669 }
 0xfe3   :  { %v3966_v49 = vmul.f32 %v5670_v63, %v3965_v51  ;;  %v5672_v53 = vpop.eup %5671 }
 0xfe4   :  { %v3969_v37 = vsub.f32 1.0, %v5672_v53  ;;  %v3971_v35 = vmul.f32 %v5672_v53, %v6715_v52 }
 0xfe5   :  { %v3967_v58 = vadd.f32 %v3966_v49, %v6529_v40 }
 0xfe7   :  { %5673 = vtanh.f32 %v3967_v58 }
 0xff1   :  { %v5674_v59 = vpop.eup %5673 }
 0xff2   :  { %v3970_v21 = vmul.f32 %v5674_v59, %v3969_v37 }
 0xff4   :  { %v3972_v36 = vadd.f32 %v3971_v35, %v3970_v21 }
 0xff6   :  { %4318 = vmatmul.mubr.msk.f32.vlgmr.msra.gmra.mrb[46].mxu1 %vm691_vm3, %v3972_v36  ;;  %4904 = vmatmul.mubr.msk.f32.vlgmr.msra.gmra.mrb[46].mxu0 %vm691_vm3, %v3972_v36 }
0x10c9   :  { %v4058_v41 = vpop.f32.mrb[46].mxu1  ;;  %v4129_v62 = vpop.f32.mrb[46].mxu0 }
0x10ca   :  { %v5448_v18 = vadd.f32 %v4058_v41, %v6551_v2  ;;  %v4060_v47 = vpop.f32.mrb[47].mxu1  ;;  %v4905_v61 = vpop.f32.mrb[47].mxu0  ;;  %v4147_v14 = vadd.f32 %v6562_v34, %v4129_v62  ;;  %v3068_v34 = vmul.f32 %v4292_v20, %v6595_v1  ;;  %v4312_v1 = vld [vmem:[%s6797_s11 + $0x5] ss:$0 sm:$0xff] }
0x10cb   :  { %v5449_v40 = vadd.f32 %v4060_v47, %v6555_v45  ;;  %v4287_v45 = vld [vmem:[%s6797_s11] ss:$0 sm:$0xff]  ;;  %v3796_v44 = vmul.f32 %v4312_v1, %v6715_v52  ;;  %v4166_v52 = vstv %s6798_s12 }
0x10cc   :  { %v4320_v48 = vmul.f32 -1.442695, %v5448_v18 }
0x10cd   :  { %v4321_v38 = vmul.f32 -1.442695, %v5449_v40 }
0x10ce   :  { %5675 = vpow2.f32 %v4320_v48 }
0x10cf   :  { %5677 = vpow2.f32 %v4321_v38 }
0x10d8   :  { %v5676_v16 = vpop.eup %5675 }
0x10d9   :  { %v4137_v7 = vadd.f32 1.0, %v5676_v16  ;;  %v5678_v10 = vpop.eup %5677 }
0x10da   :  { %v4144_v22 = vadd.f32 1.0, %v5678_v10 }
0x10db   :  { %5679 = vrcp.f32 %v4137_v7 }
0x10dc   :  { %5681 = vrcp.f32 %v4144_v22 }
0x10e5   :  { %v5680_v17 = vpop.eup %5679 }
0x10e6   :  { %v4148_v54 = vmul.f32 %v5680_v17, %v4147_v14  ;;  %v5682_v31 = vpop.eup %5681 }
0x10e7   :  { %v4151_v3 = vsub.f32 1.0, %v5682_v31  ;;  %v4153_v57 = vmul.f32 %v5682_v31, %v3972_v36 }
0x10e8   :  { %v4149_v2 = vadd.f32 %v4148_v54, %v6531_v9  ;;  %v2886_v9 = vmul.f32 %v4287_v45, %v6565_v27  ;;  %v4317_v27 = vld [vmem:[%s6797_s11 + $0x6] ss:$0 sm:$0xff] }
0x10e9   :  { %v3978_v32 = vmul.f32 %v4317_v27, %v3972_v36 }
0x10ea   :  { %5683 = vtanh.f32 %v4149_v2  ;;  %v3069_v29 = vadd.f32 %v3068_v34, %v2886_v9 }
0x10ec   :  { %v3251_v25 = vadd.f32 %v3250_v6, %v3069_v29 }
0x10ee   :  { %v3433_v5 = vadd.f32 %v3432_v28, %v3251_v25 }
0x10f0   :  { %v3615_v46 = vadd.f32 %v3614_v39, %v3433_v5 }
0x10f2   :  { %v3797_v0 = vadd.f32 %v3796_v44, %v3615_v46 }
0x10f4   :  { %v5684_v33 = vpop.eup %5683  ;;  %v3979_v12 = vadd.f32 %v3978_v32, %v3797_v0 }
0x10f5   :  { %v4152_v30 = vmul.f32 %v5684_v33, %v4151_v3 }
0x10f7   :  { %v4154_v13 = vadd.f32 %v4153_v57, %v4152_v30 }
0x10f9   :  { %v4160_v43 = vmul.f32 %v4322_v50, %v4154_v13 }
0x10fb   :  { %v4161_v11 = vadd.f32 %v4160_v43, %v3979_v12 }
0x10fd   :  { %v4162_v8 = vsel %vm691_vm3, %v4161_v11, 0.0 }
0x10fe   :  { %4163 = vadd.xlane.f32.xlu0 %v4162_v8 }
0x118b   :  { %v4164_v56 = vpop.xlane.xlu0 %4163 }
0x118c   :  { %v4167_v55 = vadd.f32 %v4166_v52, %v4164_v56 }
0x118e   :  { %v4323_v24 = vmul.f32 -1.442695, %v4167_v55 }
0x1190   :  { %5685 = vpow2.f32 %v4323_v24 }
0x119a   :  { %v5686_v60 = vpop.eup %5685 }
0x119b   :  { %v4171_v42 = vadd.f32 1.0, %v5686_v60 }
0x119d   :  { %5687 = vrcp.f32 %v4171_v42 }
0x11a7   :  { %v5688_v15 = vpop.eup %5687 }
0x11a8   :  { %4175 = vst.msk [vmem:[%s6799_s13] sm:$0x3] %vm4174_vm4, %v5688_v15 }
0x11a9   :  { %4180 = vsyncpa [#allocation7], 1 }
0x11aa   :  { %4181 = vsyncpa [#allocation9], 1 }
0x11ab   :  { %4182 = vsyncpa [#allocation12], 1 }

</bundles_post_ra>
